<compile_context>
chip_gen: v6e
topology: v6e:2x2x1
jax: 0.10.0
libtpu: 0.0.40
codegen_flags: <defaults>
</compile_context>

<pallas_src>
import functools

import numpy as np
import jax
import jax.numpy as jnp
from jax import lax
from jax.experimental import pallas as pl
from jax.experimental.pallas import tpu as pltpu

_EPS = 1e-5
_HI = jax.lax.Precision.HIGHEST          # used only by the pure-JAX reference
_VMEM = pl.BlockSpec(memory_space=pltpu.MemorySpace.VMEM)


def _round8(n):
    return -(-n // 8) * 8


# --------------------- 0/1 tap-selection matrices (host constants) --------------------- #

@functools.lru_cache(maxsize=None)
def _build_tap_selectors(spatial, n_batch, in_rows, rows_per_phase):
    """sel[t] @ A gathers, for every 3x3-conv output position of a spatial x spatial grid
    (output rows ordered phase-major: (pool_phase_h, pool_phase_w, n, oh, ow)), tap t of
    the zero-padded input A whose real rows are stored row-major (n, h, w).
    All-zero selector rows encode the conv's padding=1 and any sublane row-padding.
    rows_per_phase is a multiple of 8 so the in-kernel phase-max only touches
    sublane-aligned row slices.  Built fully vectorized (no Python loops)."""
    S, Q = spatial, spatial // 2
    sel = np.zeros((9, 4 * rows_per_phase, in_rows), np.float32)
    a, b, n, oh, ow, dh, dw = np.meshgrid(
        np.arange(2), np.arange(2), np.arange(n_batch),
        np.arange(Q), np.arange(Q), np.arange(3), np.arange(3), indexing="ij")
    hs = 2 * oh + a + dh - 1
    ws = 2 * ow + b + dw - 1
    valid = (hs >= 0) & (hs < S) & (ws >= 0) & (ws < S)
    tap = (dh * 3 + dw)[valid]
    r_out = ((a * 2 + b) * rows_per_phase + (n * Q + oh) * Q + ow)[valid]
    r_in = ((n * S + hs) * S + ws)[valid]
    sel[tap, r_out, r_in] = 1.0
    return sel


# ----------------------------------- Pallas kernel ------------------------------------- #

def _cnn_terminate_kernel(
        x1_ref,                                          # (4*P1, 9)  phase-major im2col of z-scored input
        w1_ref, b1_ref, sc1_ref, sh1_ref,                # block 1 (Wmat, bias, BN scale, BN shift)
        sel2_ref, w2_ref, b2_ref, sc2_ref, sh2_ref,      # block 2 (+ tap selectors)
        sel3_ref, w3_ref, b3_ref, sc3_ref, sh3_ref,      # block 3
        sel4_ref, w4_ref, b4_ref, sc4_ref, sh4_ref,      # block 4
        hw1_ref, hb1_ref, hw2_ref, hb2_ref,              # MLP head
        o_ref):
    f32 = jnp.float32

    def conv_bn_pool(lhs, w_ref, b_ref, sc_ref, sh_ref):
        # ONE MXU matmul per block: (4*P, 9*Cin) @ (9*Cin, Cout), f32 accumulation.
        y = jnp.dot(lhs, w_ref[...], preferred_element_type=f32)
        y = jnp.maximum(y + b_ref[...], 0.0)             # conv bias + ReLU
        y = y * sc_ref[...] + sh_ref[...]                # folded BatchNorm2d (eval)
        q = y.shape[0] // 4                              # MaxPool2d(2,2): max over 4 phase row-blocks
        return jnp.maximum(jnp.maximum(y[0:q], y[q:2 * q]),
                           jnp.maximum(y[2 * q:3 * q], y[3 * q:4 * q]))
        # Dropout(p=0) is the identity.

    def im2col(sel_ref, a):
        # In-kernel im2col: 0/1 selection matmuls gather the 9 shifted/zero-padded taps
        # in phase-major row order; lane-concat builds the (rows, 9*Cin) LHS.
        taps = [jnp.dot(sel_ref[t], a, preferred_element_type=f32) for t in range(9)]
        return jnp.concatenate(taps, axis=1)

    a = conv_bn_pool(x1_ref[...], w1_ref, b1_ref, sc1_ref, sh1_ref)           # (N*64, 64)
    a = conv_bn_pool(im2col(sel2_ref, a), w2_ref, b2_ref, sc2_ref, sh2_ref)   # (N*16, 64)
    a = conv_bn_pool(im2col(sel3_ref, a), w3_ref, b3_ref, sc3_ref, sh3_ref)   # (N*4,  64)
    f = conv_bn_pool(im2col(sel4_ref, a), w4_ref, b4_ref, sc4_ref, sh4_ref)   # (8, 64); rows >= N are padding

    # Head: Linear(64,64) -> ReLU -> Dropout(0) -> Linear(64,1).  The 64->1 projection is
    # a VPU multiply + XLU lane reduction (no 1-lane-wide MXU pass).
    h = jnp.maximum(jnp.dot(f, hw1_ref[...], preferred_element_type=f32) + hb1_ref[...], 0.0)
    o_ref[...] = jnp.sum(h * hw2_ref[...], axis=1, keepdims=True) + hb2_ref[...]


# ------------------------------------ glue wrapper -------------------------------------- #

def _fold_block_params(blk):
    w, b, gamma, beta, mean, var = blk                   # w is HWIO (3,3,Cin,Cout)
    cin, cout = w.shape[2], w.shape[3]
    scale = gamma * lax.rsqrt(var + _EPS)
    shift = beta - mean * scale
    return (w.reshape(9 * cin, cout), b.reshape(1, cout),
            scale.reshape(1, cout), shift.reshape(1, cout))


@jax.jit
def cnn_terminate_forward(x_nchw, params):
    # TODO(synk): `downsize=True` bilinear F.interpolate branch not implemented (default is False).
    N, C, H, W = x_nchw.shape
    assert C == 1 and H == 16 and W == 16, "plan specialized to 1x16x16 canvases"

    # Plain-JAX glue (fused by XLA): zscore_canvases + conv zero-pad + block-1 im2col.
    xz = (x_nchw[:, 0] - 0.0574) / 0.2084                          # (N,16,16)
    xp = jnp.pad(xz, ((0, 0), (1, 1), (1, 1)))                     # padding=1 zeros (not z-scored)
    taps = [xp[:, dh:dh + H, dw:dw + W] for dh in range(3) for dw in range(3)]
    t = jnp.stack(taps, axis=-1)                                   # (N,16,16,9)
    # phase-major rows (ph, pw, n, oh, ow) so maxpool = max over 4 contiguous row blocks.
    x1 = (t.reshape(N, 8, 2, 8, 2, 9)
           .transpose(2, 4, 0, 1, 3, 5)
           .reshape(4 * N * 64, 9))

    # Rows-per-phase for each block (padded up to sublane multiples where needed).
    rpp1 = N * 64                                                  # 16x16 -> 8x8
    rpp2 = _round8(N * 16)                                         # 8x8   -> 4x4
    rpp3 = _round8(N * 4)                                          # 4x4   -> 2x2
    rpp4 = _round8(N * 1)                                          # 2x2   -> 1x1

    # Shape-only 0/1 selector constants (memoized; built once per shape at trace time).
    # TODO(synk): selectors scale O(rows_in * rows_out); for large batches switch to a
    # grid over the pooled-pixel rows (dimension_semantics=("parallel",)) instead.
    sel2 = jnp.asarray(_build_tap_selectors(8, N, rpp1, rpp2))
    sel3 = jnp.asarray(_build_tap_selectors(4, N, rpp2, rpp3))
    sel4 = jnp.asarray(_build_tap_selectors(2, N, rpp3, rpp4))

    b1 = _fold_block_params(params["blocks"][0])
    b2 = _fold_block_params(params["blocks"][1])
    b3 = _fold_block_params(params["blocks"][2])
    b4 = _fold_block_params(params["blocks"][3])

    out = pl.pallas_call(
        _cnn_terminate_kernel,
        out_shape=jax.ShapeDtypeStruct((rpp4, 1), jnp.float32),
        in_specs=[_VMEM] * 24,
        out_specs=_VMEM,
    )(x1,
      *b1,
      sel2, *b2,
      sel3, *b3,
      sel4, *b4,
      params["w1"], params["b1"].reshape(1, -1),
      params["w2"].reshape(1, -1), params["b2"].reshape(1, 1))
    return out[:N, 0]                                              # .squeeze(-1)


# ------------------------- deterministic parameter creation ----------------------------- #

def init_params(key):
    chans = [(1, 64), (64, 64), (64, 64), (64, 64)]
    blocks = []
    for cin, cout in chans:
        key, k1, k2, k3, k4, k5, k6 = jax.random.split(key, 7)
        w = 0.1 * jax.random.normal(k1, (3, 3, cin, cout), jnp.float32)     # HWIO
        b = 0.1 * jax.random.normal(k2, (cout,), jnp.float32)
        gamma = 1.0 + 0.1 * jax.random.normal(k3, (cout,), jnp.float32)
        beta = 0.1 * jax.random.normal(k4, (cout,), jnp.float32)
        mean = 0.1 * jax.random.normal(k5, (cout,), jnp.float32)
        var = 0.5 + 0.3 * jnp.abs(jax.random.normal(k6, (cout,), jnp.float32))
        blocks.append((w, b, gamma, beta, mean, var))
    key, k1, k2, k3, k4 = jax.random.split(key, 5)
    return {
        "blocks": blocks,
        "w1": 0.1 * jax.random.normal(k1, (64, 64), jnp.float32),
        "b1": 0.1 * jax.random.normal(k2, (64,), jnp.float32),
        "w2": 0.1 * jax.random.normal(k3, (64, 1), jnp.float32),
        "b2": 0.1 * jax.random.normal(k4, (1,), jnp.float32),
    }


# -------------------------------- pure-JAX reference ------------------------------------ #

def reference_forward(x_nchw, params):
    x = (x_nchw - 0.0574) / 0.2084
    x = jnp.transpose(x, (0, 2, 3, 1))
    for (w, b, gamma, beta, mean, var) in params["blocks"]:
        y = lax.conv_general_dilated(
            x, w, (1, 1), ((1, 1), (1, 1)),
            dimension_numbers=("NHWC", "HWIO", "NHWC"), precision=_HI)
        y = jnp.maximum(y + b, 0.0)
        y = (y - mean) / jnp.sqrt(var + _EPS) * gamma + beta
        x = lax.reduce_window(y, -jnp.inf, lax.max, (1, 2, 2, 1), (1, 2, 2, 1), "VALID")
    feat = x.reshape(x.shape[0], -1)
    h = jnp.maximum(feat @ params["w1"] + params["b1"], 0.0)
    return (h @ params["w2"] + params["b2"])[:, 0]


# --------------------------------------- main -------------------------------------------- #

if __name__ == "__main__":
    key = jax.random.PRNGKey(0)
    kx, kp = jax.random.split(key)
    params = init_params(kp)

    # batch=2, 1 channel, 16x16 canvas (16 -> 8 -> 4 -> 2 -> 1 through 4 maxpools).
    x = jax.random.uniform(kx, (2, 1, 16, 16), dtype=jnp.float32)

    y = cnn_terminate_forward(x, params)
    y = jax.block_until_ready(y)

    y_ref = reference_forward(x, params)
    # Kernel matmuls use the default MXU precision (no HIGHEST), so allow a slightly
    # looser tolerance than pure-f32 would need.
    np.testing.assert_allclose(np.asarray(y), np.asarray(y_ref), rtol=3e-2, atol=3e-2)

    print("KERNEL_OK")
</pallas_src>

<mosaic_0001>
module attributes {stable_mosaic.version = 11 : i64} {
  func.func @_cnn_terminate_kernel(%arg0: memref<512x9xf32, #tpu.memory_space<vmem>>, %arg1: memref<9x64xf32, #tpu.memory_space<vmem>>, %arg2: memref<1x64xf32, #tpu.memory_space<vmem>>, %arg3: memref<1x64xf32, #tpu.memory_space<vmem>>, %arg4: memref<1x64xf32, #tpu.memory_space<vmem>>, %arg5: memref<9x128x128xf32, #tpu.memory_space<vmem>>, %arg6: memref<576x64xf32, #tpu.memory_space<vmem>>, %arg7: memref<1x64xf32, #tpu.memory_space<vmem>>, %arg8: memref<1x64xf32, #tpu.memory_space<vmem>>, %arg9: memref<1x64xf32, #tpu.memory_space<vmem>>, %arg10: memref<9x32x32xf32, #tpu.memory_space<vmem>>, %arg11: memref<576x64xf32, #tpu.memory_space<vmem>>, %arg12: memref<1x64xf32, #tpu.memory_space<vmem>>, %arg13: memref<1x64xf32, #tpu.memory_space<vmem>>, %arg14: memref<1x64xf32, #tpu.memory_space<vmem>>, %arg15: memref<9x32x8xf32, #tpu.memory_space<vmem>>, %arg16: memref<576x64xf32, #tpu.memory_space<vmem>>, %arg17: memref<1x64xf32, #tpu.memory_space<vmem>>, %arg18: memref<1x64xf32, #tpu.memory_space<vmem>>, %arg19: memref<1x64xf32, #tpu.memory_space<vmem>>, %arg20: memref<64x64xf32, #tpu.memory_space<vmem>>, %arg21: memref<1x64xf32, #tpu.memory_space<vmem>>, %arg22: memref<1x64xf32, #tpu.memory_space<vmem>>, %arg23: memref<1x1xf32, #tpu.memory_space<vmem>>, %arg24: memref<8x1xf32, #tpu.memory_space<vmem>>) attributes {dimension_semantics = [], scalar_prefetch = 0 : i64, scratch_operands = 0 : i64, tpu.core_type = #tpu.core_type<tc>} {
    %c0 = arith.constant 0 : index
    %c0_0 = arith.constant 0 : index
    %0 = vector.load %arg0[%c0, %c0_0] : memref<512x9xf32, #tpu.memory_space<vmem>>, vector<512x9xf32>
    %c0_1 = arith.constant 0 : index
    %c0_2 = arith.constant 0 : index
    %1 = vector.load %arg1[%c0_1, %c0_2] : memref<9x64xf32, #tpu.memory_space<vmem>>, vector<9x64xf32>
    %cst = arith.constant dense<0.000000e+00> : vector<512x64xf32>
    %2 = tpu.matmul %0, %1, %cst {dimension_numbers = #tpu.dot_dimension_numbers<[1], [0], [0], [1], [0, 0, 1, 1], [], []>} : vector<512x9xf32>, vector<9x64xf32>, vector<512x64xf32> -> vector<512x64xf32>
    %c0_3 = arith.constant 0 : index
    %c0_4 = arith.constant 0 : index
    %3 = vector.load %arg2[%c0_3, %c0_4] : memref<1x64xf32, #tpu.memory_space<vmem>>, vector<1x64xf32>
    %4 = vector.broadcast %3 : vector<1x64xf32> to vector<512x64xf32>
    %5 = arith.addf %2, %4 : vector<512x64xf32>
    %cst_5 = arith.constant 0.000000e+00 : f32
    %6 = vector.broadcast %cst_5 : f32 to vector<512x64xf32>
    %7 = arith.maximumf %5, %6 : vector<512x64xf32>
    %c0_6 = arith.constant 0 : index
    %c0_7 = arith.constant 0 : index
    %8 = vector.load %arg3[%c0_6, %c0_7] : memref<1x64xf32, #tpu.memory_space<vmem>>, vector<1x64xf32>
    %9 = vector.broadcast %8 : vector<1x64xf32> to vector<512x64xf32>
    %10 = arith.mulf %7, %9 : vector<512x64xf32>
    %c0_8 = arith.constant 0 : index
    %c0_9 = arith.constant 0 : index
    %11 = vector.load %arg4[%c0_8, %c0_9] : memref<1x64xf32, #tpu.memory_space<vmem>>, vector<1x64xf32>
    %12 = vector.broadcast %11 : vector<1x64xf32> to vector<512x64xf32>
    %13 = arith.addf %10, %12 : vector<512x64xf32>
    %14 = vector.extract_strided_slice %13 {offsets = [0, 0], sizes = [128, 64], strides = [1, 1]} : vector<512x64xf32> to vector<128x64xf32>
    %15 = vector.extract_strided_slice %13 {offsets = [128, 0], sizes = [128, 64], strides = [1, 1]} : vector<512x64xf32> to vector<128x64xf32>
    %16 = arith.maximumf %14, %15 : vector<128x64xf32>
    %17 = vector.extract_strided_slice %13 {offsets = [256, 0], sizes = [128, 64], strides = [1, 1]} : vector<512x64xf32> to vector<128x64xf32>
    %18 = vector.extract_strided_slice %13 {offsets = [384, 0], sizes = [128, 64], strides = [1, 1]} : vector<512x64xf32> to vector<128x64xf32>
    %19 = arith.maximumf %17, %18 : vector<128x64xf32>
    %20 = arith.maximumf %16, %19 : vector<128x64xf32>
    %c0_10 = arith.constant 0 : index
    %c0_11 = arith.constant 0 : index
    %c0_12 = arith.constant 0 : index
    %21 = vector.load %arg5[%c0_10, %c0_11, %c0_12] : memref<9x128x128xf32, #tpu.memory_space<vmem>>, vector<1x128x128xf32>
    %22 = vector.shape_cast %21 : vector<1x128x128xf32> to vector<128x128xf32>
    %cst_13 = arith.constant dense<0.000000e+00> : vector<128x64xf32>
    %23 = tpu.matmul %22, %20, %cst_13 {dimension_numbers = #tpu.dot_dimension_numbers<[1], [0], [0], [1], [0, 0, 1, 1], [], []>} : vector<128x128xf32>, vector<128x64xf32>, vector<128x64xf32> -> vector<128x64xf32>
    %c1 = arith.constant 1 : index
    %c0_14 = arith.constant 0 : index
    %c0_15 = arith.constant 0 : index
    %24 = vector.load %arg5[%c1, %c0_14, %c0_15] : memref<9x128x128xf32, #tpu.memory_space<vmem>>, vector<1x128x128xf32>
    %25 = vector.shape_cast %24 : vector<1x128x128xf32> to vector<128x128xf32>
    %cst_16 = arith.constant dense<0.000000e+00> : vector<128x64xf32>
    %26 = tpu.matmul %25, %20, %cst_16 {dimension_numbers = #tpu.dot_dimension_numbers<[1], [0], [0], [1], [0, 0, 1, 1], [], []>} : vector<128x128xf32>, vector<128x64xf32>, vector<128x64xf32> -> vector<128x64xf32>
    %c2 = arith.constant 2 : index
    %c0_17 = arith.constant 0 : index
    %c0_18 = arith.constant 0 : index
    %27 = vector.load %arg5[%c2, %c0_17, %c0_18] : memref<9x128x128xf32, #tpu.memory_space<vmem>>, vector<1x128x128xf32>
    %28 = vector.shape_cast %27 : vector<1x128x128xf32> to vector<128x128xf32>
    %cst_19 = arith.constant dense<0.000000e+00> : vector<128x64xf32>
    %29 = tpu.matmul %28, %20, %cst_19 {dimension_numbers = #tpu.dot_dimension_numbers<[1], [0], [0], [1], [0, 0, 1, 1], [], []>} : vector<128x128xf32>, vector<128x64xf32>, vector<128x64xf32> -> vector<128x64xf32>
    %c3 = arith.constant 3 : index
    %c0_20 = arith.constant 0 : index
    %c0_21 = arith.constant 0 : index
    %30 = vector.load %arg5[%c3, %c0_20, %c0_21] : memref<9x128x128xf32, #tpu.memory_space<vmem>>, vector<1x128x128xf32>
    %31 = vector.shape_cast %30 : vector<1x128x128xf32> to vector<128x128xf32>
    %cst_22 = arith.constant dense<0.000000e+00> : vector<128x64xf32>
    %32 = tpu.matmul %31, %20, %cst_22 {dimension_numbers = #tpu.dot_dimension_numbers<[1], [0], [0], [1], [0, 0, 1, 1], [], []>} : vector<128x128xf32>, vector<128x64xf32>, vector<128x64xf32> -> vector<128x64xf32>
    %c4 = arith.constant 4 : index
    %c0_23 = arith.constant 0 : index
    %c0_24 = arith.constant 0 : index
    %33 = vector.load %arg5[%c4, %c0_23, %c0_24] : memref<9x128x128xf32, #tpu.memory_space<vmem>>, vector<1x128x128xf32>
    %34 = vector.shape_cast %33 : vector<1x128x128xf32> to vector<128x128xf32>
    %cst_25 = arith.constant dense<0.000000e+00> : vector<128x64xf32>
    %35 = tpu.matmul %34, %20, %cst_25 {dimension_numbers = #tpu.dot_dimension_numbers<[1], [0], [0], [1], [0, 0, 1, 1], [], []>} : vector<128x128xf32>, vector<128x64xf32>, vector<128x64xf32> -> vector<128x64xf32>
    %c5 = arith.constant 5 : index
    %c0_26 = arith.constant 0 : index
    %c0_27 = arith.constant 0 : index
    %36 = vector.load %arg5[%c5, %c0_26, %c0_27] : memref<9x128x128xf32, #tpu.memory_space<vmem>>, vector<1x128x128xf32>
    %37 = vector.shape_cast %36 : vector<1x128x128xf32> to vector<128x128xf32>
    %cst_28 = arith.constant dense<0.000000e+00> : vector<128x64xf32>
    %38 = tpu.matmul %37, %20, %cst_28 {dimension_numbers = #tpu.dot_dimension_numbers<[1], [0], [0], [1], [0, 0, 1, 1], [], []>} : vector<128x128xf32>, vector<128x64xf32>, vector<128x64xf32> -> vector<128x64xf32>
    %c6 = arith.constant 6 : index
    %c0_29 = arith.constant 0 : index
    %c0_30 = arith.constant 0 : index
    %39 = vector.load %arg5[%c6, %c0_29, %c0_30] : memref<9x128x128xf32, #tpu.memory_space<vmem>>, vector<1x128x128xf32>
    %40 = vector.shape_cast %39 : vector<1x128x128xf32> to vector<128x128xf32>
    %cst_31 = arith.constant dense<0.000000e+00> : vector<128x64xf32>
    %41 = tpu.matmul %40, %20, %cst_31 {dimension_numbers = #tpu.dot_dimension_numbers<[1], [0], [0], [1], [0, 0, 1, 1], [], []>} : vector<128x128xf32>, vector<128x64xf32>, vector<128x64xf32> -> vector<128x64xf32>
    %c7 = arith.constant 7 : index
    %c0_32 = arith.constant 0 : index
    %c0_33 = arith.constant 0 : index
    %42 = vector.load %arg5[%c7, %c0_32, %c0_33] : memref<9x128x128xf32, #tpu.memory_space<vmem>>, vector<1x128x128xf32>
    %43 = vector.shape_cast %42 : vector<1x128x128xf32> to vector<128x128xf32>
    %cst_34 = arith.constant dense<0.000000e+00> : vector<128x64xf32>
    %44 = tpu.matmul %43, %20, %cst_34 {dimension_numbers = #tpu.dot_dimension_numbers<[1], [0], [0], [1], [0, 0, 1, 1], [], []>} : vector<128x128xf32>, vector<128x64xf32>, vector<128x64xf32> -> vector<128x64xf32>
    %c8 = arith.constant 8 : index
    %c0_35 = arith.constant 0 : index
    %c0_36 = arith.constant 0 : index
    %45 = vector.load %arg5[%c8, %c0_35, %c0_36] : memref<9x128x128xf32, #tpu.memory_space<vmem>>, vector<1x128x128xf32>
    %46 = vector.shape_cast %45 : vector<1x128x128xf32> to vector<128x128xf32>
    %cst_37 = arith.constant dense<0.000000e+00> : vector<128x64xf32>
    %47 = tpu.matmul %46, %20, %cst_37 {dimension_numbers = #tpu.dot_dimension_numbers<[1], [0], [0], [1], [0, 0, 1, 1], [], []>} : vector<128x128xf32>, vector<128x64xf32>, vector<128x64xf32> -> vector<128x64xf32>
    %48 = tpu.concatenate %23, %26, %29, %32, %35, %38, %41, %44, %47 in 1 : vector<128x64xf32>, vector<128x64xf32>, vector<128x64xf32>, vector<128x64xf32>, vector<128x64xf32>, vector<128x64xf32>, vector<128x64xf32>, vector<128x64xf32>, vector<128x64xf32> -> vector<128x576xf32>
    %c0_38 = arith.constant 0 : index
    %c0_39 = arith.constant 0 : index
    %49 = vector.load %arg6[%c0_38, %c0_39] : memref<576x64xf32, #tpu.memory_space<vmem>>, vector<576x64xf32>
    %cst_40 = arith.constant dense<0.000000e+00> : vector<128x64xf32>
    %50 = tpu.matmul %48, %49, %cst_40 {dimension_numbers = #tpu.dot_dimension_numbers<[1], [0], [0], [1], [0, 0, 1, 1], [], []>} : vector<128x576xf32>, vector<576x64xf32>, vector<128x64xf32> -> vector<128x64xf32>
    %c0_41 = arith.constant 0 : index
    %c0_42 = arith.constant 0 : index
    %51 = vector.load %arg7[%c0_41, %c0_42] : memref<1x64xf32, #tpu.memory_space<vmem>>, vector<1x64xf32>
    %52 = vector.broadcast %51 : vector<1x64xf32> to vector<128x64xf32>
    %53 = arith.addf %50, %52 : vector<128x64xf32>
    %cst_43 = arith.constant 0.000000e+00 : f32
    %54 = vector.broadcast %cst_43 : f32 to vector<128x64xf32>
    %55 = arith.maximumf %53, %54 : vector<128x64xf32>
    %c0_44 = arith.constant 0 : index
    %c0_45 = arith.constant 0 : index
    %56 = vector.load %arg8[%c0_44, %c0_45] : memref<1x64xf32, #tpu.memory_space<vmem>>, vector<1x64xf32>
    %57 = vector.broadcast %56 : vector<1x64xf32> to vector<128x64xf32>
    %58 = arith.mulf %55, %57 : vector<128x64xf32>
    %c0_46 = arith.constant 0 : index
    %c0_47 = arith.constant 0 : index
    %59 = vector.load %arg9[%c0_46, %c0_47] : memref<1x64xf32, #tpu.memory_space<vmem>>, vector<1x64xf32>
    %60 = vector.broadcast %59 : vector<1x64xf32> to vector<128x64xf32>
    %61 = arith.addf %58, %60 : vector<128x64xf32>
    %62 = vector.extract_strided_slice %61 {offsets = [0, 0], sizes = [32, 64], strides = [1, 1]} : vector<128x64xf32> to vector<32x64xf32>
    %63 = vector.extract_strided_slice %61 {offsets = [32, 0], sizes = [32, 64], strides = [1, 1]} : vector<128x64xf32> to vector<32x64xf32>
    %64 = arith.maximumf %62, %63 : vector<32x64xf32>
    %65 = vector.extract_strided_slice %61 {offsets = [64, 0], sizes = [32, 64], strides = [1, 1]} : vector<128x64xf32> to vector<32x64xf32>
    %66 = vector.extract_strided_slice %61 {offsets = [96, 0], sizes = [32, 64], strides = [1, 1]} : vector<128x64xf32> to vector<32x64xf32>
    %67 = arith.maximumf %65, %66 : vector<32x64xf32>
    %68 = arith.maximumf %64, %67 : vector<32x64xf32>
    %c0_48 = arith.constant 0 : index
    %c0_49 = arith.constant 0 : index
    %c0_50 = arith.constant 0 : index
    %69 = vector.load %arg10[%c0_48, %c0_49, %c0_50] : memref<9x32x32xf32, #tpu.memory_space<vmem>>, vector<1x32x32xf32>
    %70 = vector.shape_cast %69 : vector<1x32x32xf32> to vector<32x32xf32>
    %cst_51 = arith.constant dense<0.000000e+00> : vector<32x64xf32>
    %71 = tpu.matmul %70, %68, %cst_51 {dimension_numbers = #tpu.dot_dimension_numbers<[1], [0], [0], [1], [0, 0, 1, 1], [], []>} : vector<32x32xf32>, vector<32x64xf32>, vector<32x64xf32> -> vector<32x64xf32>
    %c1_52 = arith.constant 1 : index
    %c0_53 = arith.constant 0 : index
    %c0_54 = arith.constant 0 : index
    %72 = vector.load %arg10[%c1_52, %c0_53, %c0_54] : memref<9x32x32xf32, #tpu.memory_space<vmem>>, vector<1x32x32xf32>
    %73 = vector.shape_cast %72 : vector<1x32x32xf32> to vector<32x32xf32>
    %cst_55 = arith.constant dense<0.000000e+00> : vector<32x64xf32>
    %74 = tpu.matmul %73, %68, %cst_55 {dimension_numbers = #tpu.dot_dimension_numbers<[1], [0], [0], [1], [0, 0, 1, 1], [], []>} : vector<32x32xf32>, vector<32x64xf32>, vector<32x64xf32> -> vector<32x64xf32>
    %c2_56 = arith.constant 2 : index
    %c0_57 = arith.constant 0 : index
    %c0_58 = arith.constant 0 : index
    %75 = vector.load %arg10[%c2_56, %c0_57, %c0_58] : memref<9x32x32xf32, #tpu.memory_space<vmem>>, vector<1x32x32xf32>
    %76 = vector.shape_cast %75 : vector<1x32x32xf32> to vector<32x32xf32>
    %cst_59 = arith.constant dense<0.000000e+00> : vector<32x64xf32>
    %77 = tpu.matmul %76, %68, %cst_59 {dimension_numbers = #tpu.dot_dimension_numbers<[1], [0], [0], [1], [0, 0, 1, 1], [], []>} : vector<32x32xf32>, vector<32x64xf32>, vector<32x64xf32> -> vector<32x64xf32>
    %c3_60 = arith.constant 3 : index
    %c0_61 = arith.constant 0 : index
    %c0_62 = arith.constant 0 : index
    %78 = vector.load %arg10[%c3_60, %c0_61, %c0_62] : memref<9x32x32xf32, #tpu.memory_space<vmem>>, vector<1x32x32xf32>
    %79 = vector.shape_cast %78 : vector<1x32x32xf32> to vector<32x32xf32>
    %cst_63 = arith.constant dense<0.000000e+00> : vector<32x64xf32>
    %80 = tpu.matmul %79, %68, %cst_63 {dimension_numbers = #tpu.dot_dimension_numbers<[1], [0], [0], [1], [0, 0, 1, 1], [], []>} : vector<32x32xf32>, vector<32x64xf32>, vector<32x64xf32> -> vector<32x64xf32>
    %c4_64 = arith.constant 4 : index
    %c0_65 = arith.constant 0 : index
    %c0_66 = arith.constant 0 : index
    %81 = vector.load %arg10[%c4_64, %c0_65, %c0_66] : memref<9x32x32xf32, #tpu.memory_space<vmem>>, vector<1x32x32xf32>
    %82 = vector.shape_cast %81 : vector<1x32x32xf32> to vector<32x32xf32>
    %cst_67 = arith.constant dense<0.000000e+00> : vector<32x64xf32>
    %83 = tpu.matmul %82, %68, %cst_67 {dimension_numbers = #tpu.dot_dimension_numbers<[1], [0], [0], [1], [0, 0, 1, 1], [], []>} : vector<32x32xf32>, vector<32x64xf32>, vector<32x64xf32> -> vector<32x64xf32>
    %c5_68 = arith.constant 5 : index
    %c0_69 = arith.constant 0 : index
    %c0_70 = arith.constant 0 : index
    %84 = vector.load %arg10[%c5_68, %c0_69, %c0_70] : memref<9x32x32xf32, #tpu.memory_space<vmem>>, vector<1x32x32xf32>
    %85 = vector.shape_cast %84 : vector<1x32x32xf32> to vector<32x32xf32>
    %cst_71 = arith.constant dense<0.000000e+00> : vector<32x64xf32>
    %86 = tpu.matmul %85, %68, %cst_71 {dimension_numbers = #tpu.dot_dimension_numbers<[1], [0], [0], [1], [0, 0, 1, 1], [], []>} : vector<32x32xf32>, vector<32x64xf32>, vector<32x64xf32> -> vector<32x64xf32>
    %c6_72 = arith.constant 6 : index
    %c0_73 = arith.constant 0 : index
    %c0_74 = arith.constant 0 : index
    %87 = vector.load %arg10[%c6_72, %c0_73, %c0_74] : memref<9x32x32xf32, #tpu.memory_space<vmem>>, vector<1x32x32xf32>
    %88 = vector.shape_cast %87 : vector<1x32x32xf32> to vector<32x32xf32>
    %cst_75 = arith.constant dense<0.000000e+00> : vector<32x64xf32>
    %89 = tpu.matmul %88, %68, %cst_75 {dimension_numbers = #tpu.dot_dimension_numbers<[1], [0], [0], [1], [0, 0, 1, 1], [], []>} : vector<32x32xf32>, vector<32x64xf32>, vector<32x64xf32> -> vector<32x64xf32>
    %c7_76 = arith.constant 7 : index
    %c0_77 = arith.constant 0 : index
    %c0_78 = arith.constant 0 : index
    %90 = vector.load %arg10[%c7_76, %c0_77, %c0_78] : memref<9x32x32xf32, #tpu.memory_space<vmem>>, vector<1x32x32xf32>
    %91 = vector.shape_cast %90 : vector<1x32x32xf32> to vector<32x32xf32>
    %cst_79 = arith.constant dense<0.000000e+00> : vector<32x64xf32>
    %92 = tpu.matmul %91, %68, %cst_79 {dimension_numbers = #tpu.dot_dimension_numbers<[1], [0], [0], [1], [0, 0, 1, 1], [], []>} : vector<32x32xf32>, vector<32x64xf32>, vector<32x64xf32> -> vector<32x64xf32>
    %c8_80 = arith.constant 8 : index
    %c0_81 = arith.constant 0 : index
    %c0_82 = arith.constant 0 : index
    %93 = vector.load %arg10[%c8_80, %c0_81, %c0_82] : memref<9x32x32xf32, #tpu.memory_space<vmem>>, vector<1x32x32xf32>
    %94 = vector.shape_cast %93 : vector<1x32x32xf32> to vector<32x32xf32>
    %cst_83 = arith.constant dense<0.000000e+00> : vector<32x64xf32>
    %95 = tpu.matmul %94, %68, %cst_83 {dimension_numbers = #tpu.dot_dimension_numbers<[1], [0], [0], [1], [0, 0, 1, 1], [], []>} : vector<32x32xf32>, vector<32x64xf32>, vector<32x64xf32> -> vector<32x64xf32>
    %96 = tpu.concatenate %71, %74, %77, %80, %83, %86, %89, %92, %95 in 1 : vector<32x64xf32>, vector<32x64xf32>, vector<32x64xf32>, vector<32x64xf32>, vector<32x64xf32>, vector<32x64xf32>, vector<32x64xf32>, vector<32x64xf32>, vector<32x64xf32> -> vector<32x576xf32>
    %c0_84 = arith.constant 0 : index
    %c0_85 = arith.constant 0 : index
    %97 = vector.load %arg11[%c0_84, %c0_85] : memref<576x64xf32, #tpu.memory_space<vmem>>, vector<576x64xf32>
    %cst_86 = arith.constant dense<0.000000e+00> : vector<32x64xf32>
    %98 = tpu.matmul %96, %97, %cst_86 {dimension_numbers = #tpu.dot_dimension_numbers<[1], [0], [0], [1], [0, 0, 1, 1], [], []>} : vector<32x576xf32>, vector<576x64xf32>, vector<32x64xf32> -> vector<32x64xf32>
    %c0_87 = arith.constant 0 : index
    %c0_88 = arith.constant 0 : index
    %99 = vector.load %arg12[%c0_87, %c0_88] : memref<1x64xf32, #tpu.memory_space<vmem>>, vector<1x64xf32>
    %100 = vector.broadcast %99 : vector<1x64xf32> to vector<32x64xf32>
    %101 = arith.addf %98, %100 : vector<32x64xf32>
    %cst_89 = arith.constant 0.000000e+00 : f32
    %102 = vector.broadcast %cst_89 : f32 to vector<32x64xf32>
    %103 = arith.maximumf %101, %102 : vector<32x64xf32>
    %c0_90 = arith.constant 0 : index
    %c0_91 = arith.constant 0 : index
    %104 = vector.load %arg13[%c0_90, %c0_91] : memref<1x64xf32, #tpu.memory_space<vmem>>, vector<1x64xf32>
    %105 = vector.broadcast %104 : vector<1x64xf32> to vector<32x64xf32>
    %106 = arith.mulf %103, %105 : vector<32x64xf32>
    %c0_92 = arith.constant 0 : index
    %c0_93 = arith.constant 0 : index
    %107 = vector.load %arg14[%c0_92, %c0_93] : memref<1x64xf32, #tpu.memory_space<vmem>>, vector<1x64xf32>
    %108 = vector.broadcast %107 : vector<1x64xf32> to vector<32x64xf32>
    %109 = arith.addf %106, %108 : vector<32x64xf32>
    %110 = vector.extract_strided_slice %109 {offsets = [0, 0], sizes = [8, 64], strides = [1, 1]} : vector<32x64xf32> to vector<8x64xf32>
    %111 = vector.extract_strided_slice %109 {offsets = [8, 0], sizes = [8, 64], strides = [1, 1]} : vector<32x64xf32> to vector<8x64xf32>
    %112 = arith.maximumf %110, %111 : vector<8x64xf32>
    %113 = vector.extract_strided_slice %109 {offsets = [16, 0], sizes = [8, 64], strides = [1, 1]} : vector<32x64xf32> to vector<8x64xf32>
    %114 = vector.extract_strided_slice %109 {offsets = [24, 0], sizes = [8, 64], strides = [1, 1]} : vector<32x64xf32> to vector<8x64xf32>
    %115 = arith.maximumf %113, %114 : vector<8x64xf32>
    %116 = arith.maximumf %112, %115 : vector<8x64xf32>
    %c0_94 = arith.constant 0 : index
    %c0_95 = arith.constant 0 : index
    %c0_96 = arith.constant 0 : index
    %117 = vector.load %arg15[%c0_94, %c0_95, %c0_96] : memref<9x32x8xf32, #tpu.memory_space<vmem>>, vector<1x32x8xf32>
    %118 = vector.shape_cast %117 : vector<1x32x8xf32> to vector<32x8xf32>
    %cst_97 = arith.constant dense<0.000000e+00> : vector<32x64xf32>
    %119 = tpu.matmul %118, %116, %cst_97 {dimension_numbers = #tpu.dot_dimension_numbers<[1], [0], [0], [1], [0, 0, 1, 1], [], []>} : vector<32x8xf32>, vector<8x64xf32>, vector<32x64xf32> -> vector<32x64xf32>
    %c1_98 = arith.constant 1 : index
    %c0_99 = arith.constant 0 : index
    %c0_100 = arith.constant 0 : index
    %120 = vector.load %arg15[%c1_98, %c0_99, %c0_100] : memref<9x32x8xf32, #tpu.memory_space<vmem>>, vector<1x32x8xf32>
    %121 = vector.shape_cast %120 : vector<1x32x8xf32> to vector<32x8xf32>
    %cst_101 = arith.constant dense<0.000000e+00> : vector<32x64xf32>
    %122 = tpu.matmul %121, %116, %cst_101 {dimension_numbers = #tpu.dot_dimension_numbers<[1], [0], [0], [1], [0, 0, 1, 1], [], []>} : vector<32x8xf32>, vector<8x64xf32>, vector<32x64xf32> -> vector<32x64xf32>
    %c2_102 = arith.constant 2 : index
    %c0_103 = arith.constant 0 : index
    %c0_104 = arith.constant 0 : index
    %123 = vector.load %arg15[%c2_102, %c0_103, %c0_104] : memref<9x32x8xf32, #tpu.memory_space<vmem>>, vector<1x32x8xf32>
    %124 = vector.shape_cast %123 : vector<1x32x8xf32> to vector<32x8xf32>
    %cst_105 = arith.constant dense<0.000000e+00> : vector<32x64xf32>
    %125 = tpu.matmul %124, %116, %cst_105 {dimension_numbers = #tpu.dot_dimension_numbers<[1], [0], [0], [1], [0, 0, 1, 1], [], []>} : vector<32x8xf32>, vector<8x64xf32>, vector<32x64xf32> -> vector<32x64xf32>
    %c3_106 = arith.constant 3 : index
    %c0_107 = arith.constant 0 : index
    %c0_108 = arith.constant 0 : index
    %126 = vector.load %arg15[%c3_106, %c0_107, %c0_108] : memref<9x32x8xf32, #tpu.memory_space<vmem>>, vector<1x32x8xf32>
    %127 = vector.shape_cast %126 : vector<1x32x8xf32> to vector<32x8xf32>
    %cst_109 = arith.constant dense<0.000000e+00> : vector<32x64xf32>
    %128 = tpu.matmul %127, %116, %cst_109 {dimension_numbers = #tpu.dot_dimension_numbers<[1], [0], [0], [1], [0, 0, 1, 1], [], []>} : vector<32x8xf32>, vector<8x64xf32>, vector<32x64xf32> -> vector<32x64xf32>
    %c4_110 = arith.constant 4 : index
    %c0_111 = arith.constant 0 : index
    %c0_112 = arith.constant 0 : index
    %129 = vector.load %arg15[%c4_110, %c0_111, %c0_112] : memref<9x32x8xf32, #tpu.memory_space<vmem>>, vector<1x32x8xf32>
    %130 = vector.shape_cast %129 : vector<1x32x8xf32> to vector<32x8xf32>
    %cst_113 = arith.constant dense<0.000000e+00> : vector<32x64xf32>
    %131 = tpu.matmul %130, %116, %cst_113 {dimension_numbers = #tpu.dot_dimension_numbers<[1], [0], [0], [1], [0, 0, 1, 1], [], []>} : vector<32x8xf32>, vector<8x64xf32>, vector<32x64xf32> -> vector<32x64xf32>
    %c5_114 = arith.constant 5 : index
    %c0_115 = arith.constant 0 : index
    %c0_116 = arith.constant 0 : index
    %132 = vector.load %arg15[%c5_114, %c0_115, %c0_116] : memref<9x32x8xf32, #tpu.memory_space<vmem>>, vector<1x32x8xf32>
    %133 = vector.shape_cast %132 : vector<1x32x8xf32> to vector<32x8xf32>
    %cst_117 = arith.constant dense<0.000000e+00> : vector<32x64xf32>
    %134 = tpu.matmul %133, %116, %cst_117 {dimension_numbers = #tpu.dot_dimension_numbers<[1], [0], [0], [1], [0, 0, 1, 1], [], []>} : vector<32x8xf32>, vector<8x64xf32>, vector<32x64xf32> -> vector<32x64xf32>
    %c6_118 = arith.constant 6 : index
    %c0_119 = arith.constant 0 : index
    %c0_120 = arith.constant 0 : index
    %135 = vector.load %arg15[%c6_118, %c0_119, %c0_120] : memref<9x32x8xf32, #tpu.memory_space<vmem>>, vector<1x32x8xf32>
    %136 = vector.shape_cast %135 : vector<1x32x8xf32> to vector<32x8xf32>
    %cst_121 = arith.constant dense<0.000000e+00> : vector<32x64xf32>
    %137 = tpu.matmul %136, %116, %cst_121 {dimension_numbers = #tpu.dot_dimension_numbers<[1], [0], [0], [1], [0, 0, 1, 1], [], []>} : vector<32x8xf32>, vector<8x64xf32>, vector<32x64xf32> -> vector<32x64xf32>
    %c7_122 = arith.constant 7 : index
    %c0_123 = arith.constant 0 : index
    %c0_124 = arith.constant 0 : index
    %138 = vector.load %arg15[%c7_122, %c0_123, %c0_124] : memref<9x32x8xf32, #tpu.memory_space<vmem>>, vector<1x32x8xf32>
    %139 = vector.shape_cast %138 : vector<1x32x8xf32> to vector<32x8xf32>
    %cst_125 = arith.constant dense<0.000000e+00> : vector<32x64xf32>
    %140 = tpu.matmul %139, %116, %cst_125 {dimension_numbers = #tpu.dot_dimension_numbers<[1], [0], [0], [1], [0, 0, 1, 1], [], []>} : vector<32x8xf32>, vector<8x64xf32>, vector<32x64xf32> -> vector<32x64xf32>
    %c8_126 = arith.constant 8 : index
    %c0_127 = arith.constant 0 : index
    %c0_128 = arith.constant 0 : index
    %141 = vector.load %arg15[%c8_126, %c0_127, %c0_128] : memref<9x32x8xf32, #tpu.memory_space<vmem>>, vector<1x32x8xf32>
    %142 = vector.shape_cast %141 : vector<1x32x8xf32> to vector<32x8xf32>
    %cst_129 = arith.constant dense<0.000000e+00> : vector<32x64xf32>
    %143 = tpu.matmul %142, %116, %cst_129 {dimension_numbers = #tpu.dot_dimension_numbers<[1], [0], [0], [1], [0, 0, 1, 1], [], []>} : vector<32x8xf32>, vector<8x64xf32>, vector<32x64xf32> -> vector<32x64xf32>
    %144 = tpu.concatenate %119, %122, %125, %128, %131, %134, %137, %140, %143 in 1 : vector<32x64xf32>, vector<32x64xf32>, vector<32x64xf32>, vector<32x64xf32>, vector<32x64xf32>, vector<32x64xf32>, vector<32x64xf32>, vector<32x64xf32>, vector<32x64xf32> -> vector<32x576xf32>
    %c0_130 = arith.constant 0 : index
    %c0_131 = arith.constant 0 : index
    %145 = vector.load %arg16[%c0_130, %c0_131] : memref<576x64xf32, #tpu.memory_space<vmem>>, vector<576x64xf32>
    %cst_132 = arith.constant dense<0.000000e+00> : vector<32x64xf32>
    %146 = tpu.matmul %144, %145, %cst_132 {dimension_numbers = #tpu.dot_dimension_numbers<[1], [0], [0], [1], [0, 0, 1, 1], [], []>} : vector<32x576xf32>, vector<576x64xf32>, vector<32x64xf32> -> vector<32x64xf32>
    %c0_133 = arith.constant 0 : index
    %c0_134 = arith.constant 0 : index
    %147 = vector.load %arg17[%c0_133, %c0_134] : memref<1x64xf32, #tpu.memory_space<vmem>>, vector<1x64xf32>
    %148 = vector.broadcast %147 : vector<1x64xf32> to vector<32x64xf32>
    %149 = arith.addf %146, %148 : vector<32x64xf32>
    %cst_135 = arith.constant 0.000000e+00 : f32
    %150 = vector.broadcast %cst_135 : f32 to vector<32x64xf32>
    %151 = arith.maximumf %149, %150 : vector<32x64xf32>
    %c0_136 = arith.constant 0 : index
    %c0_137 = arith.constant 0 : index
    %152 = vector.load %arg18[%c0_136, %c0_137] : memref<1x64xf32, #tpu.memory_space<vmem>>, vector<1x64xf32>
    %153 = vector.broadcast %152 : vector<1x64xf32> to vector<32x64xf32>
    %154 = arith.mulf %151, %153 : vector<32x64xf32>
    %c0_138 = arith.constant 0 : index
    %c0_139 = arith.constant 0 : index
    %155 = vector.load %arg19[%c0_138, %c0_139] : memref<1x64xf32, #tpu.memory_space<vmem>>, vector<1x64xf32>
    %156 = vector.broadcast %155 : vector<1x64xf32> to vector<32x64xf32>
    %157 = arith.addf %154, %156 : vector<32x64xf32>
    %158 = vector.extract_strided_slice %157 {offsets = [0, 0], sizes = [8, 64], strides = [1, 1]} : vector<32x64xf32> to vector<8x64xf32>
    %159 = vector.extract_strided_slice %157 {offsets = [8, 0], sizes = [8, 64], strides = [1, 1]} : vector<32x64xf32> to vector<8x64xf32>
    %160 = arith.maximumf %158, %159 : vector<8x64xf32>
    %161 = vector.extract_strided_slice %157 {offsets = [16, 0], sizes = [8, 64], strides = [1, 1]} : vector<32x64xf32> to vector<8x64xf32>
    %162 = vector.extract_strided_slice %157 {offsets = [24, 0], sizes = [8, 64], strides = [1, 1]} : vector<32x64xf32> to vector<8x64xf32>
    %163 = arith.maximumf %161, %162 : vector<8x64xf32>
    %164 = arith.maximumf %160, %163 : vector<8x64xf32>
    %c0_140 = arith.constant 0 : index
    %c0_141 = arith.constant 0 : index
    %165 = vector.load %arg20[%c0_140, %c0_141] : memref<64x64xf32, #tpu.memory_space<vmem>>, vector<64x64xf32>
    %cst_142 = arith.constant dense<0.000000e+00> : vector<8x64xf32>
    %166 = tpu.matmul %164, %165, %cst_142 {dimension_numbers = #tpu.dot_dimension_numbers<[1], [0], [0], [1], [0, 0, 1, 1], [], []>} : vector<8x64xf32>, vector<64x64xf32>, vector<8x64xf32> -> vector<8x64xf32>
    %c0_143 = arith.constant 0 : index
    %c0_144 = arith.constant 0 : index
    %167 = vector.load %arg21[%c0_143, %c0_144] : memref<1x64xf32, #tpu.memory_space<vmem>>, vector<1x64xf32>
    %168 = vector.broadcast %167 : vector<1x64xf32> to vector<8x64xf32>
    %169 = arith.addf %166, %168 : vector<8x64xf32>
    %cst_145 = arith.constant 0.000000e+00 : f32
    %170 = vector.broadcast %cst_145 : f32 to vector<8x64xf32>
    %171 = arith.maximumf %169, %170 : vector<8x64xf32>
    %c0_146 = arith.constant 0 : index
    %c0_147 = arith.constant 0 : index
    %172 = vector.load %arg22[%c0_146, %c0_147] : memref<1x64xf32, #tpu.memory_space<vmem>>, vector<1x64xf32>
    %173 = vector.broadcast %172 : vector<1x64xf32> to vector<8x64xf32>
    %174 = arith.mulf %171, %173 : vector<8x64xf32>
    %cst_148 = arith.constant dense<0.000000e+00> : vector<8xf32>
    %175 = vector.multi_reduction <add>, %174, %cst_148 [1] : vector<8x64xf32> to vector<8xf32>
    %176 = vector.shape_cast %175 : vector<8xf32> to vector<8x1xf32>
    %c0_149 = arith.constant 0 : index
    %c0_150 = arith.constant 0 : index
    %177 = vector.load %arg23[%c0_149, %c0_150] : memref<1x1xf32, #tpu.memory_space<vmem>>, vector<1x1xf32>
    %178 = vector.broadcast %177 : vector<1x1xf32> to vector<8x1xf32>
    %179 = arith.addf %176, %178 : vector<8x1xf32>
    %c0_151 = arith.constant 0 : index
    %c0_152 = arith.constant 0 : index
    %180 = vector.load %arg24[%c0_151, %c0_152] : memref<8x1xf32, #tpu.memory_space<vmem>>, vector<8x1xf32>
    tpu.vector_store %arg24[%c0_151, %c0_152], %179 {strides = array<i32>} : memref<8x1xf32, #tpu.memory_space<vmem>>, vector<8x1xf32>,
    return
  }
}

</mosaic_0001>

<bundles_post_ra>
// kernel: cnn_terminate_forward.1
= control target key start
LH: loop header
LB: loop body
LE: loop exit
PB: predicated region body
PF: predicated region fallthrough
CT: control target
= control target key end

     0   :  { %vm345_vm0 = vcmask 1040384   ;;  %vm152_vm1 = vcmask 72704   ;;  %vm2701_vm2 = vcmask 523264   ;;  %vm3406_vm3 = vcmask 261120   ;;  %s12000_s1 = inlined_call_operand.vmem [shape: f32[9,64], index: 1, kind: input, shape index: {}]   ;;  %s12001_s0 = inlined_call_operand.vmem [shape: f32[512,9], index: 0, kind: input, shape index: {}]   ;;  %s12002_s2 = inlined_call_operand.vmem [shape: f32[1,64], index: 2, kind: input, shape index: {}]   ;;  %s12003_s3 = inlined_call_operand.vmem [shape: f32[1,64], index: 3, kind: input, shape index: {}]   ;;  %s12004_s4 = inlined_call_operand.vmem [shape: f32[1,64], index: 4, kind: input, shape index: {}]   ;;  %s12005_s5 = inlined_call_operand.vmem [shape: f32[9,128,128], index: 5, kind: input, shape index: {}]   ;;  %s12006_s6 = inlined_call_operand.vmem [shape: f32[576,64], index: 6, kind: input, shape index: {}]   ;;  %s12007_s10 = inlined_call_operand.vmem [shape: f32[9,32,32], index: 10, kind: input, shape index: {}]   ;;  %s12008_s7 = inlined_call_operand.vmem [shape: f32[1,64], index: 7, kind: input, shape index: {}]   ;;  %s12009_s8 = inlined_call_operand.vmem [shape: f32[1,64], index: 8, kind: input, shape index: {}]   ;;  %s12010_s9 = inlined_call_operand.vmem [shape: f32[1,64], index: 9, kind: input, shape index: {}]   ;;  %s12011_s11 = inlined_call_operand.vmem [shape: f32[576,64], index: 11, kind: input, shape index: {}]   ;;  %s12012_s15 = inlined_call_operand.vmem [shape: f32[9,32,8], index: 15, kind: input, shape index: {}]   ;;  %s12013_s12 = inlined_call_operand.vmem [shape: f32[1,64], index: 12, kind: input, shape index: {}]   ;;  %s12014_s13 = inlined_call_operand.vmem [shape: f32[1,64], index: 13, kind: input, shape index: {}]   ;;  %s12015_s14 = inlined_call_operand.vmem [shape: f32[1,64], index: 14, kind: input, shape index: {}]   ;;  %s12016_s16 = inlined_call_operand.vmem [shape: f32[576,64], index: 16, kind: input, shape index: {}]   ;;  %s12017_s20 = inlined_call_operand.vmem [shape: f32[64,64], index: 20, kind: input, shape index: {}]   ;;  %s12018_s17 = inlined_call_operand.vmem [shape: f32[1,64], index: 17, kind: input, shape index: {}]   ;;  %s12019_s18 = inlined_call_operand.vmem [shape: f32[1,64], index: 18, kind: input, shape index: {}]   ;;  %s12020_s19 = inlined_call_operand.vmem [shape: f32[1,64], index: 19, kind: input, shape index: {}]   ;;  %s12021_s23 = inlined_call_operand.<no memory space> [shape: f32[1,1], index: 23, kind: input, shape index: {}]   ;;  %s12022_s21 = inlined_call_operand.vmem [shape: f32[1,64], index: 21, kind: input, shape index: {}]   ;;  %s12023_s22 = inlined_call_operand.vmem [shape: f32[1,64], index: 22, kind: input, shape index: {}]   ;;  %s12024_s24 = inlined_call_operand.vmem [shape: f32[8,1], index: 24, kind: output, shape index: {}]  }
   0x1   :  { %12032 = sst [smem:[#allocation13_spill]] %s12000_s1  ;;  %vm4779_vm4 = vcmask 64512   ;;  %vm8645_vm5 = vmmov 0   ;;  %vm6256_vm6 = vcmask 7168  }
   0x2   :  { %12033 = sst [smem:[#allocation14_spill]] %s12001_s0 }
   0x3   :  { %12034 = sst [smem:[#allocation15_spill]] %s12002_s2 }
   0x4   :  { %12035 = sst [smem:[#allocation16_spill]] %s12003_s3 }
   0x5   :  { %12036 = sst [smem:[#allocation17_spill]] %s12004_s4 }
   0x6   :  { %12037 = sst [smem:[#allocation18_spill]] %s12005_s5 }
   0x7   :  { %12038 = sst [smem:[#allocation19_spill]] %s12006_s6  ;;  %s8643_s6 = smov 64  }
   0x8   :  { %12039 = sst [smem:[#allocation20_spill]] %s12007_s10 }
   0x9   :  { %12040 = sst [smem:[#allocation21_spill]] %s12008_s7 }
   0xa   :  { %s12041_s27 = sld [smem:[#allocation13_spill]] }
   0xb   :  { %s12042_s1 = sld [smem:[#allocation14_spill]] }
   0xc   :  { %s12043_s30 = sld [smem:[#allocation15_spill]] }
   0xd   :  { %s12044_s7 = sld [smem:[#allocation16_spill]] }
   0xe   :  { %s12045_s5 = sld [smem:[#allocation17_spill]] }
   0xf   :  { %s12046_s28 = sld [smem:[#allocation18_spill]] }
  0x10   :  { %v144_v0 = vld [vmem:[%s12041_s27 + $0x8] sm:$0x1]  ;;  %v143_v1 = vld [vmem:[%s12041_s27] sm:$0xff]  ;;  %s12063_s25 = sld [smem:[#allocation19_spill]] }
  0x11   :  { %v79_v2 = vld [vmem:[%s12042_s1] sm:$0xff]  ;;  %7495 = vmatprep.subr.msk.mxu0 %vm345_vm0, %v144_v0  ;;  %v80_v3 = vld [vmem:[%s12042_s1 + $0x8] sm:$0xff]  ;;  %v81_v4 = vld [vmem:[%s12042_s1 + $0x10] sm:$0xff]  ;;  %s12084_s10 = sld [smem:[#allocation20_spill]] }
  0x12   :  { %7499 = vmatprep.mubr.msk.f32.mxu0 %vm152_vm1, %v79_v2  ;;  %7496 = vmatpush3.msk.msra.mxu0 %vm345_vm0, %v144_v0  ;;  %v82_v5 = vld [vmem:[%s12042_s1 + $0x18] sm:$0xff]  ;;  %v83_v6 = vld [vmem:[%s12042_s1 + $0x20] sm:$0xff]  ;;  %v84_v7 = vld [vmem:[%s12042_s1 + $0x28] sm:$0xff]  ;;  %s12085_s4 = sld [smem:[#allocation21_spill]] }
  0x13   :  { %7497 = vmatprep.subr.mxu0 %v143_v1  ;;  %v85_v8 = vld [vmem:[%s12042_s1 + $0x30] sm:$0xff]  ;;  %v86_v9 = vld [vmem:[%s12042_s1 + $0x38] sm:$0xff]  ;;  %v87_v10 = vld [vmem:[%s12042_s1 + $0x40] sm:$0xff] }
  0x14   :  { %7498 = vmatpush3.msra.mxu0 %v143_v1  ;;  %v88_v11 = vld [vmem:[%s12042_s1 + $0x48] sm:$0xff]  ;;  %v89_v12 = vld [vmem:[%s12042_s1 + $0x50] sm:$0xff]  ;;  %v90_v13 = vld [vmem:[%s12042_s1 + $0x58] sm:$0xff] }
  0x15   :  { %7500 = vmatmul.mubr.msk.f32.vlgmr.msra.gmra.mxu0 %vm152_vm1, %v80_v3  ;;  %v91_v14 = vld [vmem:[%s12042_s1 + $0x60] sm:$0xff]  ;;  %v92_v15 = vld [vmem:[%s12042_s1 + $0x68] sm:$0xff]  ;;  %v93_v16 = vld [vmem:[%s12042_s1 + $0x70] sm:$0xff] }
  0x16   :  { %7502 = vmatprep.mubr.msk.f32.mxu0 %vm152_vm1, %v81_v4  ;;  %v94_v17 = vld [vmem:[%s12042_s1 + $0x78] sm:$0xff]  ;;  %v95_v18 = vld [vmem:[%s12042_s1 + $0x80] sm:$0xff]  ;;  %v96_v19 = vld [vmem:[%s12042_s1 + $0x88] sm:$0xff] }
  0x17   :  { %v97_v20 = vld [vmem:[%s12042_s1 + $0x90] sm:$0xff]  ;;  %v98_v21 = vld [vmem:[%s12042_s1 + $0x98] sm:$0xff]  ;;  %v99_v22 = vld [vmem:[%s12042_s1 + $0xa0] sm:$0xff] }
  0x18   :  { %v100_v23 = vld [vmem:[%s12042_s1 + $0xa8] sm:$0xff]  ;;  %v101_v24 = vld [vmem:[%s12042_s1 + $0xb0] sm:$0xff]  ;;  %v102_v25 = vld [vmem:[%s12042_s1 + $0xb8] sm:$0xff] }
  0x19   :  { %7503 = vmatmul.mubr.msk.f32.gmra.mxu0 %vm152_vm1, %v82_v5  ;;  %v103_v26 = vld [vmem:[%s12042_s1 + $0xc0] sm:$0xff]  ;;  %v104_v27 = vld [vmem:[%s12042_s1 + $0xc8] sm:$0xff]  ;;  %v105_v28 = vld [vmem:[%s12042_s1 + $0xd0] sm:$0xff] }
  0x1a   :  { %7505 = vmatprep.mubr.msk.f32.mxu0 %vm152_vm1, %v83_v6  ;;  %v106_v29 = vld [vmem:[%s12042_s1 + $0xd8] sm:$0xff]  ;;  %v107_v30 = vld [vmem:[%s12042_s1 + $0xe0] sm:$0xff]  ;;  %v108_v31 = vld [vmem:[%s12042_s1 + $0xe8] sm:$0xff] }
  0x1b   :  { %v109_v32 = vld [vmem:[%s12042_s1 + $0xf0] sm:$0xff]  ;;  %v110_v33 = vld [vmem:[%s12042_s1 + $0xf8] sm:$0xff]  ;;  %v111_v34 = vld [vmem:[%s12042_s1 + $0x100] sm:$0xff] }
  0x1c   :  { %v112_v35 = vld [vmem:[%s12042_s1 + $0x108] sm:$0xff]  ;;  %v113_v36 = vld [vmem:[%s12042_s1 + $0x110] sm:$0xff]  ;;  %v114_v37 = vld [vmem:[%s12042_s1 + $0x118] sm:$0xff] }
  0x1d   :  { %7506 = vmatmul.mubr.msk.f32.gmra.mxu0 %vm152_vm1, %v84_v7  ;;  %v115_v38 = vld [vmem:[%s12042_s1 + $0x120] sm:$0xff]  ;;  %v116_v39 = vld [vmem:[%s12042_s1 + $0x128] sm:$0xff]  ;;  %v117_v40 = vld [vmem:[%s12042_s1 + $0x130] sm:$0xff] }
  0x1e   :  { %7508 = vmatprep.mubr.msk.f32.mxu0 %vm152_vm1, %v85_v8  ;;  %v118_v41 = vld [vmem:[%s12042_s1 + $0x138] sm:$0xff]  ;;  %v119_v42 = vld [vmem:[%s12042_s1 + $0x140] sm:$0xff]  ;;  %v120_v43 = vld [vmem:[%s12042_s1 + $0x148] sm:$0xff] }
  0x1f   :  { %v121_v44 = vld [vmem:[%s12042_s1 + $0x150] sm:$0xff]  ;;  %v122_v45 = vld [vmem:[%s12042_s1 + $0x158] sm:$0xff]  ;;  %v123_v46 = vld [vmem:[%s12042_s1 + $0x160] sm:$0xff] }
  0x20   :  { %v124_v47 = vld [vmem:[%s12042_s1 + $0x168] sm:$0xff]  ;;  %v125_v48 = vld [vmem:[%s12042_s1 + $0x170] sm:$0xff]  ;;  %v126_v49 = vld [vmem:[%s12042_s1 + $0x178] sm:$0xff] }
  0x21   :  { %7509 = vmatmul.mubr.msk.f32.gmra.mxu0 %vm152_vm1, %v86_v9  ;;  %v127_v50 = vld [vmem:[%s12042_s1 + $0x180] sm:$0xff]  ;;  %v128_v51 = vld [vmem:[%s12042_s1 + $0x188] sm:$0xff]  ;;  %v129_v52 = vld [vmem:[%s12042_s1 + $0x190] sm:$0xff] }
  0x22   :  { %7511 = vmatprep.mubr.msk.f32.mxu0 %vm152_vm1, %v87_v10  ;;  %v130_v53 = vld [vmem:[%s12042_s1 + $0x198] sm:$0xff]  ;;  %v131_v54 = vld [vmem:[%s12042_s1 + $0x1a0] sm:$0xff]  ;;  %v132_v55 = vld [vmem:[%s12042_s1 + $0x1a8] sm:$0xff] }
  0x23   :  { %v133_v56 = vld [vmem:[%s12042_s1 + $0x1b0] sm:$0xff]  ;;  %v134_v57 = vld [vmem:[%s12042_s1 + $0x1b8] sm:$0xff]  ;;  %v135_v58 = vld [vmem:[%s12042_s1 + $0x1c0] sm:$0xff] }
  0x24   :  { %v136_v59 = vld [vmem:[%s12042_s1 + $0x1c8] sm:$0xff]  ;;  %v137_v60 = vld [vmem:[%s12042_s1 + $0x1d0] sm:$0xff]  ;;  %v138_v61 = vld [vmem:[%s12042_s1 + $0x1d8] sm:$0xff] }
  0x25   :  { %7512 = vmatmul.mubr.msk.f32.gmra.mxu0 %vm152_vm1, %v88_v11  ;;  %v139_v62 = vld [vmem:[%s12042_s1 + $0x1e0] sm:$0xff]  ;;  %v140_v63 = vld [vmem:[%s12042_s1 + $0x1e8] sm:$0xff]  ;;  %v141_v0 = vld [vmem:[%s12042_s1 + $0x1f0] sm:$0xff] }
  0x26   :  { %7514 = vmatprep.mubr.msk.f32.mxu0 %vm152_vm1, %v89_v12  ;;  %v142_v1 = vld [vmem:[%s12042_s1 + $0x1f8] sm:$0xff] }
  0x29   :  { %7515 = vmatmul.mubr.msk.f32.gmra.mxu0 %vm152_vm1, %v90_v13 }
  0x2a   :  { %7517 = vmatprep.mubr.msk.f32.mxu0 %vm152_vm1, %v91_v14  ;;  %v9048_v14 = vld [vmem:[%s12043_s30] ss:$0 sm:$0xff] }
  0x2d   :  { %7518 = vmatmul.mubr.msk.f32.gmra.mxu0 %vm152_vm1, %v92_v15 }
  0x2e   :  { %7520 = vmatprep.mubr.msk.f32.mxu0 %vm152_vm1, %v93_v16 }
  0x31   :  { %7521 = vmatmul.mubr.msk.f32.gmra.mxu0 %vm152_vm1, %v94_v17 }
  0x32   :  { %7523 = vmatprep.mubr.msk.f32.mxu0 %vm152_vm1, %v95_v18 }
  0x35   :  { %7524 = vmatmul.mubr.msk.f32.gmra.mxu0 %vm152_vm1, %v96_v19 }
  0x36   :  { %7526 = vmatprep.mubr.msk.f32.mxu0 %vm152_vm1, %v97_v20 }
  0x39   :  { %7527 = vmatmul.mubr.msk.f32.gmra.mxu0 %vm152_vm1, %v98_v21 }
  0x3a   :  { %7529 = vmatprep.mubr.msk.f32.mxu0 %vm152_vm1, %v99_v22  ;;  %v9063_v22 = vld [vmem:[%s12044_s7] ss:$0 sm:$0xff] }
  0x3d   :  { %7530 = vmatmul.mubr.msk.f32.gmra.mxu0 %vm152_vm1, %v100_v23 }
  0x3e   :  { %7532 = vmatprep.mubr.msk.f32.mxu0 %vm152_vm1, %v101_v24 }
  0x41   :  { %7533 = vmatmul.mubr.msk.f32.gmra.mxu0 %vm152_vm1, %v102_v25 }
  0x42   :  { %7535 = vmatprep.mubr.msk.f32.mxu0 %vm152_vm1, %v103_v26 }
  0x45   :  { %7536 = vmatmul.mubr.msk.f32.gmra.mxu0 %vm152_vm1, %v104_v27 }
  0x46   :  { %7538 = vmatprep.mubr.msk.f32.mxu0 %vm152_vm1, %v105_v28 }
  0x49   :  { %7539 = vmatmul.mubr.msk.f32.gmra.mxu0 %vm152_vm1, %v106_v29  ;;  %v9072_v29 = vld [vmem:[%s12045_s5] ss:$0 sm:$0xff] }
  0x4a   :  { %7541 = vmatprep.mubr.msk.f32.mxu0 %vm152_vm1, %v107_v30 }
  0x4d   :  { %7542 = vmatmul.mubr.msk.f32.gmra.mxu0 %vm152_vm1, %v108_v31 }
  0x4e   :  { %7544 = vmatprep.mubr.msk.f32.mxu0 %vm152_vm1, %v109_v32 }
  0x51   :  { %7545 = vmatmul.mubr.msk.f32.gmra.mxu0 %vm152_vm1, %v110_v33 }
  0x52   :  { %7547 = vmatprep.mubr.msk.f32.mxu0 %vm152_vm1, %v111_v34 }
  0x55   :  { %7548 = vmatmul.mubr.msk.f32.gmra.mxu0 %vm152_vm1, %v112_v35 }
  0x56   :  { %7550 = vmatprep.mubr.msk.f32.mxu0 %vm152_vm1, %v113_v36 }
  0x59   :  { %7551 = vmatmul.mubr.msk.f32.gmra.mxu0 %vm152_vm1, %v114_v37 }
  0x5a   :  { %7553 = vmatprep.mubr.msk.f32.mxu0 %vm152_vm1, %v115_v38 }
  0x5d   :  { %7554 = vmatmul.mubr.msk.f32.gmra.mxu0 %vm152_vm1, %v116_v39 }
  0x5e   :  { %7556 = vmatprep.mubr.msk.f32.mxu0 %vm152_vm1, %v117_v40 }
  0x61   :  { %7557 = vmatmul.mubr.msk.f32.gmra.mxu0 %vm152_vm1, %v118_v41 }
  0x62   :  { %7559 = vmatprep.mubr.msk.f32.mxu0 %vm152_vm1, %v119_v42  ;;  %v988_v42 = vld [vmem:[%s12046_s28] sm:$0xff] }
  0x63   :  { %7627 = vmatprep.mubr.f32.mxu1 %v988_v42 }
  0x65   :  { %7560 = vmatmul.mubr.msk.f32.gmra.mxu0 %vm152_vm1, %v120_v43 }
  0x66   :  { %7562 = vmatprep.mubr.msk.f32.mxu0 %vm152_vm1, %v121_v44 }
  0x69   :  { %7563 = vmatmul.mubr.msk.f32.gmra.mxu0 %vm152_vm1, %v122_v45  ;;  %v6378_v45 = vld [vmem:[%s12046_s28 + $0x200] sm:$0xff] }
  0x6a   :  { %7565 = vmatprep.mubr.msk.f32.mxu0 %vm152_vm1, %v123_v46 }
  0x6d   :  { %7566 = vmatmul.mubr.msk.f32.gmra.mxu0 %vm152_vm1, %v124_v47 }
  0x6e   :  { %7568 = vmatprep.mubr.msk.f32.mxu0 %vm152_vm1, %v125_v48 }
  0x71   :  { %7569 = vmatmul.mubr.msk.f32.gmra.mxu0 %vm152_vm1, %v126_v49 }
  0x72   :  { %7571 = vmatprep.mubr.msk.f32.mxu0 %vm152_vm1, %v127_v50 }
  0x75   :  { %7572 = vmatmul.mubr.msk.f32.gmra.mxu0 %vm152_vm1, %v128_v51 }
  0x76   :  { %7574 = vmatprep.mubr.msk.f32.mxu0 %vm152_vm1, %v129_v52 }
  0x79   :  { %7575 = vmatmul.mubr.msk.f32.gmra.mxu0 %vm152_vm1, %v130_v53 }
  0x7a   :  { %7577 = vmatprep.mubr.msk.f32.mxu0 %vm152_vm1, %v131_v54 }
  0x7d   :  { %7578 = vmatmul.mubr.msk.f32.gmra.mxu0 %vm152_vm1, %v132_v55 }
  0x7e   :  { %7580 = vmatprep.mubr.msk.f32.mxu0 %vm152_vm1, %v133_v56 }
  0x81   :  { %7581 = vmatmul.mubr.msk.f32.gmra.mxu0 %vm152_vm1, %v134_v57 }
  0x82   :  { %7583 = vmatprep.mubr.msk.f32.mxu0 %vm152_vm1, %v135_v58 }
  0x85   :  { %7584 = vmatmul.mubr.msk.f32.gmra.mxu0 %vm152_vm1, %v136_v59 }
  0x86   :  { %7586 = vmatprep.mubr.msk.f32.mxu0 %vm152_vm1, %v137_v60 }
  0x89   :  { %7587 = vmatmul.mubr.msk.f32.gmra.mxu0 %vm152_vm1, %v138_v61 }
  0x8a   :  { %7589 = vmatprep.mubr.msk.f32.mxu0 %vm152_vm1, %v139_v62 }
  0x8d   :  { %7590 = vmatmul.mubr.msk.f32.gmra.mxu0 %vm152_vm1, %v140_v63 }
  0x8e   :  { %7592 = vmatprep.mubr.msk.f32.mxu0 %vm152_vm1, %v141_v0 }
  0x91   :  { %7593 = vmatmul.mubr.msk.f32.gmra.mxu0 %vm152_vm1, %v142_v1 }
  0x92   :  { %7851 = vmatprep.mubr.f32.mxu0 %v6378_v45 }
  0xd5   :  { %v7501_v2 = vpop.f32.mrf.mxu0 }
  0xd6   :  { %v421_v17 = vadd.f32 %v7501_v2, %v9048_v14 }
  0xd7   :  { %v9033_v3 = vpop.f32.mrf.mxu0 }
  0xd8   :  { %v735_v20 = vmax.f32 %v421_v17, 0.0 }
  0xd9   :  { %v7504_v4 = vpop.f32.mrf.mxu0 }
  0xda   :  { %v431_v21 = vadd.f32 %v7504_v4, %v9048_v14  ;;  %v806_v26 = vmul.f32 %v9063_v22, %v735_v20 }
  0xdb   :  { %v9035_v5 = vpop.f32.mrf.mxu0 }
  0xdc   :  { %v737_v27 = vmax.f32 %v431_v21, 0.0  ;;  %v9081_v36 = vadd.f32 %v9072_v29, %v806_v26 }
  0xdd   :  { %v7507_v6 = vpop.f32.mrf.mxu0 }
  0xde   :  { %v441_v30 = vadd.f32 %v7507_v6, %v9048_v14  ;;  %v808_v37 = vmul.f32 %v9063_v22, %v737_v27 }
  0xdf   :  { %v9037_v7 = vpop.f32.mrf.mxu0 }
  0xe0   :  { %v739_v40 = vmax.f32 %v441_v30, 0.0  ;;  %v9101_v50 = vadd.f32 %v9072_v29, %v808_v37 }
  0xe1   :  { %v7510_v8 = vpop.f32.mrf.mxu0 }
  0xe2   :  { %v451_v34 = vadd.f32 %v7510_v8, %v9048_v14  ;;  %v810_v52 = vmul.f32 %v9063_v22, %v739_v40 }
  0xe3   :  { %v9039_v9 = vpop.f32.mrf.mxu0 }
  0xe4   :  { %v741_v46 = vmax.f32 %v451_v34, 0.0  ;;  %v9116_v63 = vadd.f32 %v9072_v29, %v810_v52 }
  0xe5   :  { %v7513_v10 = vpop.f32.mrf.mxu0 }
  0xe6   :  { %v461_v47 = vadd.f32 %v7513_v10, %v9048_v14  ;;  %v812_v57 = vmul.f32 %v9063_v22, %v741_v46 }
  0xe7   :  { %v9041_v11 = vpop.f32.mrf.mxu0 }
  0xe8   :  { %v743_v58 = vmax.f32 %v461_v47, 0.0  ;;  %v9124_v6 = vadd.f32 %v9072_v29, %v812_v57 }
  0xe9   :  { %v7516_v12 = vpop.f32.mrf.mxu0 }
  0xea   :  { %v471_v61 = vadd.f32 %v7516_v12, %v9048_v14  ;;  %v814_v8 = vmul.f32 %v9063_v22, %v743_v58 }
  0xeb   :  { %v9043_v13 = vpop.f32.mrf.mxu0 }
  0xec   :  { %v745_v17 = vmax.f32 %v471_v61, 0.0  ;;  %v9141_v30 = vadd.f32 %v9072_v29, %v814_v8 }
  0xed   :  { %v9050_v15 = vpop.f32.mrf.mxu0 }
  0xee   :  { %v481_v20 = vadd.f32 %v9050_v15, %v9048_v14  ;;  %12047 = vst [vmem:[#allocation3_spill] sm:$0xff] %v9141_v30 }
  0xef   :  { %v9052_v16 = vpop.f32.mrf.mxu0 }
  0xf0   :  { %v747_v15 = vmax.f32 %v481_v20, 0.0 }
  0xf1   :  { %v9055_v18 = vpop.f32.mrf.mxu0 }
  0xf2   :  { %v491_v37 = vadd.f32 %v9055_v18, %v9048_v14  ;;  %v818_v46 = vmul.f32 %v9063_v22, %v747_v15 }
  0xf3   :  { %v9057_v19 = vpop.f32.mrf.mxu0 }
  0xf4   :  { %v749_v18 = vmax.f32 %v491_v37, 0.0  ;;  %v9169_v58 = vadd.f32 %v9072_v29, %v818_v46 }
  0xf5   :  { %v7525_v23 = vpop.f32.mrf.mxu0 }
  0xf6   :  { %v501_v24 = vadd.f32 %v7525_v23, %v9048_v14  ;;  %v820_v61 = vmul.f32 %v9063_v22, %v749_v18 }
  0xf7   :  { %v9066_v25 = vpop.f32.mrf.mxu0 }
  0xf8   :  { %v751_v28 = vmax.f32 %v501_v24, 0.0 }
  0xf9   :  { %v7528_v31 = vpop.f32.mrf.mxu0 }
  0xfa   :  { %v822_v32 = vmul.f32 %v9063_v22, %v751_v28  ;;  %v511_v33 = vadd.f32 %v7528_v31, %v9048_v14 }
  0xfb   :  { %v9078_v35 = vpop.f32.mrf.mxu0 }
  0xfc   :  { %v9085_v38 = vadd.f32 %v9072_v29, %v822_v32  ;;  %v753_v39 = vmax.f32 %v511_v33, 0.0  ;;  %v816_v32 = vmul.f32 %v9063_v22, %v745_v17  ;;  %v9181_v17 = vadd.f32 %v9072_v29, %v820_v61 }
  0xfd   :  { %v7531_v41 = vpop.f32.mrf.mxu0 }
  0xfe   :  { %v824_v44 = vmul.f32 %v9063_v22, %v753_v39  ;;  %v521_v48 = vadd.f32 %v7531_v41, %v9048_v14  ;;  %v9158_v45 = vadd.f32 %v9072_v29, %v816_v32 }
  0xff   :  { %v9098_v49 = vpop.f32.mrf.mxu0 }
 0x100   :  { %v9104_v51 = vadd.f32 %v9072_v29, %v824_v44  ;;  %v755_v53 = vmax.f32 %v521_v48, 0.0 }
 0x101   :  { %v7534_v54 = vpop.f32.mrf.mxu0 }
 0x102   :  { %v531_v56 = vadd.f32 %v7534_v54, %v9048_v14  ;;  %v826_v59 = vmul.f32 %v9063_v22, %v755_v53 }
 0x103   :  { %v9112_v60 = vpop.f32.mrf.mxu0 }
 0x104   :  { %v757_v62 = vmax.f32 %v531_v56, 0.0  ;;  %v9119_v0 = vadd.f32 %v9072_v29, %v826_v59 }
 0x105   :  { %v7537_v1 = vpop.f32.mrf.mxu0 }
 0x106   :  { %v828_v2 = vmul.f32 %v9063_v22, %v757_v62  ;;  %v541_v4 = vadd.f32 %v7537_v1, %v9048_v14 }
 0x107   :  { %v9129_v12 = vpop.f32.mrf.mxu0 }
 0x108   :  { %v9134_v21 = vadd.f32 %v9072_v29, %v828_v2  ;;  %v759_v23 = vmax.f32 %v541_v4, 0.0 }
 0x109   :  { %v7540_v24 = vpop.f32.mrf.mxu0 }
 0x10a   :  { %v830_v27 = vmul.f32 %v9063_v22, %v759_v23  ;;  %v551_v28 = vadd.f32 %v7540_v24, %v9048_v14 }
 0x10b   :  { %v9143_v31 = vpop.f32.mrf.mxu0 }
 0x10c   :  { %v9147_v33 = vadd.f32 %v9072_v29, %v830_v27  ;;  %v761_v34 = vmax.f32 %v551_v28, 0.0 }
 0x10d   :  { %v7543_v39 = vpop.f32.mrf.mxu0 }
 0x10e   :  { %12048 = vst [vmem:[#allocation4_spill] sm:$0xff] %v9147_v33  ;;  %v832_v41 = vmul.f32 %v9063_v22, %v761_v34  ;;  %v561_v42 = vadd.f32 %v7543_v39, %v9048_v14 }
 0x10f   :  { %v9155_v44 = vpop.f32.mrf.mxu0 }
 0x110   :  { %v9162_v47 = vadd.f32 %v9072_v29, %v832_v41  ;;  %v763_v48 = vmax.f32 %v561_v42, 0.0 }
 0x111   :  { %v7546_v52 = vpop.f32.mrf.mxu0 }
 0x112   :  { %v834_v54 = vmul.f32 %v9063_v22, %v763_v48  ;;  %v571_v56 = vadd.f32 %v7546_v52, %v9048_v14 }
 0x113   :  { %v565_v57 = vpop.f32.mrf.mxu0 }
 0x114   :  { %v9172_v59 = vadd.f32 %v9072_v29, %v834_v54  ;;  %v765_v62 = vmax.f32 %v571_v56, 0.0 }
 0x115   :  { %v7549_v1 = vpop.f32.mrf.mxu0 }
 0x116   :  { %v836_v4 = vmul.f32 %v9063_v22, %v765_v62  ;;  %v581_v48 = vadd.f32 %v7549_v1, %v9048_v14  ;;  %v456_v1 = vadd.f32 %v9048_v14, %v9041_v11 }
 0x117   :  { %v9178_v8 = vpop.f32.mrf.mxu0 }
 0x118   :  { %v9184_v20 = vadd.f32 %v9072_v29, %v836_v4  ;;  %v767_v54 = vmax.f32 %v581_v48, 0.0  ;;  %v446_v48 = vadd.f32 %v9048_v14, %v9039_v9 }
 0x119   :  { %v7552_v23 = vpop.f32.mrf.mxu0 }
 0x11a   :  { %v591_v61 = vadd.f32 %v7552_v23, %v9048_v14  ;;  %v838_v40 = vmul.f32 %v9063_v22, %v767_v54  ;;  %v466_v23 = vadd.f32 %v9048_v14, %v9043_v13  ;;  %v9237_v13 = vadd.f32 %v9048_v14, %v9035_v5 }
 0x11b   :  { %v9188_v27 = vpop.f32.mrf.mxu0  ;;  %v566_v5 = vadd.f32 %v9048_v14, %v565_v57 }
 0x11c   :  { %v769_v2 = vmax.f32 %v591_v61, 0.0  ;;  %v9227_v61 = vadd.f32 %v9048_v14, %v9033_v3  ;;  %v476_v3 = vadd.f32 %v9048_v14, %v9052_v16  ;;  %v744_v33 = vmax.f32 %v466_v23, 0.0 }
 0x11d   :  { %v7555_v28 = vpop.f32.mrf.mxu0 }
 0x11e   :  { %v601_v26 = vadd.f32 %v7555_v28, %v9048_v14  ;;  %12049 = vst [vmem:[#allocation5_spill] sm:$0xff] %v9227_v61  ;;  %v840_v28 = vmul.f32 %v9063_v22, %v769_v2 }
 0x11f   :  { %v9190_v32 = vpop.f32.mrf.mxu0 }
 0x120   :  { %v911_v16 = vadd.f32 %v9072_v29, %v840_v28 }
 0x121   :  { %v7558_v15 = vpop.f32.mrf.mxu0 }
 0x122   :  { %v611_v55 = vadd.f32 %v7558_v15, %v9048_v14  ;;  %v486_v15 = vadd.f32 %v9048_v14, %v9057_v19 }
 0x123   :  { %v9192_v34 = vpop.f32.mrf.mxu0 }
 0x125   :  { %v9194_v37 = vpop.f32.mrf.mxu0 }
 0x127   :  { %v9196_v39 = vpop.f32.mrf.mxu0 }
 0x129   :  { %v9198_v41 = vpop.f32.mrf.mxu0 }
 0x12b   :  { %v9200_v42 = vpop.f32.mrf.mxu0 }
 0x12d   :  { %v9202_v46 = vpop.f32.mrf.mxu0 }
 0x12f   :  { %v9205_v18 = vpop.f32.mrf.mxu0 }
 0x131   :  { %v9207_v52 = vpop.f32.mrf.mxu0 }
 0x133   :  { %v9209_v56 = vpop.f32.mrf.mxu0 }
 0x135   :  { %v7573_v62 = vpop.f32.mrf.mxu0 }
 0x136   :  { %v661_v4 = vadd.f32 %v7573_v62, %v9048_v14 }
 0x137   :  { %v9214_v53 = vpop.f32.mrf.mxu0 }
 0x138   :  { %v783_v24 = vmax.f32 %v661_v4, 0.0  ;;  %v909_v4 = vadd.f32 %v9072_v29, %v838_v40  ;;  %v740_v40 = vmax.f32 %v446_v48, 0.0  ;;  %v12050_v48 = vmax.f32 %v9081_v36, %v9085_v38 }
 0x139   :  { %v7576_v10 = vpop.f32.mrf.mxu0  ;;  %v815_v38 = vmul.f32 %v9063_v22, %v744_v33  ;;  %v526_v33 = vadd.f32 %v9048_v14, %v9112_v60 }
 0x13a   :  { %v854_v62 = vmul.f32 %v9063_v22, %v783_v24  ;;  %v671_v54 = vadd.f32 %v7576_v10, %v9048_v14  ;;  %v742_v10 = vmax.f32 %v456_v1, 0.0  ;;  %v771_v24 = vmax.f32 %v601_v26, 0.0 }
 0x13b   :  { %v9230_v11 = vpop.f32.mrf.mxu0  ;;  %v773_v26 = vmax.f32 %v611_v55, 0.0  ;;  %v546_v55 = vadd.f32 %v9048_v14, %v9143_v31 }
 0x13c   :  { %v925_v9 = vadd.f32 %v9072_v29, %v854_v62  ;;  %v785_v43 = vmax.f32 %v671_v54, 0.0  ;;  %v556_v62 = vadd.f32 %v9048_v14, %v9155_v44  ;;  %v813_v19 = vmul.f32 %v9063_v22, %v742_v10 }
 0x13d   :  { %v7579_v61 = vpop.f32.mrf.mxu0  ;;  %v842_v44 = vmul.f32 %v9063_v22, %v771_v24  ;;  %v748_v24 = vmax.f32 %v486_v15, 0.0  ;;  %v9281_v15 = vadd.f32 %v9048_v14, %v9037_v7 }
 0x13e   :  { %v957_v30 = vmax.f32 %v909_v4, %v925_v9  ;;  %v856_v2 = vmul.f32 %v9063_v22, %v785_v43  ;;  %v681_v1 = vadd.f32 %v7579_v61, %v9048_v14  ;;  %v746_v4 = vmax.f32 %v476_v3, 0.0 }
 0x13f   :  { %v9248_v54 = vpop.f32.mrf.mxu0  ;;  %v536_v61 = vadd.f32 %v9048_v14, %v9129_v12  ;;  %v12051_v12 = vmax.f32 %v9101_v50, %v9104_v51  ;;  %v9285_v51 = vmul.f32 %v9063_v22, %v740_v40 }
 0x140   :  { %v9254_v23 = vmax.f32 %v12050_v48, %v957_v30  ;;  %v927_v43 = vadd.f32 %v9072_v29, %v856_v2  ;;  %v787_v57 = vmax.f32 %v681_v1, 0.0  ;;  %v762_v30 = vmax.f32 %v556_v62, 0.0 }
 0x141   :  { %v7582_v9 = vpop.f32.mrf.mxu0  ;;  %v764_v2 = vmax.f32 %v566_v5, 0.0  ;;  %v844_v1 = vmul.f32 %v9063_v22, %v773_v26  ;;  %v913_v62 = vadd.f32 %v9072_v29, %v842_v44  ;;  %v758_v26 = vmax.f32 %v536_v61, 0.0 }
 0x142   :  { %v959_v28 = vmax.f32 %v911_v16, %v927_v43  ;;  %v691_v36 = vadd.f32 %v7582_v9, %v9048_v14  ;;  %v858_v10 = vmul.f32 %v9063_v22, %v787_v57  ;;  %v817_v16 = vmul.f32 %v9063_v22, %v746_v4 }
 0x143   :  { %v9266_v3 = vpop.f32.mrf.mxu0  ;;  %v760_v57 = vmax.f32 %v546_v55, 0.0  ;;  %v833_v4 = vmul.f32 %v9063_v22, %v762_v30  ;;  %v835_v60 = vmul.f32 %v9063_v22, %v764_v2  ;;  %v915_v7 = vadd.f32 %v9072_v29, %v844_v1 }
 0x144   :  { %v9272_v48 = vmax.f32 %v12051_v12, %v959_v28  ;;  %v789_v31 = vmax.f32 %v691_v36, 0.0  ;;  %v929_v5 = vadd.f32 %v9072_v29, %v858_v10  ;;  %v9290_v28 = vadd.f32 %v9072_v29, %v813_v19 }
 0x145   :  { %v7585_v43 = vpop.f32.mrf.mxu0  ;;  %v819_v36 = vmul.f32 %v9063_v22, %v748_v24  ;;  %v9296_v55 = vadd.f32 %v9072_v29, %v815_v38  ;;  %v9299_v40 = vadd.f32 %v9072_v29, %v817_v16  ;;  %v756_v30 = vmax.f32 %v526_v33, 0.0 }
 0x146   :  { %v860_v50 = vmul.f32 %v9063_v22, %v789_v31  ;;  %v961_v9 = vmax.f32 %v913_v62, %v929_v5  ;;  %v12052_v2 = vmax.f32 %v9116_v63, %v9119_v0  ;;  %v829_v12 = vmul.f32 %v9063_v22, %v758_v26 }
 0x147   :  { %v695_v44 = vpop.f32.mrf.mxu0  ;;  %v831_v24 = vmul.f32 %v9063_v22, %v760_v57  ;;  %v621_v1 = vadd.f32 %v9194_v37, %v9048_v14  ;;  %v9312_v38 = vadd.f32 %v9048_v14, %v9066_v25  ;;  %v9315_v16 = vadd.f32 %v9072_v29, %v833_v4 }
 0x148   :  { %v931_v61 = vadd.f32 %v9072_v29, %v860_v50  ;;  %v9304_v10 = vmax.f32 %v12052_v2, %v961_v9  ;;  %v9318_v63 = vadd.f32 %v9072_v29, %v835_v60  ;;  %v651_v0 = vadd.f32 %v9207_v52, %v9048_v14 }
 0x149   :  { %v7588_v19 = vpop.f32.mrf.mxu0  ;;  %v9323_v62 = vadd.f32 %v9072_v29, %v819_v36  ;;  %v9327_v37 = vadd.f32 %v9048_v14, %v9078_v35  ;;  %v9331_v25 = vadd.f32 %v9048_v14, %v9098_v49  ;;  %v12053_v5 = vmax.f32 %v9124_v6, %v9134_v21 }
 0x14a   :  { %v963_v31 = vmax.f32 %v915_v7, %v931_v61  ;;  %v9339_v57 = vmul.f32 %v9063_v22, %v756_v30  ;;  %v631_v52 = vadd.f32 %v9198_v41, %v9048_v14  ;;  %v641_v50 = vadd.f32 %v9202_v46, %v9048_v14 }
 0x14b   :  { %v705_v33 = vpop.f32.mrf.mxu0  ;;  %v646_v35 = vadd.f32 %v9048_v14, %v9209_v56  ;;  %v9348_v49 = vadd.f32 %v9072_v29, %v829_v12  ;;  %v9351_v6 = vadd.f32 %v9072_v29, %v831_v24  ;;  %v775_v21 = vmax.f32 %v621_v1, 0.0 }
 0x14c   :  { %v9336_v26 = vmax.f32 %v12053_v5, %v963_v31  ;;  %v636_v46 = vadd.f32 %v9048_v14, %v9205_v18  ;;  %v781_v56 = vmax.f32 %v651_v0, 0.0  ;;  %v9362_v7 = vadd.f32 %v9048_v14, %v9192_v34 }
 0x14d   :  { %v7591_v4 = vpop.f32.mrf.mxu0  ;;  %v711_v61 = vadd.f32 %v7588_v19, %v9048_v14  ;;  %v616_v12 = vadd.f32 %v9048_v14, %v9196_v39  ;;  %v777_v24 = vmax.f32 %v631_v52, 0.0  ;;  %v779_v1 = vmax.f32 %v641_v50, 0.0 }
 0x14e   :  { %v721_v60 = vadd.f32 %v7591_v4, %v9048_v14  ;;  %v780_v31 = vmax.f32 %v646_v35, 0.0  ;;  %v9369_v18 = vmul.f32 %v9063_v22, %v775_v21  ;;  %v706_v0 = vadd.f32 %v9048_v14, %v705_v33 }
 0x14f   :  { %v715_v36 = vpop.f32.mrf.mxu0  ;;  %v626_v19 = vadd.f32 %v9048_v14, %v9200_v42  ;;  %v701_v39 = vadd.f32 %v7585_v43, %v9048_v14  ;;  %v793_v50 = vmax.f32 %v711_v61, 0.0  ;;  %v848_v33 = vmul.f32 %v9063_v22, %v777_v24 }
 0x150   :  { %v795_v30 = vmax.f32 %v721_v60, 0.0  ;;  %v716_v2 = vadd.f32 %v9048_v14, %v715_v36  ;;  %v778_v60 = vmax.f32 %v636_v46, 0.0  ;;  %v852_v36 = vmul.f32 %v9063_v22, %v781_v56 }
 0x151   :  { %v7594_v5 = vpop.f32.mrf.mxu0  ;;  %v696_v42 = vadd.f32 %v9048_v14, %v695_v44  ;;  %v792_v46 = vmax.f32 %v706_v0, 0.0  ;;  %v776_v61 = vmax.f32 %v626_v19, 0.0  ;;  %v864_v24 = vmul.f32 %v9063_v22, %v793_v50 }
 0x152   :  { %v794_v4 = vmax.f32 %v716_v2, 0.0  ;;  %v731_v34 = vadd.f32 %v7594_v5, %v9048_v14  ;;  %v866_v35 = vmul.f32 %v9063_v22, %v795_v30  ;;  %v850_v2 = vmul.f32 %v9063_v22, %v779_v1 }
 0x153   :  { %v725_v52 = vpop.f32.mrf.mxu0  ;;  %v851_v5 = vmul.f32 %v9063_v22, %v780_v31  ;;  %v849_v30 = vmul.f32 %v9063_v22, %v778_v60  ;;  %v790_v19 = vmax.f32 %v696_v42, 0.0  ;;  %v863_v60 = vmul.f32 %v9063_v22, %v792_v46 }
 0x154   :  { %v797_v9 = vmax.f32 %v731_v34, 0.0  ;;  %v726_v21 = vadd.f32 %v9048_v14, %v725_v52  ;;  %v865_v56 = vmul.f32 %v9063_v22, %v794_v4  ;;  %v923_v34 = vadd.f32 %v9072_v29, %v852_v36 }
 0x155   :  { %v791_v52 = vmax.f32 %v701_v39, 0.0  ;;  %v937_v1 = vadd.f32 %v9072_v29, %v866_v35  ;;  %v921_v0 = vadd.f32 %v9072_v29, %v850_v2  ;;  %v922_v4 = vadd.f32 %v9072_v29, %v851_v5 }
 0x156   :  { %v868_v43 = vmul.f32 %v9063_v22, %v797_v9  ;;  %v796_v41 = vmax.f32 %v726_v21, 0.0  ;;  %v686_v9 = vadd.f32 %v9048_v14, %v9266_v3  ;;  %v936_v36 = vadd.f32 %v9072_v29, %v865_v56 }
 0x157   :  { %v774_v35 = vmax.f32 %v616_v12, 0.0  ;;  %v847_v21 = vmul.f32 %v9063_v22, %v776_v61  ;;  %v862_v2 = vmul.f32 %v9063_v22, %v791_v52  ;;  %v935_v5 = vadd.f32 %v9072_v29, %v864_v24 }
 0x158   :  { %v939_v31 = vadd.f32 %v9072_v29, %v868_v43  ;;  %v867_v44 = vmul.f32 %v9063_v22, %v796_v41  ;;  %v920_v41 = vadd.f32 %v9072_v29, %v849_v30  ;;  %v969_v43 = vmax.f32 %v921_v0, %v937_v1 }
 0x159   :  { %v12054_v3 = vmax.f32 %v9181_v17, %v9184_v20  ;;  %v919_v56 = vadd.f32 %v9072_v29, %v848_v33  ;;  %v676_v12 = vadd.f32 %v9048_v14, %v9248_v54  ;;  %v861_v61 = vmul.f32 %v9063_v22, %v790_v19 }
 0x15a   :  { %v971_v39 = vmax.f32 %v923_v34, %v939_v31  ;;  %v938_v50 = vadd.f32 %v9072_v29, %v867_v44  ;;  %v788_v34 = vmax.f32 %v686_v9, 0.0  ;;  %v934_v30 = vadd.f32 %v9072_v29, %v863_v60 }
 0x15b   :  { %v968_v52 = vmax.f32 %v920_v41, %v936_v36  ;;  %v12055_v24 = vmax.f32 %v9323_v62, %v9318_v63  ;;  %v596_v17 = vadd.f32 %v9048_v14, %v9190_v32  ;;  %v772_v20 = vmax.f32 %v9362_v7, 0.0 }
 0x15c   :  { %v9405_v42 = vmax.f32 %v12054_v3, %v971_v39  ;;  %v970_v46 = vmax.f32 %v922_v4, %v938_v50  ;;  %v845_v54 = vmul.f32 %v9063_v22, %v774_v35  ;;  %v918_v33 = vadd.f32 %v9072_v29, %v847_v21 }
 0x15d   :  { %v754_v63 = vmax.f32 %v9331_v25, 0.0  ;;  %v933_v62 = vadd.f32 %v9072_v29, %v862_v2  ;;  %v967_v31 = vmax.f32 %v919_v56, %v935_v5  ;;  %v12056_v44 = vmax.f32 %v9169_v58, %v9172_v59  ;;  %v12059_v56 = vld [vmem:[#allocation3_spill] sm:$0xff] }
 0x15e   :  { %v9415_v1 = vmax.f32 %v12055_v24, %v970_v46  ;;  %7595 = vmatprep.subr.mxu1 %v9405_v42  ;;  %7819 = vmatprep.subr.mxu0 %v9405_v42  ;;  %v917_v32 = vadd.f32 %v9072_v29, %v9369_v18  ;;  %v666_v7 = vadd.f32 %v9048_v14, %v9230_v11  ;;  %v786_v4 = vmax.f32 %v676_v12, 0.0 }
 0x15f   :  { %7596 = vmatpush3.msra.mxu1 %v9405_v42  ;;  %7820 = vmatpush3.msra.mxu0 %v9405_v42  ;;  %v9431_v0 = vmax.f32 %v12056_v44, %v969_v43  ;;  %v859_v25 = vmul.f32 %v9063_v22, %v788_v34  ;;  %v932_v58 = vadd.f32 %v9072_v29, %v861_v61  ;;  %v738_v11 = vmax.f32 %v9281_v15, 0.0 }
 0x160   :  { %7597 = vmatprep.subr.mxu1 %v9415_v1  ;;  %7821 = vmatprep.subr.mxu0 %v9415_v1  ;;  %v966_v59 = vmax.f32 %v918_v33, %v934_v30  ;;  %v12057_v9 = vmax.f32 %v9299_v40, %v9315_v16  ;;  %v950_v18 = vmax.f32 %v9296_v55, %v9351_v6  ;;  %v770_v40 = vmax.f32 %v596_v17, 0.0 }
 0x161   :  { %7598 = vmatpush3.msra.mxu1 %v9415_v1  ;;  %7822 = vmatpush3.msra.mxu0 %v9415_v1  ;;  %v586_v60 = vadd.f32 %v9048_v14, %v9188_v27  ;;  %v843_v36 = vmul.f32 %v9063_v22, %v772_v20  ;;  %v916_v16 = vadd.f32 %v9072_v29, %v845_v54  ;;  %v784_v6 = vmax.f32 %v666_v7, 0.0 }
 0x162   :  { %v9446_v19 = vmax.f32 %v12057_v9, %v968_v52  ;;  %7599 = vmatprep.subr.mxu1 %v9431_v0  ;;  %7823 = vmatprep.subr.mxu0 %v9431_v0  ;;  %v965_v39 = vmax.f32 %v917_v32, %v933_v62  ;;  %v12058_v50 = vmax.f32 %v9158_v45, %v9162_v47  ;;  %v736_v45 = vmax.f32 %v9237_v13, 0.0 }
 0x163   :  { %7600 = vmatpush3.msra.mxu1 %v9431_v0  ;;  %7824 = vmatpush3.msra.mxu0 %v9431_v0  ;;  %v825_v27 = vmul.f32 %v9063_v22, %v754_v63  ;;  %v656_v55 = vadd.f32 %v9048_v14, %v9214_v53  ;;  %v857_v35 = vmul.f32 %v9063_v22, %v786_v4  ;;  %v752_v53 = vmax.f32 %v9327_v37, 0.0  ;;  %v12060_v37 = vld [vmem:[#allocation4_spill] sm:$0xff]  ;;  %v12062_v63 = vld [vmem:[#allocation5_spill] sm:$0xff] }
 0x164   :  { %v9462_v15 = vmax.f32 %v12058_v50, %v967_v31  ;;  %7601 = vmatprep.subr.mxu1 %v9446_v19  ;;  %7825 = vmatprep.subr.mxu0 %v9446_v19  ;;  %v930_v47 = vadd.f32 %v9072_v29, %v859_v25  ;;  %v964_v21 = vmax.f32 %v916_v16, %v932_v58  ;;  %v768_v43 = vmax.f32 %v586_v60, 0.0 }
 0x165   :  { %7602 = vmatpush3.msra.mxu1 %v9446_v19  ;;  %7826 = vmatpush3.msra.mxu0 %v9446_v19  ;;  %v9474_v41 = vmax.f32 %v950_v18, %v966_v59  ;;  %v898_v2 = vadd.f32 %v9072_v29, %v9339_v57  ;;  %v948_v5 = vmax.f32 %v9290_v28, %v9348_v49  ;;  %v782_v28 = vmax.f32 %v656_v55, 0.0 }
 0x166   :  { %7603 = vmatprep.subr.mxu1 %v9462_v15  ;;  %7827 = vmatprep.subr.mxu0 %v9462_v15  ;;  %v576_v13 = vadd.f32 %v9048_v14, %v9178_v8  ;;  %v841_v3 = vmul.f32 %v9063_v22, %v770_v40  ;;  %v914_v46 = vadd.f32 %v9072_v29, %v843_v36  ;;  %v750_v52 = vmax.f32 %v9312_v38, 0.0 }
 0x167   :  { %7604 = vmatpush3.msra.mxu1 %v9462_v15  ;;  %7828 = vmatpush3.msra.mxu0 %v9462_v15  ;;  %v12061_v12 = vmax.f32 %v12059_v56, %v12060_v37  ;;  %v809_v14 = vmul.f32 %v9063_v22, %v738_v11  ;;  %v882_v8 = vadd.f32 %v9072_v29, %v9285_v51  ;;  %v734_v38 = vmax.f32 %v12062_v63, 0.0  ;;  %v994_v56 = vld [vmem:[%s12046_s28 + $0x30] sm:$0xff]  ;;  %v995_v37 = vld [vmem:[%s12046_s28 + $0x38] sm:$0xff] }
 0x168   :  { %7605 = vmatprep.subr.mxu1 %v9474_v41  ;;  %7829 = vmatprep.subr.mxu0 %v9474_v41  ;;  %v855_v57 = vmul.f32 %v9063_v22, %v784_v6  ;;  %v928_v49 = vadd.f32 %v9072_v29, %v857_v35  ;;  %v962_v61 = vmax.f32 %v914_v46, %v930_v47  ;;  %v766_v20 = vmax.f32 %v576_v13, 0.0  ;;  %v6379_v47 = vld [vmem:[%s12046_s28 + $0x208] sm:$0xff]  ;;  %v992_v13 = vld [vmem:[%s12046_s28 + $0x20] sm:$0xff]  ;;  %v1002_v63 = vld [vmem:[%s12046_s28 + $0x70] sm:$0xff] }
 0x169   :  { %v9492_v34 = vmax.f32 %v12061_v12, %v965_v39  ;;  %7606 = vmatpush3.msra.mxu1 %v9474_v41  ;;  %7830 = vmatpush3.msra.mxu0 %v9474_v41  ;;  %v9503_v30 = vmax.f32 %v948_v5, %v964_v21  ;;  %v823_v51 = vmul.f32 %v9063_v22, %v752_v53  ;;  %v990_v21 = vld [vmem:[%s12046_s28 + $0x10] sm:$0xff]  ;;  %v991_v53 = vld [vmem:[%s12046_s28 + $0x18] sm:$0xff]  ;;  %v6383_v46 = vld [vmem:[%s12046_s28 + $0x228] sm:$0xff] }
 0x16a   :  { %v896_v24 = vadd.f32 %v9072_v29, %v825_v27  ;;  %v946_v17 = vmax.f32 %v882_v8, %v898_v2  ;;  %v839_v54 = vmul.f32 %v9063_v22, %v768_v43  ;;  %v912_v33 = vadd.f32 %v9072_v29, %v841_v3  ;;  %v6380_v2 = vld [vmem:[%s12046_s28 + $0x210] sm:$0xff]  ;;  %v6381_v5 = vld [vmem:[%s12046_s28 + $0x218] sm:$0xff]  ;;  %v993_v43 = vld [vmem:[%s12046_s28 + $0x28] sm:$0xff] }
 0x16b   :  { %7607 = vmatprep.subr.mxu1 %v9492_v34  ;;  %7831 = vmatprep.subr.mxu0 %v9492_v34  ;;  %v807_v62 = vmul.f32 %v9063_v22, %v736_v45  ;;  %v880_v31 = vadd.f32 %v9072_v29, %v809_v14  ;;  %v853_v44 = vmul.f32 %v9063_v22, %v782_v28  ;;  %v989_v45 = vld [vmem:[%s12046_s28 + $0x8] sm:$0xff]  ;;  %v6382_v3 = vld [vmem:[%s12046_s28 + $0x220] sm:$0xff]  ;;  %v6384_v12 = vld [vmem:[%s12046_s28 + $0x230] sm:$0xff] }
 0x16c   :  { %7608 = vmatpush3.msra.mxu1 %v9492_v34  ;;  %7832 = vmatpush3.msra.mxu0 %v9492_v34  ;;  %v926_v32 = vadd.f32 %v9072_v29, %v855_v57  ;;  %v960_v7 = vmax.f32 %v912_v33, %v928_v49  ;;  %v9523_v4 = vmax.f32 %v946_v17, %v962_v61  ;;  %v6385_v14 = vld [vmem:[%s12046_s28 + $0x238] sm:$0xff]  ;;  %v996_v8 = vld [vmem:[%s12046_s28 + $0x40] sm:$0xff]  ;;  %v997_v28 = vld [vmem:[%s12046_s28 + $0x48] sm:$0xff] }
 0x16d   :  { %7609 = vmatprep.subr.mxu1 %v9503_v30  ;;  %7833 = vmatprep.subr.mxu0 %v9503_v30  ;;  %v821_v25 = vmul.f32 %v9063_v22, %v750_v52  ;;  %v894_v58 = vadd.f32 %v9072_v29, %v823_v51  ;;  %v944_v59 = vmax.f32 %v880_v31, %v896_v24  ;;  %v6386_v57 = vld [vmem:[%s12046_s28 + $0x240] sm:$0xff]  ;;  %v6387_v49 = vld [vmem:[%s12046_s28 + $0x248] sm:$0xff]  ;;  %v998_v61 = vld [vmem:[%s12046_s28 + $0x50] sm:$0xff] }
 0x16e   :  { %7610 = vmatpush3.msra.mxu1 %v9503_v30  ;;  %7834 = vmatpush3.msra.mxu0 %v9503_v30  ;;  %v837_v9 = vmul.f32 %v9063_v22, %v766_v20  ;;  %v910_v11 = vadd.f32 %v9072_v29, %v839_v54  ;;  %v805_v18 = vmul.f32 %v9063_v22, %v734_v38  ;;  %v999_v52 = vld [vmem:[%s12046_s28 + $0x58] sm:$0xff]  ;;  %v6388_v51 = vld [vmem:[%s12046_s28 + $0x250] sm:$0xff]  ;;  %v1000_v17 = vld [vmem:[%s12046_s28 + $0x60] sm:$0xff] }
 0x16f   :  { %7611 = vmatprep.subr.mxu1 %v9336_v26  ;;  %7835 = vmatprep.subr.mxu0 %v9336_v26  ;;  %v878_v60 = vadd.f32 %v9072_v29, %v807_v62  ;;  %v924_v36 = vadd.f32 %v9072_v29, %v853_v44  ;;  %v9540_v16 = vmax.f32 %v944_v59, %v960_v7  ;;  %v6389_v24 = vld [vmem:[%s12046_s28 + $0x258] sm:$0xff]  ;;  %v1001_v20 = vld [vmem:[%s12046_s28 + $0x68] sm:$0xff]  ;;  %v6390_v54 = vld [vmem:[%s12046_s28 + $0x260] sm:$0xff] }
 0x170   :  { %7612 = vmatpush3.msra.mxu1 %v9336_v26  ;;  %7836 = vmatpush3.msra.mxu0 %v9336_v26  ;;  %v958_v40 = vmax.f32 %v910_v11, %v926_v32  ;;  %v892_v22 = vadd.f32 %v9072_v29, %v821_v25  ;;  %v908_v50 = vadd.f32 %v9072_v29, %v837_v9  ;;  %v6391_v33 = vld [vmem:[%s12046_s28 + $0x268] sm:$0xff]  ;;  %v1003_v38 = vld [vmem:[%s12046_s28 + $0x78] sm:$0xff]  ;;  %v6392_v62 = vld [vmem:[%s12046_s28 + $0x270] sm:$0xff] }
 0x171   :  { %7613 = vmatprep.subr.mxu1 %v9523_v4  ;;  %7837 = vmatprep.subr.mxu0 %v9523_v4  ;;  %v942_v39 = vmax.f32 %v878_v60, %v894_v58  ;;  %v876_v27 = vadd.f32 %v9072_v29, %v805_v18  ;;  %v6393_v31 = vld [vmem:[%s12046_s28 + $0x278] sm:$0xff]  ;;  %v6330_v44 = vld [vmem:[%s12046_s28 + $0x80] sm:$0xff]  ;;  %v6331_v32 = vld [vmem:[%s12046_s28 + $0x88] sm:$0xff] }
 0x172   :  { %7614 = vmatpush3.msra.mxu1 %v9523_v4  ;;  %7838 = vmatpush3.msra.mxu0 %v9523_v4  ;;  %v956_v55 = vmax.f32 %v908_v50, %v924_v36  ;;  %v6410_v7 = vld [vmem:[%s12046_s28 + $0x300] sm:$0xff]  ;;  %v6411_v25 = vld [vmem:[%s12046_s28 + $0x308] sm:$0xff]  ;;  %v6332_v58 = vld [vmem:[%s12046_s28 + $0x90] sm:$0xff] }
 0x173   :  { %7615 = vmatprep.subr.mxu1 %v9304_v10  ;;  %7839 = vmatprep.subr.mxu0 %v9304_v10  ;;  %v9553_v6 = vmax.f32 %v942_v39, %v958_v40  ;;  %v940_v35 = vmax.f32 %v876_v27, %v892_v22  ;;  %v6333_v59 = vld [vmem:[%s12046_s28 + $0x98] sm:$0xff]  ;;  %v6334_v9 = vld [vmem:[%s12046_s28 + $0xa0] sm:$0xff]  ;;  %v6335_v11 = vld [vmem:[%s12046_s28 + $0xa8] sm:$0xff] }
 0x174   :  { %7616 = vmatpush3.msra.mxu1 %v9304_v10  ;;  %7840 = vmatpush3.msra.mxu0 %v9304_v10  ;;  %v6336_v18 = vld [vmem:[%s12046_s28 + $0xb0] sm:$0xff]  ;;  %v6337_v60 = vld [vmem:[%s12046_s28 + $0xb8] sm:$0xff]  ;;  %v6338_v36 = vld [vmem:[%s12046_s28 + $0xc0] sm:$0xff] }
 0x175   :  { %7617 = vmatprep.subr.mxu1 %v9540_v16  ;;  %7841 = vmatprep.subr.mxu0 %v9540_v16  ;;  %v9563_v29 = vmax.f32 %v940_v35, %v956_v55  ;;  %v6339_v40 = vld [vmem:[%s12046_s28 + $0xc8] sm:$0xff]  ;;  %v6340_v22 = vld [vmem:[%s12046_s28 + $0xd0] sm:$0xff]  ;;  %v6341_v39 = vld [vmem:[%s12046_s28 + $0xd8] sm:$0xff] }
 0x176   :  { %7618 = vmatpush3.msra.mxu1 %v9540_v16  ;;  %7842 = vmatpush3.msra.mxu0 %v9540_v16  ;;  %v6342_v50 = vld [vmem:[%s12046_s28 + $0xe0] sm:$0xff]  ;;  %v6343_v27 = vld [vmem:[%s12046_s28 + $0xe8] sm:$0xff]  ;;  %v6344_v55 = vld [vmem:[%s12046_s28 + $0xf0] sm:$0xff] }
 0x177   :  { %7619 = vmatprep.subr.mxu1 %v9272_v48  ;;  %7843 = vmatprep.subr.mxu0 %v9272_v48  ;;  %v6345_v35 = vld [vmem:[%s12046_s28 + $0xf8] sm:$0xff] }
 0x178   :  { %7620 = vmatpush3.msra.mxu1 %v9272_v48  ;;  %7844 = vmatpush3.msra.mxu0 %v9272_v48 }
 0x179   :  { %7621 = vmatprep.subr.mxu1 %v9553_v6  ;;  %7845 = vmatprep.subr.mxu0 %v9553_v6 }
 0x17a   :  { %7622 = vmatpush3.msra.mxu1 %v9553_v6  ;;  %7846 = vmatpush3.msra.mxu0 %v9553_v6 }
 0x17b   :  { %7623 = vmatprep.subr.mxu1 %v9254_v23  ;;  %7847 = vmatprep.subr.mxu0 %v9254_v23 }
 0x17c   :  { %7624 = vmatpush3.msra.mxu1 %v9254_v23  ;;  %7848 = vmatpush3.msra.mxu0 %v9254_v23 }
 0x17d   :  { %7625 = vmatprep.subr.mxu1 %v9563_v29  ;;  %7849 = vmatprep.subr.mxu0 %v9563_v29 }
 0x17e   :  { %7626 = vmatpush3.msra.mxu1 %v9563_v29  ;;  %7850 = vmatpush3.msra.mxu0 %v9563_v29 }
 0x17f   :  { %7628 = vmatmul.mubr.f32.vlgmr.msra.gmra.mxu1 %v989_v45  ;;  %7651 = vmatprep.subr.mxu1 %v9405_v42  ;;  %v6346_v45 = vld [vmem:[%s12046_s28 + $0x100] sm:$0xff] }
 0x180   :  { %7931 = vmatprep.subr.mxu0 %v9405_v42  ;;  %7652 = vmatpush3.msra.mxu1 %v9405_v42 }
 0x181   :  { %7852 = vmatmul.mubr.f32.vlgmr.msra.gmra.mxu0 %v6379_v47  ;;  %7653 = vmatprep.subr.mxu1 %v9415_v1  ;;  %v6347_v47 = vld [vmem:[%s12046_s28 + $0x108] sm:$0xff] }
 0x182   :  { %7932 = vmatpush3.msra.mxu0 %v9405_v42  ;;  %7630 = vmatprep.mubr.f32.mxu1 %v990_v21  ;;  %v6348_v21 = vld [vmem:[%s12046_s28 + $0x110] sm:$0xff] }
 0x183   :  { %7933 = vmatprep.subr.mxu0 %v9415_v1  ;;  %7654 = vmatpush3.msra.mxu1 %v9415_v1 }
 0x184   :  { %7934 = vmatpush3.msra.mxu0 %v9415_v1  ;;  %7631 = vmatmul.mubr.f32.gmra.mxu1 %v991_v53  ;;  %v6349_v53 = vld [vmem:[%s12046_s28 + $0x118] sm:$0xff] }
 0x185   :  { %7655 = vmatprep.subr.mxu1 %v9431_v0  ;;  %7854 = vmatprep.mubr.f32.mxu0 %v6380_v2  ;;  %v6350_v2 = vld [vmem:[%s12046_s28 + $0x120] sm:$0xff] }
 0x186   :  { %7935 = vmatprep.subr.mxu0 %v9431_v0  ;;  %7656 = vmatpush3.msra.mxu1 %v9431_v0 }
 0x187   :  { %7855 = vmatmul.mubr.f32.gmra.mxu0 %v6381_v5  ;;  %7657 = vmatprep.subr.mxu1 %v9446_v19  ;;  %v6351_v5 = vld [vmem:[%s12046_s28 + $0x128] sm:$0xff] }
 0x188   :  { %7936 = vmatpush3.msra.mxu0 %v9431_v0  ;;  %7633 = vmatprep.mubr.f32.mxu1 %v992_v13  ;;  %v6352_v13 = vld [vmem:[%s12046_s28 + $0x130] sm:$0xff] }
 0x189   :  { %7937 = vmatprep.subr.mxu0 %v9446_v19  ;;  %7658 = vmatpush3.msra.mxu1 %v9446_v19 }
 0x18a   :  { %7938 = vmatpush3.msra.mxu0 %v9446_v19  ;;  %7634 = vmatmul.mubr.f32.gmra.mxu1 %v993_v43  ;;  %v6353_v43 = vld [vmem:[%s12046_s28 + $0x138] sm:$0xff] }
 0x18b   :  { %7659 = vmatprep.subr.mxu1 %v9462_v15  ;;  %7857 = vmatprep.mubr.f32.mxu0 %v6382_v3  ;;  %v6354_v3 = vld [vmem:[%s12046_s28 + $0x140] sm:$0xff] }
 0x18c   :  { %7939 = vmatprep.subr.mxu0 %v9462_v15  ;;  %7660 = vmatpush3.msra.mxu1 %v9462_v15 }
 0x18d   :  { %7858 = vmatmul.mubr.f32.gmra.mxu0 %v6383_v46  ;;  %7661 = vmatprep.subr.mxu1 %v9474_v41  ;;  %v6355_v46 = vld [vmem:[%s12046_s28 + $0x148] sm:$0xff] }
 0x18e   :  { %7940 = vmatpush3.msra.mxu0 %v9462_v15  ;;  %7636 = vmatprep.mubr.f32.mxu1 %v994_v56  ;;  %v6356_v56 = vld [vmem:[%s12046_s28 + $0x150] sm:$0xff] }
 0x18f   :  { %7941 = vmatprep.subr.mxu0 %v9474_v41  ;;  %7662 = vmatpush3.msra.mxu1 %v9474_v41 }
 0x190   :  { %7942 = vmatpush3.msra.mxu0 %v9474_v41  ;;  %7637 = vmatmul.mubr.f32.gmra.mxu1 %v995_v37  ;;  %v6357_v37 = vld [vmem:[%s12046_s28 + $0x158] sm:$0xff] }
 0x191   :  { %7663 = vmatprep.subr.mxu1 %v9492_v34  ;;  %7860 = vmatprep.mubr.f32.mxu0 %v6384_v12  ;;  %v6358_v12 = vld [vmem:[%s12046_s28 + $0x160] sm:$0xff] }
 0x192   :  { %7943 = vmatprep.subr.mxu0 %v9492_v34  ;;  %7664 = vmatpush3.msra.mxu1 %v9492_v34 }
 0x193   :  { %7861 = vmatmul.mubr.f32.gmra.mxu0 %v6385_v14  ;;  %7665 = vmatprep.subr.mxu1 %v9503_v30  ;;  %v6359_v14 = vld [vmem:[%s12046_s28 + $0x168] sm:$0xff] }
 0x194   :  { %7944 = vmatpush3.msra.mxu0 %v9492_v34  ;;  %7639 = vmatprep.mubr.f32.mxu1 %v996_v8  ;;  %v6360_v8 = vld [vmem:[%s12046_s28 + $0x170] sm:$0xff] }
 0x195   :  { %7945 = vmatprep.subr.mxu0 %v9503_v30  ;;  %7666 = vmatpush3.msra.mxu1 %v9503_v30 }
 0x196   :  { %7946 = vmatpush3.msra.mxu0 %v9503_v30  ;;  %7640 = vmatmul.mubr.f32.gmra.mxu1 %v997_v28  ;;  %v6361_v28 = vld [vmem:[%s12046_s28 + $0x178] sm:$0xff] }
 0x197   :  { %7667 = vmatprep.subr.mxu1 %v9336_v26  ;;  %7863 = vmatprep.mubr.f32.mxu0 %v6386_v57  ;;  %v6362_v57 = vld [vmem:[%s12046_s28 + $0x180] sm:$0xff] }
 0x198   :  { %7947 = vmatprep.subr.mxu0 %v9336_v26  ;;  %7668 = vmatpush3.msra.mxu1 %v9336_v26 }
 0x199   :  { %7864 = vmatmul.mubr.f32.gmra.mxu0 %v6387_v49  ;;  %7669 = vmatprep.subr.mxu1 %v9523_v4  ;;  %v6363_v49 = vld [vmem:[%s12046_s28 + $0x188] sm:$0xff] }
 0x19a   :  { %7948 = vmatpush3.msra.mxu0 %v9336_v26  ;;  %7642 = vmatprep.mubr.f32.mxu1 %v998_v61  ;;  %v6364_v61 = vld [vmem:[%s12046_s28 + $0x190] sm:$0xff] }
 0x19b   :  { %7949 = vmatprep.subr.mxu0 %v9523_v4  ;;  %7670 = vmatpush3.msra.mxu1 %v9523_v4 }
 0x19c   :  { %7950 = vmatpush3.msra.mxu0 %v9523_v4  ;;  %7643 = vmatmul.mubr.f32.gmra.mxu1 %v999_v52  ;;  %v6365_v52 = vld [vmem:[%s12046_s28 + $0x198] sm:$0xff] }
 0x19d   :  { %7671 = vmatprep.subr.mxu1 %v9304_v10  ;;  %7866 = vmatprep.mubr.f32.mxu0 %v6388_v51  ;;  %v6366_v51 = vld [vmem:[%s12046_s28 + $0x1a0] sm:$0xff] }
 0x19e   :  { %7951 = vmatprep.subr.mxu0 %v9304_v10  ;;  %7672 = vmatpush3.msra.mxu1 %v9304_v10 }
 0x19f   :  { %7867 = vmatmul.mubr.f32.gmra.mxu0 %v6389_v24  ;;  %7673 = vmatprep.subr.mxu1 %v9540_v16  ;;  %v6367_v24 = vld [vmem:[%s12046_s28 + $0x1a8] sm:$0xff] }
 0x1a0   :  { %7952 = vmatpush3.msra.mxu0 %v9304_v10  ;;  %7645 = vmatprep.mubr.f32.mxu1 %v1000_v17  ;;  %v6368_v17 = vld [vmem:[%s12046_s28 + $0x1b0] sm:$0xff] }
 0x1a1   :  { %7953 = vmatprep.subr.mxu0 %v9540_v16  ;;  %7674 = vmatpush3.msra.mxu1 %v9540_v16 }
 0x1a2   :  { %7954 = vmatpush3.msra.mxu0 %v9540_v16  ;;  %7646 = vmatmul.mubr.f32.gmra.mxu1 %v1001_v20  ;;  %v6369_v20 = vld [vmem:[%s12046_s28 + $0x1b8] sm:$0xff] }
 0x1a3   :  { %7675 = vmatprep.subr.mxu1 %v9272_v48  ;;  %7869 = vmatprep.mubr.f32.mxu0 %v6390_v54  ;;  %v6370_v54 = vld [vmem:[%s12046_s28 + $0x1c0] sm:$0xff] }
 0x1a4   :  { %7955 = vmatprep.subr.mxu0 %v9272_v48  ;;  %7676 = vmatpush3.msra.mxu1 %v9272_v48 }
 0x1a5   :  { %7870 = vmatmul.mubr.f32.gmra.mxu0 %v6391_v33  ;;  %7677 = vmatprep.subr.mxu1 %v9553_v6  ;;  %v6371_v33 = vld [vmem:[%s12046_s28 + $0x1c8] sm:$0xff] }
 0x1a6   :  { %7956 = vmatpush3.msra.mxu0 %v9272_v48  ;;  %7648 = vmatprep.mubr.f32.mxu1 %v1002_v63  ;;  %v6372_v63 = vld [vmem:[%s12046_s28 + $0x1d0] sm:$0xff] }
 0x1a7   :  { %7957 = vmatprep.subr.mxu0 %v9553_v6  ;;  %7678 = vmatpush3.msra.mxu1 %v9553_v6 }
 0x1a8   :  { %7958 = vmatpush3.msra.mxu0 %v9553_v6  ;;  %7649 = vmatmul.mubr.f32.gmra.mxu1 %v1003_v38  ;;  %v6373_v38 = vld [vmem:[%s12046_s28 + $0x1d8] sm:$0xff] }
 0x1a9   :  { %7679 = vmatprep.subr.mxu1 %v9254_v23  ;;  %7872 = vmatprep.mubr.f32.mxu0 %v6392_v62  ;;  %v6374_v62 = vld [vmem:[%s12046_s28 + $0x1e0] sm:$0xff] }
 0x1aa   :  { %7959 = vmatprep.subr.mxu0 %v9254_v23  ;;  %7680 = vmatpush3.msra.mxu1 %v9254_v23 }
 0x1ab   :  { %7873 = vmatmul.mubr.f32.gmra.mxu0 %v6393_v31  ;;  %7681 = vmatprep.subr.mxu1 %v9563_v29  ;;  %v6375_v31 = vld [vmem:[%s12046_s28 + $0x1e8] sm:$0xff] }
 0x1ac   :  { %7960 = vmatpush3.msra.mxu0 %v9254_v23  ;;  %7682 = vmatpush3.msra.mxu1 %v9563_v29 }
 0x1ad   :  { %7961 = vmatprep.subr.mxu0 %v9563_v29  ;;  %7683 = vmatprep.mubr.f32.mxu1 %v6330_v44  ;;  %v6376_v44 = vld [vmem:[%s12046_s28 + $0x1f0] sm:$0xff] }
 0x1ae   :  { %7962 = vmatpush3.msra.mxu0 %v9563_v29  ;;  %7684 = vmatmul.mubr.f32.vlgmr.msra.gmra.mxu1 %v6331_v32  ;;  %v6377_v32 = vld [vmem:[%s12046_s28 + $0x1f8] sm:$0xff] }
 0x1af   :  { %7707 = vmatprep.subr.mxu1 %v9405_v42  ;;  %7963 = vmatprep.mubr.f32.mxu0 %v6410_v7  ;;  %v6394_v7 = vld [vmem:[%s12046_s28 + $0x280] sm:$0xff] }
 0x1b0   :  { %8043 = vmatprep.subr.mxu0 %v9405_v42  ;;  %7708 = vmatpush3.msra.mxu1 %v9405_v42 }
 0x1b1   :  { %7964 = vmatmul.mubr.f32.vlgmr.msra.gmra.mxu0 %v6411_v25  ;;  %7709 = vmatprep.subr.mxu1 %v9415_v1  ;;  %v6412_v25 = vld [vmem:[%s12046_s28 + $0x310] sm:$0xff] }
 0x1b2   :  { %8044 = vmatpush3.msra.mxu0 %v9405_v42  ;;  %7686 = vmatprep.mubr.f32.mxu1 %v6332_v58  ;;  %v6395_v58 = vld [vmem:[%s12046_s28 + $0x288] sm:$0xff] }
 0x1b3   :  { %8045 = vmatprep.subr.mxu0 %v9415_v1  ;;  %7710 = vmatpush3.msra.mxu1 %v9415_v1 }
 0x1b4   :  { %8046 = vmatpush3.msra.mxu0 %v9415_v1  ;;  %7687 = vmatmul.mubr.f32.gmra.mxu1 %v6333_v59  ;;  %v6396_v59 = vld [vmem:[%s12046_s28 + $0x290] sm:$0xff] }
 0x1b5   :  { %7711 = vmatprep.subr.mxu1 %v9431_v0  ;;  %8047 = vmatprep.subr.mxu0 %v9431_v0 }
 0x1b6   :  { %7712 = vmatpush3.msra.mxu1 %v9431_v0  ;;  %8048 = vmatpush3.msra.mxu0 %v9431_v0 }
 0x1b7   :  { %7713 = vmatprep.subr.mxu1 %v9446_v19  ;;  %8049 = vmatprep.subr.mxu0 %v9446_v19 }
 0x1b8   :  { %7689 = vmatprep.mubr.f32.mxu1 %v6334_v9  ;;  %7714 = vmatpush3.msra.mxu1 %v9446_v19  ;;  %v6413_v9 = vld [vmem:[%s12046_s28 + $0x318] sm:$0xff] }
 0x1b9   :  { %8050 = vmatpush3.msra.mxu0 %v9446_v19  ;;  %7690 = vmatmul.mubr.f32.gmra.mxu1 %v6335_v11  ;;  %v6397_v11 = vld [vmem:[%s12046_s28 + $0x298] sm:$0xff] }
 0x1ba   :  { %7715 = vmatprep.subr.mxu1 %v9462_v15  ;;  %8051 = vmatprep.subr.mxu0 %v9462_v15 }
 0x1bb   :  { %7716 = vmatpush3.msra.mxu1 %v9462_v15  ;;  %8052 = vmatpush3.msra.mxu0 %v9462_v15 }
 0x1bc   :  { %7717 = vmatprep.subr.mxu1 %v9474_v41  ;;  %8053 = vmatprep.subr.mxu0 %v9474_v41 }
 0x1bd   :  { %7692 = vmatprep.mubr.f32.mxu1 %v6336_v18  ;;  %7718 = vmatpush3.msra.mxu1 %v9474_v41  ;;  %v6414_v18 = vld [vmem:[%s12046_s28 + $0x320] sm:$0xff] }
 0x1be   :  { %8054 = vmatpush3.msra.mxu0 %v9474_v41  ;;  %7693 = vmatmul.mubr.f32.gmra.mxu1 %v6337_v60  ;;  %v6398_v60 = vld [vmem:[%s12046_s28 + $0x2a0] sm:$0xff] }
 0x1bf   :  { %7719 = vmatprep.subr.mxu1 %v9492_v34  ;;  %8055 = vmatprep.subr.mxu0 %v9492_v34 }
 0x1c0   :  { %7720 = vmatpush3.msra.mxu1 %v9492_v34  ;;  %8056 = vmatpush3.msra.mxu0 %v9492_v34 }
 0x1c1   :  { %7721 = vmatprep.subr.mxu1 %v9503_v30  ;;  %8057 = vmatprep.subr.mxu0 %v9503_v30 }
 0x1c2   :  { %7695 = vmatprep.mubr.f32.mxu1 %v6338_v36  ;;  %7722 = vmatpush3.msra.mxu1 %v9503_v30  ;;  %v6399_v36 = vld [vmem:[%s12046_s28 + $0x2a8] sm:$0xff] }
 0x1c3   :  { %8058 = vmatpush3.msra.mxu0 %v9503_v30  ;;  %7696 = vmatmul.mubr.f32.gmra.mxu1 %v6339_v40  ;;  %v6416_v40 = vld [vmem:[%s12046_s28 + $0x330] sm:$0xff] }
 0x1c4   :  { %7723 = vmatprep.subr.mxu1 %v9336_v26  ;;  %8059 = vmatprep.subr.mxu0 %v9336_v26 }
 0x1c5   :  { %7724 = vmatpush3.msra.mxu1 %v9336_v26  ;;  %8060 = vmatpush3.msra.mxu0 %v9336_v26 }
 0x1c6   :  { %7725 = vmatprep.subr.mxu1 %v9523_v4  ;;  %8061 = vmatprep.subr.mxu0 %v9523_v4 }
 0x1c7   :  { %7698 = vmatprep.mubr.f32.mxu1 %v6340_v22  ;;  %7726 = vmatpush3.msra.mxu1 %v9523_v4  ;;  %v6401_v22 = vld [vmem:[%s12046_s28 + $0x2b8] sm:$0xff] }
 0x1c8   :  { %8062 = vmatpush3.msra.mxu0 %v9523_v4  ;;  %7699 = vmatmul.mubr.f32.gmra.mxu1 %v6341_v39  ;;  %v6418_v39 = vld [vmem:[%s12046_s28 + $0x340] sm:$0xff] }
 0x1c9   :  { %7727 = vmatprep.subr.mxu1 %v9304_v10  ;;  %8063 = vmatprep.subr.mxu0 %v9304_v10 }
 0x1ca   :  { %7728 = vmatpush3.msra.mxu1 %v9304_v10  ;;  %8064 = vmatpush3.msra.mxu0 %v9304_v10 }
 0x1cb   :  { %7729 = vmatprep.subr.mxu1 %v9540_v16  ;;  %8065 = vmatprep.subr.mxu0 %v9540_v16 }
 0x1cc   :  { %7701 = vmatprep.mubr.f32.mxu1 %v6342_v50  ;;  %7730 = vmatpush3.msra.mxu1 %v9540_v16  ;;  %v6403_v50 = vld [vmem:[%s12046_s28 + $0x2c8] sm:$0xff] }
 0x1cd   :  { %8066 = vmatpush3.msra.mxu0 %v9540_v16  ;;  %7702 = vmatmul.mubr.f32.gmra.mxu1 %v6343_v27  ;;  %v6420_v27 = vld [vmem:[%s12046_s28 + $0x350] sm:$0xff] }
 0x1ce   :  { %7731 = vmatprep.subr.mxu1 %v9272_v48  ;;  %8067 = vmatprep.subr.mxu0 %v9272_v48 }
 0x1cf   :  { %7732 = vmatpush3.msra.mxu1 %v9272_v48  ;;  %8068 = vmatpush3.msra.mxu0 %v9272_v48 }
 0x1d0   :  { %7733 = vmatprep.subr.mxu1 %v9553_v6  ;;  %8069 = vmatprep.subr.mxu0 %v9553_v6 }
 0x1d1   :  { %7704 = vmatprep.mubr.f32.mxu1 %v6344_v55  ;;  %7734 = vmatpush3.msra.mxu1 %v9553_v6  ;;  %v6405_v55 = vld [vmem:[%s12046_s28 + $0x2d8] sm:$0xff] }
 0x1d2   :  { %8070 = vmatpush3.msra.mxu0 %v9553_v6  ;;  %7705 = vmatmul.mubr.f32.gmra.mxu1 %v6345_v35  ;;  %v6422_v35 = vld [vmem:[%s12046_s28 + $0x360] sm:$0xff] }
 0x1d3   :  { %7735 = vmatprep.subr.mxu1 %v9254_v23  ;;  %8071 = vmatprep.subr.mxu0 %v9254_v23 }
 0x1d4   :  { %7736 = vmatpush3.msra.mxu1 %v9254_v23  ;;  %8072 = vmatpush3.msra.mxu0 %v9254_v23 }
 0x1d5   :  { %7737 = vmatprep.subr.mxu1 %v9563_v29  ;;  %8073 = vmatprep.subr.mxu0 %v9563_v29 }
 0x1d6   :  { %7738 = vmatpush3.msra.mxu1 %v9563_v29  ;;  %7739 = vmatprep.mubr.f32.mxu1 %v6346_v45  ;;  %v6407_v45 = vld [vmem:[%s12046_s28 + $0x2e8] sm:$0xff] }
 0x1d7   :  { %8074 = vmatpush3.msra.mxu0 %v9563_v29  ;;  %7740 = vmatmul.mubr.f32.vlgmr.msra.gmra.mxu1 %v6347_v47  ;;  %v6424_v47 = vld [vmem:[%s12046_s28 + $0x370] sm:$0xff] }
 0x1d8   :  { %7763 = vmatprep.subr.mxu1 %v9405_v42  ;;  %7742 = vmatprep.mubr.f32.mxu1 %v6348_v21  ;;  %v6409_v21 = vld [vmem:[%s12046_s28 + $0x2f8] sm:$0xff] }
 0x1d9   :  { %7764 = vmatpush3.msra.mxu1 %v9405_v42  ;;  %7966 = vmatprep.mubr.f32.mxu0 %v6412_v25 }
 0x1da   :  { %7765 = vmatprep.subr.mxu1 %v9415_v1  ;;  %7967 = vmatmul.mubr.f32.gmra.mxu0 %v6413_v9 }
 0x1db   :  { %7766 = vmatpush3.msra.mxu1 %v9415_v1  ;;  %7969 = vmatprep.mubr.f32.mxu0 %v6414_v18 }
 0x1dc   :  { %7743 = vmatmul.mubr.f32.gmra.mxu1 %v6349_v53  ;;  %7767 = vmatprep.subr.mxu1 %v9431_v0  ;;  %v6442_v53 = vld [vmem:[%s12046_s28 + $0x400] sm:$0xff] }
 0x1dd   :  { %7768 = vmatpush3.msra.mxu1 %v9431_v0  ;;  %7745 = vmatprep.mubr.f32.mxu1 %v6350_v2  ;;  %v6427_v2 = vld [vmem:[%s12046_s28 + $0x388] sm:$0xff] }
 0x1de   :  { %7769 = vmatprep.subr.mxu1 %v9446_v19 }
 0x1df   :  { %7770 = vmatpush3.msra.mxu1 %v9446_v19 }
 0x1e0   :  { %7746 = vmatmul.mubr.f32.gmra.mxu1 %v6351_v5  ;;  %7771 = vmatprep.subr.mxu1 %v9462_v15  ;;  %v6430_v5 = vld [vmem:[%s12046_s28 + $0x3a0] sm:$0xff] }
 0x1e1   :  { %7772 = vmatpush3.msra.mxu1 %v9462_v15  ;;  %7748 = vmatprep.mubr.f32.mxu1 %v6352_v13  ;;  %v6444_v13 = vld [vmem:[%s12046_s28 + $0x410] sm:$0xff] }
 0x1e2   :  { %7773 = vmatprep.subr.mxu1 %v9474_v41 }
 0x1e3   :  { %7774 = vmatpush3.msra.mxu1 %v9474_v41 }
 0x1e4   :  { %7749 = vmatmul.mubr.f32.gmra.mxu1 %v6353_v43  ;;  %7775 = vmatprep.subr.mxu1 %v9492_v34  ;;  %v6445_v43 = vld [vmem:[%s12046_s28 + $0x418] sm:$0xff] }
 0x1e5   :  { %7776 = vmatpush3.msra.mxu1 %v9492_v34  ;;  %7751 = vmatprep.mubr.f32.mxu1 %v6354_v3  ;;  %v6432_v3 = vld [vmem:[%s12046_s28 + $0x3b0] sm:$0xff] }
 0x1e6   :  { %7777 = vmatprep.subr.mxu1 %v9503_v30 }
 0x1e7   :  { %7778 = vmatpush3.msra.mxu1 %v9503_v30 }
 0x1e8   :  { %7752 = vmatmul.mubr.f32.gmra.mxu1 %v6355_v46  ;;  %7779 = vmatprep.subr.mxu1 %v9336_v26 }
 0x1e9   :  { %7780 = vmatpush3.msra.mxu1 %v9336_v26  ;;  %7754 = vmatprep.mubr.f32.mxu1 %v6356_v56  ;;  %v6433_v56 = vld [vmem:[%s12046_s28 + $0x3b8] sm:$0xff] }
 0x1ea   :  { %7781 = vmatprep.subr.mxu1 %v9523_v4 }
 0x1eb   :  { %7782 = vmatpush3.msra.mxu1 %v9523_v4 }
 0x1ec   :  { %7755 = vmatmul.mubr.f32.gmra.mxu1 %v6357_v37  ;;  %7783 = vmatprep.subr.mxu1 %v9304_v10 }
 0x1ed   :  { %7784 = vmatpush3.msra.mxu1 %v9304_v10  ;;  %7757 = vmatprep.mubr.f32.mxu1 %v6358_v12  ;;  %v6434_v12 = vld [vmem:[%s12046_s28 + $0x3c0] sm:$0xff] }
 0x1ee   :  { %7785 = vmatprep.subr.mxu1 %v9540_v16 }
 0x1ef   :  { %7786 = vmatpush3.msra.mxu1 %v9540_v16 }
 0x1f0   :  { %7758 = vmatmul.mubr.f32.gmra.mxu1 %v6359_v14  ;;  %7787 = vmatprep.subr.mxu1 %v9272_v48  ;;  %v6446_v14 = vld [vmem:[%s12046_s28 + $0x420] sm:$0xff] }
 0x1f1   :  { %7788 = vmatpush3.msra.mxu1 %v9272_v48  ;;  %7760 = vmatprep.mubr.f32.mxu1 %v6360_v8  ;;  %v6447_v8 = vld [vmem:[%s12046_s28 + $0x428] sm:$0xff] }
 0x1f2   :  { %7789 = vmatprep.subr.mxu1 %v9553_v6 }
 0x1f3   :  { %7790 = vmatpush3.msra.mxu1 %v9553_v6 }
 0x1f4   :  { %7761 = vmatmul.mubr.f32.gmra.mxu1 %v6361_v28  ;;  %7791 = vmatprep.subr.mxu1 %v9254_v23 }
 0x1f5   :  { %7792 = vmatpush3.msra.mxu1 %v9254_v23  ;;  %7795 = vmatprep.mubr.f32.mxu1 %v6362_v57  ;;  %v6435_v57 = vld [vmem:[%s12046_s28 + $0x3c8] sm:$0xff] }
 0x1f6   :  { %7793 = vmatprep.subr.mxu1 %v9563_v29 }
 0x1f7   :  { %7794 = vmatpush3.msra.mxu1 %v9563_v29 }
 0x1f8   :  { %7796 = vmatmul.mubr.f32.vlgmr.msra.gmra.mxu1 %v6363_v49  ;;  %7875 = vmatprep.subr.mxu1 %v9405_v42  ;;  %v6436_v49 = vld [vmem:[%s12046_s28 + $0x3d0] sm:$0xff] }
 0x1f9   :  { %7876 = vmatpush3.msra.mxu1 %v9405_v42  ;;  %7798 = vmatprep.mubr.f32.mxu1 %v6364_v61 }
 0x1fa   :  { %7877 = vmatprep.subr.mxu1 %v9415_v1 }
 0x1fb   :  { %7878 = vmatpush3.msra.mxu1 %v9415_v1 }
 0x1fc   :  { %7799 = vmatmul.mubr.f32.gmra.mxu1 %v6365_v52  ;;  %7879 = vmatprep.subr.mxu1 %v9431_v0  ;;  %v6437_v52 = vld [vmem:[%s12046_s28 + $0x3d8] sm:$0xff] }
 0x1fd   :  { %7880 = vmatpush3.msra.mxu1 %v9431_v0  ;;  %7801 = vmatprep.mubr.f32.mxu1 %v6366_v51  ;;  %v6438_v51 = vld [vmem:[%s12046_s28 + $0x3e0] sm:$0xff] }
 0x1fe   :  { %7881 = vmatprep.subr.mxu1 %v9446_v19 }
 0x1ff   :  { %7882 = vmatpush3.msra.mxu1 %v9446_v19 }
 0x200   :  { %7802 = vmatmul.mubr.f32.gmra.mxu1 %v6367_v24  ;;  %7883 = vmatprep.subr.mxu1 %v9462_v15 }
 0x201   :  { %7884 = vmatpush3.msra.mxu1 %v9462_v15  ;;  %7804 = vmatprep.mubr.f32.mxu1 %v6368_v17  ;;  %v6448_v17 = vld [vmem:[%s12046_s28 + $0x430] sm:$0xff] }
 0x202   :  { %7885 = vmatprep.subr.mxu1 %v9474_v41 }
 0x203   :  { %7886 = vmatpush3.msra.mxu1 %v9474_v41 }
 0x204   :  { %7805 = vmatmul.mubr.f32.gmra.mxu1 %v6369_v20  ;;  %7887 = vmatprep.subr.mxu1 %v9492_v34  ;;  %v6449_v20 = vld [vmem:[%s12046_s28 + $0x438] sm:$0xff] }
 0x205   :  { %7888 = vmatpush3.msra.mxu1 %v9492_v34  ;;  %7807 = vmatprep.mubr.f32.mxu1 %v6370_v54 }
 0x206   :  { %7889 = vmatprep.subr.mxu1 %v9503_v30 }
 0x207   :  { %7890 = vmatpush3.msra.mxu1 %v9503_v30 }
 0x208   :  { %7808 = vmatmul.mubr.f32.gmra.mxu1 %v6371_v33  ;;  %7891 = vmatprep.subr.mxu1 %v9336_v26  ;;  %v6439_v33 = vld [vmem:[%s12046_s28 + $0x3e8] sm:$0xff] }
 0x209   :  { %7892 = vmatpush3.msra.mxu1 %v9336_v26  ;;  %7810 = vmatprep.mubr.f32.mxu1 %v6372_v63  ;;  %v6440_v63 = vld [vmem:[%s12046_s28 + $0x3f0] sm:$0xff] }
 0x20a   :  { %7893 = vmatprep.subr.mxu1 %v9523_v4 }
 0x20b   :  { %7894 = vmatpush3.msra.mxu1 %v9523_v4 }
 0x20c   :  { %7811 = vmatmul.mubr.f32.gmra.mxu1 %v6373_v38  ;;  %7895 = vmatprep.subr.mxu1 %v9304_v10 }
 0x20d   :  { %7896 = vmatpush3.msra.mxu1 %v9304_v10  ;;  %7813 = vmatprep.mubr.f32.mxu1 %v6374_v62  ;;  %v6441_v62 = vld [vmem:[%s12046_s28 + $0x3f8] sm:$0xff] }
 0x20e   :  { %7897 = vmatprep.subr.mxu1 %v9540_v16 }
 0x20f   :  { %7898 = vmatpush3.msra.mxu1 %v9540_v16 }
 0x210   :  { %7814 = vmatmul.mubr.f32.gmra.mxu1 %v6375_v31  ;;  %7899 = vmatprep.subr.mxu1 %v9272_v48 }
 0x211   :  { %7900 = vmatpush3.msra.mxu1 %v9272_v48  ;;  %7816 = vmatprep.mubr.f32.mxu1 %v6376_v44  ;;  %v6450_v44 = vld [vmem:[%s12046_s28 + $0x440] sm:$0xff] }
 0x212   :  { %7901 = vmatprep.subr.mxu1 %v9553_v6 }
 0x213   :  { %7902 = vmatpush3.msra.mxu1 %v9553_v6 }
 0x214   :  { %7817 = vmatmul.mubr.f32.gmra.mxu1 %v6377_v32  ;;  %7903 = vmatprep.subr.mxu1 %v9254_v23  ;;  %v6451_v32 = vld [vmem:[%s12046_s28 + $0x448] sm:$0xff] }
 0x215   :  { %7904 = vmatpush3.msra.mxu1 %v9254_v23  ;;  %7907 = vmatprep.mubr.f32.mxu1 %v6394_v7 }
 0x216   :  { %7905 = vmatprep.subr.mxu1 %v9563_v29 }
 0x217   :  { %7906 = vmatpush3.msra.mxu1 %v9563_v29 }
 0x218   :  { %7908 = vmatmul.mubr.f32.vlgmr.msra.gmra.mxu1 %v6395_v58  ;;  %7987 = vmatprep.subr.mxu1 %v9405_v42  ;;  %v6452_v58 = vld [vmem:[%s12046_s28 + $0x450] sm:$0xff] }
 0x219   :  { %7988 = vmatpush3.msra.mxu1 %v9405_v42  ;;  %7910 = vmatprep.mubr.f32.mxu1 %v6396_v59  ;;  %v6415_v42 = vld [vmem:[%s12046_s28 + $0x328] sm:$0xff]  ;;  %v6453_v59 = vld [vmem:[%s12046_s28 + $0x458] sm:$0xff] }
 0x21a   :  { %7989 = vmatprep.subr.mxu1 %v9415_v1  ;;  %7970 = vmatmul.mubr.f32.gmra.mxu0 %v6415_v42  ;;  %v6455_v42 = vld [vmem:[%s12046_s28 + $0x468] sm:$0xff] }
 0x21b   :  { %7990 = vmatpush3.msra.mxu1 %v9415_v1  ;;  %v6400_v1 = vld [vmem:[%s12046_s28 + $0x2b0] sm:$0xff]  ;;  %7972 = vmatprep.mubr.f32.mxu0 %v6416_v40 }
 0x21c   :  { %7911 = vmatmul.mubr.f32.gmra.mxu1 %v6397_v11  ;;  %7991 = vmatprep.subr.mxu1 %v9431_v0 }
 0x21d   :  { %7992 = vmatpush3.msra.mxu1 %v9431_v0  ;;  %7913 = vmatprep.mubr.f32.mxu1 %v6398_v60  ;;  %v6417_v0 = vld [vmem:[%s12046_s28 + $0x338] sm:$0xff]  ;;  %v6454_v60 = vld [vmem:[%s12046_s28 + $0x460] sm:$0xff] }
 0x21e   :  { %7993 = vmatprep.subr.mxu1 %v9446_v19  ;;  %7973 = vmatmul.mubr.f32.gmra.mxu0 %v6417_v0  ;;  %v6456_v0 = vld [vmem:[%s12046_s28 + $0x470] sm:$0xff] }
 0x21f   :  { %7994 = vmatpush3.msra.mxu1 %v9446_v19  ;;  %v6402_v19 = vld [vmem:[%s12046_s28 + $0x2c0] sm:$0xff]  ;;  %7975 = vmatprep.mubr.f32.mxu0 %v6418_v39 }
 0x220   :  { %7914 = vmatmul.mubr.f32.gmra.mxu1 %v6399_v36  ;;  %7995 = vmatprep.subr.mxu1 %v9462_v15 }
 0x221   :  { %7996 = vmatpush3.msra.mxu1 %v9462_v15  ;;  %7916 = vmatprep.mubr.f32.mxu1 %v6400_v1  ;;  %v6419_v15 = vld [vmem:[%s12046_s28 + $0x348] sm:$0xff] }
 0x222   :  { %7997 = vmatprep.subr.mxu1 %v9474_v41  ;;  %7976 = vmatmul.mubr.f32.gmra.mxu0 %v6419_v15 }
 0x223   :  { %7998 = vmatpush3.msra.mxu1 %v9474_v41  ;;  %v6404_v41 = vld [vmem:[%s12046_s28 + $0x2d0] sm:$0xff]  ;;  %7978 = vmatprep.mubr.f32.mxu0 %v6420_v27 }
 0x224   :  { %7917 = vmatmul.mubr.f32.gmra.mxu1 %v6401_v22  ;;  %7999 = vmatprep.subr.mxu1 %v9492_v34  ;;  %v6457_v22 = vld [vmem:[%s12046_s28 + $0x478] sm:$0xff] }
 0x225   :  { %8000 = vmatpush3.msra.mxu1 %v9492_v34  ;;  %7919 = vmatprep.mubr.f32.mxu1 %v6402_v19  ;;  %v6421_v34 = vld [vmem:[%s12046_s28 + $0x358] sm:$0xff] }
 0x226   :  { %8001 = vmatprep.subr.mxu1 %v9503_v30  ;;  %7979 = vmatmul.mubr.f32.gmra.mxu0 %v6421_v34 }
 0x227   :  { %8002 = vmatpush3.msra.mxu1 %v9503_v30  ;;  %v6406_v30 = vld [vmem:[%s12046_s28 + $0x2e0] sm:$0xff]  ;;  %7981 = vmatprep.mubr.f32.mxu0 %v6422_v35 }
 0x228   :  { %7920 = vmatmul.mubr.f32.gmra.mxu1 %v6403_v50  ;;  %8003 = vmatprep.subr.mxu1 %v9336_v26 }
 0x229   :  { %8004 = vmatpush3.msra.mxu1 %v9336_v26  ;;  %7922 = vmatprep.mubr.f32.mxu1 %v6404_v41  ;;  %v6423_v26 = vld [vmem:[%s12046_s28 + $0x368] sm:$0xff] }
 0x22a   :  { %8005 = vmatprep.subr.mxu1 %v9523_v4  ;;  %7982 = vmatmul.mubr.f32.gmra.mxu0 %v6423_v26 }
 0x22b   :  { %8006 = vmatpush3.msra.mxu1 %v9523_v4  ;;  %v6408_v4 = vld [vmem:[%s12046_s28 + $0x2f0] sm:$0xff]  ;;  %7984 = vmatprep.mubr.f32.mxu0 %v6424_v47 }
 0x22c   :  { %7923 = vmatmul.mubr.f32.gmra.mxu1 %v6405_v55  ;;  %8007 = vmatprep.subr.mxu1 %v9304_v10 }
 0x22d   :  { %8008 = vmatpush3.msra.mxu1 %v9304_v10  ;;  %7925 = vmatprep.mubr.f32.mxu1 %v6406_v30  ;;  %v6425_v10 = vld [vmem:[%s12046_s28 + $0x378] sm:$0xff] }
 0x22e   :  { %8009 = vmatprep.subr.mxu1 %v9540_v16  ;;  %7985 = vmatmul.mubr.f32.gmra.mxu0 %v6425_v10 }
 0x22f   :  { %8010 = vmatpush3.msra.mxu1 %v9540_v16  ;;  %v6426_v16 = vld [vmem:[%s12046_s28 + $0x380] sm:$0xff]  ;;  %8075 = vmatprep.mubr.f32.mxu0 %v6442_v53  ;;  %v2781_v53 = vld [vmem:[%s12063_s25 + $0x78] sm:$0xff] }
 0x230   :  { %7926 = vmatmul.mubr.f32.gmra.mxu1 %v6407_v45  ;;  %8011 = vmatprep.subr.mxu1 %v9272_v48 }
 0x231   :  { %8012 = vmatpush3.msra.mxu1 %v9272_v48  ;;  %7928 = vmatprep.mubr.f32.mxu1 %v6408_v4  ;;  %v6443_v48 = vld [vmem:[%s12046_s28 + $0x408] sm:$0xff] }
 0x232   :  { %8013 = vmatprep.subr.mxu1 %v9553_v6  ;;  %8076 = vmatmul.mubr.f32.vlgmr.msra.gmra.mxu0 %v6443_v48  ;;  %v2796_v48 = vld [vmem:[%s12063_s25 + $0xf0] sm:$0xff] }
 0x233   :  { %8014 = vmatpush3.msra.mxu1 %v9553_v6  ;;  %v6428_v6 = vld [vmem:[%s12046_s28 + $0x390] sm:$0xff]  ;;  %8078 = vmatprep.mubr.f32.mxu0 %v6444_v13 }
 0x234   :  { %7929 = vmatmul.mubr.f32.gmra.mxu1 %v6409_v21  ;;  %8015 = vmatprep.subr.mxu1 %v9254_v23  ;;  %v2797_v21 = vld [vmem:[%s12063_s25 + $0xf8] sm:$0xff] }
 0x235   :  { %8016 = vmatpush3.msra.mxu1 %v9254_v23  ;;  %8019 = vmatprep.mubr.f32.mxu1 %v6426_v16  ;;  %v6429_v23 = vld [vmem:[%s12046_s28 + $0x398] sm:$0xff] }
 0x236   :  { %8017 = vmatprep.subr.mxu1 %v9563_v29  ;;  %8079 = vmatmul.mubr.f32.gmra.mxu0 %v6445_v43  ;;  %v2794_v43 = vld [vmem:[%s12063_s25 + $0xe0] sm:$0xff] }
 0x237   :  { %8018 = vmatpush3.msra.mxu1 %v9563_v29  ;;  %v6431_v29 = vld [vmem:[%s12046_s28 + $0x3a8] sm:$0xff]  ;;  %8081 = vmatprep.mubr.f32.mxu0 %v6446_v14  ;;  %v2792_v14 = vld [vmem:[%s12063_s25 + $0xd0] sm:$0xff] }
 0x238   :  { %8020 = vmatmul.mubr.f32.vlgmr.msra.gmra.mxu1 %v6427_v2  ;;  %6985 = vmatprep.subr.mxu1 %v2797_v21  ;;  %v2780_v2 = vld [vmem:[%s12063_s25 + $0x70] sm:$0xff]  ;;  %v2770_v21 = vld [vmem:[%s12063_s25 + $0x20] sm:$0xff] }
 0x239   :  { %8022 = vmatprep.mubr.f32.mxu1 %v6428_v6  ;;  %6986 = vmatpush3.msra.mxu1 %v2781_v53  ;;  %v2785_v53 = vld [vmem:[%s12063_s25 + $0x98] sm:$0xff] }
 0x23a   :  { %8082 = vmatmul.mubr.f32.gmra.mxu0 %v6447_v8  ;;  %6987 = vmatprep.subr.mxu1 %v2796_v48  ;;  %v2776_v8 = vld [vmem:[%s12063_s25 + $0x50] sm:$0xff] }
 0x23b   :  { %8084 = vmatprep.mubr.f32.mxu0 %v6448_v17  ;;  %6988 = vmatpush3.msra.mxu1 %v2780_v2  ;;  %v2790_v17 = vld [vmem:[%s12063_s25 + $0xc0] sm:$0xff]  ;;  %v2769_v2 = vld [vmem:[%s12063_s25 + $0x18] sm:$0xff] }
 0x23c   :  { %8023 = vmatmul.mubr.f32.gmra.mxu1 %v6429_v23  ;;  %v2795_v23 = vld [vmem:[%s12063_s25 + $0xe8] sm:$0xff] }
 0x23d   :  { %8025 = vmatprep.mubr.f32.mxu1 %v6430_v5  ;;  %v2779_v5 = vld [vmem:[%s12063_s25 + $0x68] sm:$0xff]  ;;  %6989 = vmatprep.subr.mxu1 %v2795_v23 }
 0x23e   :  { %8085 = vmatmul.mubr.f32.gmra.mxu0 %v6449_v20  ;;  %6990 = vmatpush3.msra.mxu1 %v2779_v5  ;;  %v2774_v20 = vld [vmem:[%s12063_s25 + $0x40] sm:$0xff]  ;;  %v2784_v5 = vld [vmem:[%s12063_s25 + $0x90] sm:$0xff] }
 0x23f   :  { %v10160_v46 = vpop.f32.mrf.mxu1  ;;  %8087 = vmatprep.mubr.f32.mxu0 %v6450_v44  ;;  %6991 = vmatprep.subr.mxu1 %v2794_v43  ;;  %v2768_v43 = vld [vmem:[%s12063_s25 + $0x10] sm:$0xff] }
 0x240   :  { %8026 = vmatmul.mubr.f32.gmra.mxu1 %v6431_v29  ;;  %v2778_v29 = vld [vmem:[%s12063_s25 + $0x60] sm:$0xff] }
 0x241   :  { %8028 = vmatprep.mubr.f32.mxu1 %v6432_v3  ;;  %v10165_v37 = vpop.f32.mrf.mxu1  ;;  %v2793_v3 = vld [vmem:[%s12063_s25 + $0xd8] sm:$0xff]  ;;  %6992 = vmatpush3.msra.mxu1 %v2778_v29 }
 0x242   :  { %8088 = vmatmul.mubr.f32.gmra.mxu0 %v6451_v32  ;;  %6993 = vmatprep.subr.mxu1 %v2793_v3  ;;  %v2788_v32 = vld [vmem:[%s12063_s25 + $0xb0] sm:$0xff]  ;;  %v2783_v3 = vld [vmem:[%s12063_s25 + $0x88] sm:$0xff] }
 0x243   :  { %8090 = vmatprep.mubr.f32.mxu0 %v6452_v58  ;;  %v2772_v58 = vld [vmem:[%s12063_s25 + $0x30] sm:$0xff] }
 0x244   :  { %8029 = vmatmul.mubr.f32.gmra.mxu1 %v6433_v56  ;;  %v10176_v28 = vpop.f32.mrf.mxu1  ;;  %v2777_v56 = vld [vmem:[%s12063_s25 + $0x58] sm:$0xff] }
 0x245   :  { %8031 = vmatprep.mubr.f32.mxu1 %v6434_v12  ;;  %6994 = vmatpush3.msra.mxu1 %v2777_v56 }
 0x246   :  { %v10184_v61 = vpop.f32.mrf.mxu1  ;;  %8091 = vmatmul.mubr.f32.gmra.mxu0 %v6453_v59  ;;  %6995 = vmatprep.subr.mxu1 %v2792_v14  ;;  %v2787_v59 = vld [vmem:[%s12063_s25 + $0xa8] sm:$0xff] }
 0x247   :  { %8093 = vmatprep.mubr.f32.mxu0 %v6454_v60  ;;  %6996 = vmatpush3.msra.mxu1 %v2776_v8  ;;  %v2767_v14 = vld [vmem:[%s12063_s25 + $0x8] sm:$0xff]  ;;  %v2782_v8 = vld [vmem:[%s12063_s25 + $0x80] sm:$0xff] }
 0x248   :  { %8032 = vmatmul.mubr.f32.gmra.mxu1 %v6435_v57  ;;  %v2791_v57 = vld [vmem:[%s12063_s25 + $0xc8] sm:$0xff] }
 0x249   :  { %8034 = vmatprep.mubr.f32.mxu1 %v6436_v49  ;;  %6997 = vmatprep.subr.mxu1 %v2791_v57  ;;  %v2766_v57 = vld [vmem:[%s12063_s25] sm:$0xff] }
 0x24a   :  { %v10192_v24 = vpop.f32.mrf.mxu1  ;;  %8094 = vmatmul.mubr.f32.gmra.mxu0 %v6455_v42  ;;  %v2771_v42 = vld [vmem:[%s12063_s25 + $0x28] sm:$0xff] }
 0x24b   :  { %8096 = vmatprep.mubr.f32.mxu0 %v6456_v0 }
 0x24c   :  { %8035 = vmatmul.mubr.f32.gmra.mxu1 %v6437_v52  ;;  %v10200_v54 = vpop.f32.mrf.mxu1  ;;  %v2775_v52 = vld [vmem:[%s12063_s25 + $0x48] sm:$0xff] }
 0x24d   :  { %8037 = vmatprep.mubr.f32.mxu1 %v6438_v51  ;;  %6998 = vmatpush3.msra.mxu1 %v2775_v52 }
 0x24e   :  { %8097 = vmatmul.mubr.f32.gmra.mxu0 %v6457_v22  ;;  %6999 = vmatprep.subr.mxu1 %v2790_v17  ;;  %v2786_v22 = vld [vmem:[%s12063_s25 + $0xa0] sm:$0xff] }
 0x24f   :  { %7000 = vmatpush3.msra.mxu1 %v2774_v20 }
 0x250   :  { %8038 = vmatmul.mubr.f32.gmra.mxu1 %v6439_v33  ;;  %v10208_v38 = vpop.f32.mrf.mxu1  ;;  %v2789_v33 = vld [vmem:[%s12063_s25 + $0xb8] sm:$0xff] }
 0x251   :  { %8040 = vmatprep.mubr.f32.mxu1 %v6440_v63  ;;  %7001 = vmatprep.subr.mxu1 %v2789_v33 }
 0x252   :  { %v10213_v31 = vpop.f32.mrf.mxu1 }
 0x254   :  { %8041 = vmatmul.mubr.f32.gmra.mxu1 %v6441_v62  ;;  %v2773_v62 = vld [vmem:[%s12063_s25 + $0x38] sm:$0xff] }
 0x255   :  { %7002 = vmatpush3.msra.mxu1 %v2773_v62 }
 0x256   :  { %v10221_v7 = vpop.f32.mrf.mxu1  ;;  %7003 = vmatprep.subr.mxu1 %v2788_v32 }
 0x257   :  { %7004 = vmatpush3.msra.mxu1 %v2772_v58 }
 0x258   :  { %v10223_v25 = vpop.f32.mrf.mxu1  ;;  %7005 = vmatprep.subr.mxu1 %v2787_v59 }
 0x259   :  { %7006 = vmatpush3.msra.mxu1 %v2771_v42 }
 0x25a   :  { %7007 = vmatprep.subr.mxu1 %v2786_v22 }
 0x25b   :  { %7008 = vmatpush3.msra.mxu1 %v2770_v21 }
 0x25c   :  { %v10231_v9 = vpop.f32.mrf.mxu1  ;;  %7009 = vmatprep.subr.mxu1 %v2785_v53 }
 0x25d   :  { %7010 = vmatpush3.msra.mxu1 %v2769_v2 }
 0x25e   :  { %v10233_v11 = vpop.f32.mrf.mxu1  ;;  %7011 = vmatprep.subr.mxu1 %v2784_v5 }
 0x25f   :  { %7012 = vmatpush3.msra.mxu1 %v2768_v43 }
 0x260   :  { %7013 = vmatprep.subr.mxu1 %v2783_v3 }
 0x261   :  { %7014 = vmatpush3.msra.mxu1 %v2767_v14 }
 0x262   :  { %v10235_v18 = vpop.f32.mrf.mxu1  ;;  %7015 = vmatprep.subr.mxu1 %v2782_v8 }
 0x263   :  { %7016 = vmatpush3.msra.mxu1 %v2766_v57 }
 0x264   :  { %v10243_v36 = vpop.f32.mrf.mxu1 }
 0x268   :  { %v10245_v1 = vpop.f32.mrf.mxu1 }
 0x26a   :  { %v10247_v40 = vpop.f32.mrf.mxu1 }
 0x26e   :  { %v10255_v19 = vpop.f32.mrf.mxu1 }
 0x270   :  { %v10257_v39 = vpop.f32.mrf.mxu1 }
 0x274   :  { %v10259_v15 = vpop.f32.mrf.mxu1 }
 0x276   :  { %v10261_v50 = vpop.f32.mrf.mxu1 }
 0x279   :  { %v10263_v41 = vpop.f32.mrf.mxu1 }
 0x27b   :  { %v10265_v27 = vpop.f32.mrf.mxu1 }
 0x27e   :  { %v10267_v34 = vpop.f32.mrf.mxu1 }
 0x280   :  { %v10269_v55 = vpop.f32.mrf.mxu1 }
 0x283   :  { %v10271_v30 = vpop.f32.mrf.mxu1 }
 0x285   :  { %v10273_v35 = vpop.f32.mrf.mxu1 }
 0x288   :  { %v10275_v26 = vpop.f32.mrf.mxu1 }
 0x28a   :  { %v10277_v45 = vpop.f32.mrf.mxu1 }
 0x28d   :  { %v10279_v4 = vpop.f32.mrf.mxu1 }
 0x28f   :  { %v10281_v47 = vpop.f32.mrf.mxu1 }
 0x292   :  { %v10283_v10 = vpop.f32.mrf.mxu1 }
 0x294   :  { %v10288_v16 = vpop.f32.mrf.mxu1 }
 0x297   :  { %v10299_v6 = vpop.f32.mrf.mxu1 }
 0x299   :  { %v10307_v13 = vpop.f32.mrf.mxu1 }
 0x29c   :  { %v10321_v12 = vpop.f32.mrf.mxu1 }
 0x29e   :  { %v10332_v49 = vpop.f32.mrf.mxu1 }
 0x2a0   :  { %v10337_v51 = vpop.f32.mrf.mxu1 }
 0x2a2   :  { %v10348_v63 = vpop.f32.mrf.mxu1 }
 0x2a4   :  { %v10353_v44 = vpop.f32.mrf.mxu1 }
 0x2a6   :  { %v10364_v60 = vpop.f32.mrf.mxu1 }
 0x2a8   :  { %v10369_v0 = vpop.f32.mrf.mxu1 }
 0x2aa   :  { %v10380_v48 = vpop.f32.mrf.mxu1 }
 0x2ac   :  { %v10385_v23 = vpop.f32.mrf.mxu1 }
 0x2ae   :  { %v10393_v29 = vpop.f32.mrf.mxu1 }
 0x2b0   :  { %v10398_v56 = vpop.f32.mrf.mxu1 }
 0x2b2   :  { %v10409_v52 = vpop.f32.mrf.mxu1 }
 0x2b4   :  { %v10411_v17 = vpop.f32.mrf.mxu1 }
 0x2b6   :  { %v10413_v20 = vpop.f32.mrf.mxu1 }
 0x2b8   :  { %v7797_v33 = vpop.f32.mrf.mxu1 }
 0x2b9   :  { %v8408_v42 = vpack.i.bf16 %v10255_v19, %v7797_v33 }
 0x2ba   :  { %v1556_v62 = vpop.f32.mrf.mxu1 }
 0x2bb   :  { %v8403_v32 = vpack.i.bf16 %v10257_v39, %v1556_v62  ;;  %v2829_v62 = vld [vmem:[%s12063_s25 + $0x1f8] sm:$0xff] }
 0x2bc   :  { %v7800_v58 = vpop.f32.mrf.mxu1  ;;  %7065 = vmatprep.subr.mxu0 %v2829_v62 }
 0x2bd   :  { %8404 = vrot.lane.b32.xlu0 %v8403_v32, %s8643_s6  ;;  %v8418_v2 = vpack.i.bf16 %v10259_v15, %v7800_v58 }
 0x2be   :  { %v1566_v59 = vpop.f32.mrf.mxu1 }
 0x2bf   :  { %v8413_v22 = vpack.i.bf16 %v10261_v50, %v1566_v59 }
 0x2c0   :  { %v7803_v21 = vpop.f32.mrf.mxu1 }
 0x2c1   :  { %8409 = vrot.lane.b32.xlu0 %v8408_v42, %s8643_s6  ;;  %8414 = vrot.lane.b32.xlu1 %v8413_v22, %s8643_s6  ;;  %v8428_v19 = vpack.i.bf16 %v10263_v41, %v7803_v21  ;;  %v2827_v42 = vld [vmem:[%s12063_s25 + $0x1e8] sm:$0xff] }
 0x2c2   :  { %v1576_v53 = vpop.f32.mrf.mxu1  ;;  %v2811_v21 = vld [vmem:[%s12063_s25 + $0x168] sm:$0xff] }
 0x2c3   :  { %v8423_v5 = vpack.i.bf16 %v10265_v27, %v1576_v53  ;;  %v2826_v53 = vld [vmem:[%s12063_s25 + $0x1e0] sm:$0xff] }
 0x2c4   :  { %v7806_v39 = vpop.f32.mrf.mxu1 }
 0x2c5   :  { %8419 = vrot.lane.b32.xlu1 %v8418_v2, %s8643_s6  ;;  %8424 = vrot.lane.b32.xlu0 %v8423_v5, %s8643_s6  ;;  %v8438_v15 = vpack.i.bf16 %v10267_v34, %v7806_v39  ;;  %v2813_v34 = vld [vmem:[%s12063_s25 + $0x178] sm:$0xff] }
 0x2c6   :  { %v1586_v43 = vpop.f32.mrf.mxu1  ;;  %7066 = vmatpush3.msra.mxu0 %v2813_v34  ;;  %v2825_v39 = vld [vmem:[%s12063_s25 + $0x1d8] sm:$0xff] }
 0x2c7   :  { %v8433_v50 = vpack.i.bf16 %v10269_v55, %v1586_v43 }
 0x2c8   :  { %v7809_v3 = vpop.f32.mrf.mxu1 }
 0x2c9   :  { %8429 = vrot.lane.b32.xlu1 %v8428_v19, %s8643_s6  ;;  %8434 = vrot.lane.b32.xlu0 %v8433_v50, %s8643_s6  ;;  %v8458_v55 = vpack.i.bf16 %v10271_v30, %v7809_v3  ;;  %v2812_v30 = vld [vmem:[%s12063_s25 + $0x170] sm:$0xff]  ;;  %v10473_v19 = vpop.f32.mrf.mxu0  ;;  %v2809_v50 = vld [vmem:[%s12063_s25 + $0x158] sm:$0xff] }
 0x2ca   :  { %v1596_v14 = vpop.f32.mrf.mxu1  ;;  %12064 = vst [vmem:[#allocation3_spill] sm:$0xff] %v10473_v19  ;;  %v2808_v3 = vld [vmem:[%s12063_s25 + $0x150] sm:$0xff] }
 0x2cb   :  { %v8453_v57 = vpack.i.bf16 %v10273_v35, %v1596_v14  ;;  %v2828_v35 = vld [vmem:[%s12063_s25 + $0x1f0] sm:$0xff] }
 0x2cc   :  { %v7812_v8 = vpop.f32.mrf.mxu1  ;;  %7067 = vmatprep.subr.mxu0 %v2828_v35  ;;  %v2821_v35 = vld [vmem:[%s12063_s25 + $0x1b8] sm:$0xff] }
 0x2cd   :  { %8439 = vrot.lane.b32.xlu0 %v8438_v15, %s8643_s6  ;;  %7068 = vmatpush3.msra.mxu0 %v2812_v30  ;;  %v8478_v5 = vpack.i.bf16 %v10275_v26, %v7812_v8  ;;  %v2824_v26 = vld [vmem:[%s12063_s25 + $0x1d0] sm:$0xff]  ;;  %v2823_v8 = vld [vmem:[%s12063_s25 + $0x1c8] sm:$0xff] }
 0x2ce   :  { %v1606_v27 = vpop.f32.mrf.mxu1  ;;  %7069 = vmatprep.subr.mxu0 %v2827_v42  ;;  %v2805_v42 = vld [vmem:[%s12063_s25 + $0x138] sm:$0xff] }
 0x2cf   :  { %v8473_v59 = vpack.i.bf16 %v10277_v45, %v1606_v27  ;;  %7070 = vmatpush3.msra.mxu0 %v2811_v21  ;;  %v2810_v45 = vld [vmem:[%s12063_s25 + $0x160] sm:$0xff] }
 0x2d0   :  { %v7815_v33 = vpop.f32.mrf.mxu1  ;;  %7071 = vmatprep.subr.mxu0 %v2826_v53 }
 0x2d1   :  { %8454 = vrot.lane.b32.xlu0 %v8453_v57, %s8643_s6  ;;  %7072 = vmatpush3.msra.mxu0 %v2810_v45  ;;  %v10493_v57 = vpop.f32.mrf.mxu0  ;;  %v8498_v34 = vpack.i.bf16 %v10279_v4, %v7815_v33  ;;  %v2820_v4 = vld [vmem:[%s12063_s25 + $0x1b0] sm:$0xff]  ;;  %v2819_v45 = vld [vmem:[%s12063_s25 + $0x1a8] sm:$0xff] }
 0x2d2   :  { %v1616_v41 = vpop.f32.mrf.mxu1  ;;  %7073 = vmatprep.subr.mxu0 %v2825_v39  ;;  %v2804_v33 = vld [vmem:[%s12063_s25 + $0x130] sm:$0xff] }
 0x2d3   :  { %7074 = vmatpush3.msra.mxu0 %v2809_v50  ;;  %v8493_v15 = vpack.i.bf16 %v10281_v47, %v1616_v41  ;;  %v2822_v47 = vld [vmem:[%s12063_s25 + $0x1c0] sm:$0xff] }
 0x2d4   :  { %v10437_v32 = vpop.f32.mrf.mxu1  ;;  %7075 = vmatprep.subr.mxu0 %v2824_v26  ;;  %v2806_v41 = vld [vmem:[%s12063_s25 + $0x140] sm:$0xff] }
 0x2d5   :  { %8459 = vrot.lane.b32.xlu0 %v8458_v55, %s8643_s6  ;;  %7076 = vmatpush3.msra.mxu0 %v2808_v3  ;;  %v2807_v55 = vld [vmem:[%s12063_s25 + $0x148] sm:$0xff]  ;;  %v2802_v26 = vld [vmem:[%s12063_s25 + $0x120] sm:$0xff] }
 0x2d6   :  { %v1626_v58 = vpop.f32.mrf.mxu1  ;;  %7077 = vmatprep.subr.mxu0 %v2823_v8  ;;  %v2817_v8 = vld [vmem:[%s12063_s25 + $0x198] sm:$0xff] }
 0x2d7   :  { %7078 = vmatpush3.msra.mxu0 %v2807_v55  ;;  %v8513_v53 = vpack.i.bf16 %v10288_v16, %v1626_v58  ;;  %v2803_v16 = vld [vmem:[%s12063_s25 + $0x128] sm:$0xff]  ;;  %v2818_v58 = vld [vmem:[%s12063_s25 + $0x1a0] sm:$0xff] }
 0x2d8   :  { %v10453_v22 = vpop.f32.mrf.mxu1  ;;  %7079 = vmatprep.subr.mxu0 %v2822_v47 }
 0x2d9   :  { %8474 = vrot.lane.b32.xlu0 %v8473_v59, %s8643_s6  ;;  %7080 = vmatpush3.msra.mxu0 %v2806_v41  ;;  %v10513_v59 = vpop.f32.mrf.mxu0  ;;  %v2801_v41 = vld [vmem:[%s12063_s25 + $0x118] sm:$0xff] }
 0x2da   :  { %v10465_v2 = vpop.f32.mrf.mxu1  ;;  %12065 = vst [vmem:[#allocation4_spill] sm:$0xff] %v10513_v59  ;;  %7081 = vmatprep.subr.mxu0 %v2821_v35  ;;  %v2815_v35 = vld [vmem:[%s12063_s25 + $0x188] sm:$0xff] }
 0x2db   :  { %7082 = vmatpush3.msra.mxu0 %v2805_v42  ;;  %v10538_v50 = vpop.f32.mrf.mxu0 }
 0x2dc   :  { %v10471_v43 = vpop.f32.mrf.mxu1  ;;  %7083 = vmatprep.subr.mxu0 %v2820_v4  ;;  %12066 = vst [vmem:[#allocation5_spill] sm:$0xff] %v10538_v50 }
 0x2dd   :  { %8479 = vrot.lane.b32.xlu0 %v8478_v5, %s8643_s6  ;;  %7084 = vmatpush3.msra.mxu0 %v2804_v33  ;;  %v10534_v5 = vld [vmem:[%s12063_s25 + $0x238] sm:$0xff]  ;;  %v10560_v47 = vpop.f32.mrf.mxu0  ;;  %v2799_v33 = vld [vmem:[%s12063_s25 + $0x108] sm:$0xff] }
 0x2de   :  { %v10485_v14 = vpop.f32.mrf.mxu1  ;;  %7085 = vmatprep.subr.mxu0 %v2819_v45  ;;  %8099 = vmatprep.subr.mxu1 %v10534_v5  ;;  %12067 = vst [vmem:[#allocation6_spill] sm:$0xff] %v10560_v47 }
 0x2df   :  { %7086 = vmatpush3.msra.mxu0 %v2803_v16  ;;  %v10577_v4 = vpop.f32.mrf.mxu0  ;;  %v2798_v16 = vld [vmem:[%s12063_s25 + $0x100] sm:$0xff] }
 0x2e0   :  { %v10491_v27 = vpop.f32.mrf.mxu1  ;;  %7087 = vmatprep.subr.mxu0 %v2818_v58  ;;  %12068 = vst [vmem:[#allocation7_spill] sm:$0xff] %v10577_v4 }
 0x2e1   :  { %8494 = vrot.lane.b32.xlu0 %v8493_v15, %s8643_s6  ;;  %v8518_v15 = vpack.i.bf16 %v10283_v10, %v10437_v32  ;;  %7088 = vmatpush3.msra.mxu0 %v2802_v26  ;;  %v2816_v10 = vld [vmem:[%s12063_s25 + $0x190] sm:$0xff]  ;;  %v10590_v26 = vpop.f32.mrf.mxu0 }
 0x2e2   :  { %v10505_v62 = vpop.f32.mrf.mxu1  ;;  %7089 = vmatprep.subr.mxu0 %v2817_v8  ;;  %v2800_v32 = vld [vmem:[%s12063_s25 + $0x110] sm:$0xff]  ;;  %12069 = vst [vmem:[#allocation8_spill] sm:$0xff] %v10590_v26 }
 0x2e3   :  { %7090 = vmatpush3.msra.mxu0 %v2801_v41  ;;  %v10592_v41 = vpop.f32.mrf.mxu0 }
 0x2e4   :  { %v10511_v30 = vpop.f32.mrf.mxu1  ;;  %7091 = vmatprep.subr.mxu0 %v2816_v10  ;;  %12070 = vst [vmem:[#allocation9_spill] sm:$0xff] %v10592_v41 }
 0x2e5   :  { %8499 = vrot.lane.b32.xlu0 %v8498_v34, %s8643_s6  ;;  %7092 = vmatpush3.msra.mxu0 %v2800_v32 }
 0x2e6   :  { %v10525_v21 = vpop.f32.mrf.mxu1  ;;  %7093 = vmatprep.subr.mxu0 %v2815_v35 }
 0x2e7   :  { %7094 = vmatpush3.msra.mxu0 %v2799_v33  ;;  %v10595_v33 = vpop.f32.mrf.mxu0 }
 0x2e8   :  { %v10536_v39 = vpop.f32.mrf.mxu1  ;;  %12071 = vst [vmem:[#allocation10_spill] sm:$0xff] %v10595_v33 }
 0x2e9   :  { %8514 = vrot.lane.b32.xlu0 %v8513_v53, %s8643_s6  ;;  %v2814_v53 = vld [vmem:[%s12063_s25 + $0x180] sm:$0xff]  ;;  %v10599_v4 = vpop.f32.mrf.mxu0 }
 0x2ea   :  { %v10551_v3 = vpop.f32.mrf.mxu1  ;;  %7095 = vmatprep.subr.mxu0 %v2814_v53  ;;  %12072 = vst [vmem:[#allocation11_spill] sm:$0xff] %v10599_v4 }
 0x2eb   :  { %7096 = vmatpush3.msra.mxu0 %v2798_v16  ;;  %v10603_v50 = vpop.f32.mrf.mxu0 }
 0x2ec   :  { %v10558_v55 = vpop.f32.mrf.mxu1  ;;  %12073 = vst [vmem:[#allocation12_spill] sm:$0xff] %v10603_v50 }
 0x2ed   :  { %8519 = vrot.lane.b32.xlu0 %v8518_v15, %s8643_s6  ;;  %v10607_v33 = vpop.f32.mrf.mxu0 }
 0x2ee   :  { %v1930_v34 = vpop.f32.mrf.mxu1 }
 0x2ef   :  { %v10611_v4 = vpop.f32.mrf.mxu0 }
 0x2f0   :  { %v10575_v42 = vpop.f32.mrf.mxu1 }
 0x2f1   :  { %v10615_v19 = vpop.f32.mrf.mxu0 }
 0x2f2   :  { %v1940_v45 = vpop.f32.mrf.mxu1 }
 0x2f4   :  { %v10588_v58 = vpop.f32.mrf.mxu1 }
 0x2f6   :  { %v1950_v15 = vpop.f32.mrf.mxu1 }
 0x2f8   :  { %v8021_v8 = vpop.f32.mrf.mxu1 }
 0x2f9   :  { %v8448_v47 = vpack.i.bf16 %v10453_v22, %v8021_v8 }
 0x2fa   :  { %v2204_v10 = vpop.f32.mrf.mxu1 }
 0x2fb   :  { %v8443_v32 = vpack.i.bf16 %v10465_v2, %v2204_v10 }
 0x2fc   :  { %v8024_v35 = vpop.f32.mrf.mxu1 }
 0x2fd   :  { %8444 = vrot.lane.b32.xlu1 %v8443_v32, %s8643_s6  ;;  %v8468_v10 = vpack.i.bf16 %v10471_v43, %v8024_v35 }
 0x2fe   :  { %v2214_v53 = vpop.f32.mrf.mxu1 }
 0x2ff   :  { %v8463_v59 = vpack.i.bf16 %v10485_v14, %v2214_v53 }
 0x300   :  { %v8027_v16 = vpop.f32.mrf.mxu1 }
 0x301   :  { %8449 = vrot.lane.b32.xlu1 %v8448_v47, %s8643_s6  ;;  %v8488_v53 = vpack.i.bf16 %v10491_v27, %v8027_v16 }
 0x302   :  { %v2224_v26 = vpop.f32.mrf.mxu1 }
 0x303   :  { %v8483_v8 = vpack.i.bf16 %v10505_v62, %v2224_v26 }
 0x304   :  { %v8030_v41 = vpop.f32.mrf.mxu1 }
 0x305   :  { %8464 = vrot.lane.b32.xlu1 %v8463_v59, %s8643_s6 }
 0x306   :  { %v2234_v2 = vpop.f32.mrf.mxu1 }
 0x307   :  { %v8503_v35 = vpack.i.bf16 %v10525_v21, %v2234_v2 }
 0x308   :  { %v8033_v32 = vpop.f32.mrf.mxu1 }
 0x309   :  { %8469 = vrot.lane.b32.xlu1 %v8468_v10, %s8643_s6  ;;  %v10620_v10 = vpop.f32.mrf.mxu0  ;;  %v8528_v2 = vpack.i.bf16 %v10536_v39, %v8033_v32 }
 0x30a   :  { %v2244_v22 = vpop.f32.mrf.mxu1 }
 0x30b   :  { %v8523_v21 = vpack.i.bf16 %v10551_v3, %v2244_v22 }
 0x30c   :  { %v8036_v47 = vpop.f32.mrf.mxu1 }
 0x30d   :  { %8484 = vrot.lane.b32.xlu1 %v8483_v8, %s8643_s6  ;;  %v10625_v8 = vpop.f32.mrf.mxu0 }
 0x30e   :  { %v2254_v14 = vpop.f32.mrf.mxu1 }
 0x30f   :  { %v8533_v59 = vpack.i.bf16 %v1930_v34, %v2254_v14  ;;  %v8508_v34 = vpack.i.bf16 %v10511_v30, %v8030_v41  ;;  %v8538_v30 = vpack.i.bf16 %v10558_v55, %v8036_v47 }
 0x310   :  { %v8039_v50 = vpop.f32.mrf.mxu1 }
 0x311   :  { %8489 = vrot.lane.b32.xlu1 %v8488_v53, %s8643_s6  ;;  %8534 = vrot.lane.b32.xlu0 %v8533_v59, %s8643_s6  ;;  %v8548_v41 = vpack.i.bf16 %v10575_v42, %v8039_v50 }
 0x312   :  { %v2264_v43 = vpop.f32.mrf.mxu1 }
 0x313   :  { %v8543_v62 = vpack.i.bf16 %v1940_v45, %v2264_v43  ;;  %v10630_v45 = vpop.f32.mrf.mxu0 }
 0x314   :  { %v8042_v26 = vpop.f32.mrf.mxu1 }
 0x315   :  { %8504 = vrot.lane.b32.xlu1 %v8503_v35, %s8643_s6  ;;  %8544 = vrot.lane.b32.xlu0 %v8543_v62, %s8643_s6  ;;  %v10634_v14 = vpop.f32.mrf.mxu0  ;;  %v8558_v3 = vpack.i.bf16 %v10588_v58, %v8042_v26  ;;  %v2836_v58 = vld [vmem:[%s12063_s25 + $0x230] sm:$0xff] }
 0x316   :  { %v2274_v27 = vpop.f32.mrf.mxu1 }
 0x317   :  { %v8553_v16 = vpack.i.bf16 %v1950_v15, %v2274_v27  ;;  %v10638_v15 = vpop.f32.mrf.mxu0 }
 0x319   :  { %8509 = vrot.lane.b32.xlu1 %v8508_v34, %s8643_s6  ;;  %8554 = vrot.lane.b32.xlu0 %v8553_v16, %s8643_s6  ;;  %v10642_v53 = vpop.f32.mrf.mxu0 }
 0x31b   :  { %v10646_v22 = vpop.f32.mrf.mxu0 }
 0x31d   :  { %8524 = vrot.lane.b32.xlu1 %v8523_v21, %s8643_s6  ;;  %v10649_v47 = vpop.f32.mrf.mxu0 }
 0x31f   :  { %v10658_v27 = vpop.f32.mrf.mxu0 }
 0x321   :  { %8529 = vrot.lane.b32.xlu1 %v8528_v2, %s8643_s6 }
 0x325   :  { %8539 = vrot.lane.b32.xlu1 %v8538_v30, %s8643_s6 }
 0x329   :  { %8549 = vrot.lane.b32.xlu1 %v8548_v41, %s8643_s6 }
 0x32d   :  { %8559 = vrot.lane.b32.xlu1 %v8558_v3, %s8643_s6  ;;  %v10673_v3 = vpop.f32.mrf.mxu0 }
 0x32f   :  { %v8405_v39 = vpop.permute.xlu0 %8404 }
 0x330   :  { %v8407_v32 = vunpack.i.h.bf16 %v8405_v39  ;;  %v8406_v55 = vunpack.i.l.bf16 %v8405_v39 }
 0x332   :  { %v2718_v59 = vsel %vm2701_vm2, %v10307_v13, %v8406_v55  ;;  %v2702_v50 = vsel %vm2701_vm2, %v10165_v37, %v8407_v32  ;;  %v2835_v13 = vld [vmem:[%s12063_s25 + $0x228] sm:$0xff] }
 0x333   :  { %v8410_v42 = vpop.permute.xlu0 %8409  ;;  %2957 = vmatprep.mubr.f32.mxu1 %v2718_v59  ;;  %v8415_v43 = vpop.permute.xlu1 %8414 }
 0x334   :  { %v8412_v35 = vunpack.i.h.bf16 %v8410_v42  ;;  %v8411_v62 = vunpack.i.l.bf16 %v8410_v42  ;;  %v8416_v26 = vunpack.i.l.bf16 %v8415_v43  ;;  %2958 = vmatmul.mubr.f32.vlgmr.msra.gmra.mxu1 %v2702_v50  ;;  %v8417_v16 = vunpack.i.h.bf16 %v8415_v43  ;;  %v10685_v50 = vpop.f32.mrf.mxu0 }
 0x335   :  { %8100 = vmatpush3.msra.mxu1 %v10534_v5  ;;  %v2834_v5 = vld [vmem:[%s12063_s25 + $0x220] sm:$0xff] }
 0x336   :  { %v2719_v37 = vsel %vm2701_vm2, %v10299_v6, %v8411_v62  ;;  %v2703_v34 = vsel %vm2701_vm2, %v10160_v46, %v8412_v35  ;;  %8101 = vmatprep.subr.mxu1 %v2836_v58  ;;  %v2720_v41 = vsel %vm2701_vm2, %v10332_v49, %v8416_v26  ;;  %v2833_v46 = vld [vmem:[%s12063_s25 + $0x218] sm:$0xff]  ;;  %v2704_v32 = vsel %vm2701_vm2, %v10184_v61, %v8417_v16  ;;  %v2832_v49 = vld [vmem:[%s12063_s25 + $0x210] sm:$0xff]  ;;  %v2831_v61 = vld [vmem:[%s12063_s25 + $0x208] sm:$0xff] }
 0x337   :  { %2962 = vmatprep.mubr.f32.mxu1 %v2719_v37  ;;  %v8420_v21 = vpop.permute.xlu1 %8419  ;;  %v8425_v2 = vpop.permute.xlu0 %8424  ;;  %8102 = vmatpush3.msra.mxu1 %v2836_v58 }
 0x338   :  { %v8421_v30 = vunpack.i.l.bf16 %v8420_v21  ;;  %2963 = vmatmul.mubr.f32.gmra.mxu1 %v2703_v34  ;;  %8103 = vmatprep.subr.mxu1 %v2835_v13  ;;  %v8422_v6 = vunpack.i.h.bf16 %v8420_v21  ;;  %v8426_v55 = vunpack.i.l.bf16 %v8425_v2  ;;  %v8427_v43 = vunpack.i.h.bf16 %v8425_v2 }
 0x339   :  { %2967 = vmatprep.mubr.f32.mxu1 %v2720_v41  ;;  %8104 = vmatpush3.msra.mxu1 %v2835_v13  ;;  %v10697_v13 = vpop.f32.mrf.mxu0 }
 0x33a   :  { %8105 = vmatprep.subr.mxu1 %v2834_v5  ;;  %v2721_v59 = vsel %vm2701_vm2, %v10321_v12, %v8421_v30  ;;  %v2705_v35 = vsel %vm2701_vm2, %v10176_v28, %v8422_v6  ;;  %v2830_v12 = vld [vmem:[%s12063_s25 + $0x200] sm:$0xff]  ;;  %v2722_v26 = vsel %vm2701_vm2, %v10348_v63, %v8426_v55  ;;  %v2706_v28 = vsel %vm2701_vm2, %v10200_v54, %v8427_v43 }
 0x33b   :  { %v8435_v39 = vpop.permute.xlu0 %8434  ;;  %8106 = vmatpush3.msra.mxu1 %v2834_v5  ;;  %v8430_v42 = vpop.permute.xlu1 %8429 }
 0x33c   :  { %2968 = vmatmul.mubr.f32.gmra.mxu1 %v2704_v32  ;;  %8107 = vmatprep.subr.mxu1 %v2833_v46  ;;  %v8431_v62 = vunpack.i.l.bf16 %v8430_v42  ;;  %v8432_v37 = vunpack.i.h.bf16 %v8430_v42  ;;  %v8436_v16 = vunpack.i.l.bf16 %v8435_v39  ;;  %v10703_v2 = vpop.f32.mrf.mxu0  ;;  %v8437_v63 = vunpack.i.h.bf16 %v8435_v39 }
 0x33d   :  { %2972 = vmatprep.mubr.f32.mxu1 %v2721_v59  ;;  %8108 = vmatpush3.msra.mxu1 %v2833_v46 }
 0x33e   :  { %8109 = vmatprep.subr.mxu1 %v2832_v49  ;;  %v2723_v21 = vsel %vm2701_vm2, %v10337_v51, %v8431_v62  ;;  %v2707_v30 = vsel %vm2701_vm2, %v10192_v24, %v8432_v37  ;;  %v2724_v46 = vsel %vm2701_vm2, %v10364_v60, %v8436_v16  ;;  %v10709_v54 = vpop.f32.mrf.mxu0  ;;  %v2708_v51 = vsel %vm2701_vm2, %v10213_v31, %v8437_v63 }
 0x33f   :  { %v8440_v58 = vpop.permute.xlu0 %8439  ;;  %8110 = vmatpush3.msra.mxu1 %v2832_v49 }
 0x340   :  { %2973 = vmatmul.mubr.f32.gmra.mxu1 %v2705_v35  ;;  %8111 = vmatprep.subr.mxu1 %v2831_v61  ;;  %v8441_v41 = vunpack.i.l.bf16 %v8440_v58  ;;  %v8442_v6 = vunpack.i.h.bf16 %v8440_v58  ;;  %v10715_v55 = vpop.f32.mrf.mxu0 }
 0x341   :  { %2977 = vmatprep.mubr.f32.mxu1 %v2722_v26  ;;  %8112 = vmatpush3.msra.mxu1 %v2831_v61 }
 0x342   :  { %8113 = vmatprep.subr.mxu1 %v2830_v12  ;;  %v2725_v39 = vsel %vm2701_vm2, %v10353_v44, %v8441_v41  ;;  %v2709_v60 = vsel %vm2701_vm2, %v10208_v38, %v8442_v6  ;;  %v10721_v43 = vpop.f32.mrf.mxu0 }
 0x343   :  { %v8455_v34 = vpop.permute.xlu0 %8454  ;;  %8114 = vmatpush3.msra.mxu1 %v2830_v12 }
 0x344   :  { %2978 = vmatmul.mubr.f32.gmra.mxu1 %v2706_v28  ;;  %v8456_v49 = vunpack.i.l.bf16 %v8455_v34  ;;  %v8457_v24 = vunpack.i.h.bf16 %v8455_v34  ;;  %v10727_v62 = vpop.f32.mrf.mxu0 }
 0x345   :  { %2982 = vmatprep.mubr.f32.mxu1 %v2723_v21 }
 0x346   :  { %v2726_v61 = vsel %vm2701_vm2, %v10380_v48, %v8456_v49  ;;  %v2710_v44 = vsel %vm2701_vm2, %v10223_v25, %v8457_v24  ;;  %v10733_v34 = vpop.f32.mrf.mxu0 }
 0x347   :  { %v8460_v5 = vpop.permute.xlu0 %8459 }
 0x348   :  { %2983 = vmatmul.mubr.f32.gmra.mxu1 %v2707_v30  ;;  %v8461_v42 = vunpack.i.l.bf16 %v8460_v5  ;;  %v8462_v31 = vunpack.i.h.bf16 %v8460_v5  ;;  %v8077_v63 = vpop.f32.mrf.mxu0 }
 0x349   :  { %2987 = vmatprep.mubr.f32.mxu1 %v2724_v46 }
 0x34a   :  { %v2727_v12 = vsel %vm2701_vm2, %v10369_v0, %v8461_v42  ;;  %v2711_v48 = vsel %vm2701_vm2, %v10221_v7, %v8462_v31  ;;  %v2366_v46 = vpop.f32.mrf.mxu0 }
 0x34b   :  { %v8475_v32 = vpop.permute.xlu0 %8474 }
 0x34c   :  { %2988 = vmatmul.mubr.f32.gmra.mxu1 %v2708_v51  ;;  %v8476_v35 = vunpack.i.l.bf16 %v8475_v32  ;;  %v8477_v38 = vunpack.i.h.bf16 %v8475_v32 }
 0x34d   :  { %2992 = vmatprep.mubr.f32.mxu1 %v2725_v39 }
 0x34e   :  { %v2728_v37 = vsel %vm2701_vm2, %v10393_v29, %v8476_v35  ;;  %v2712_v0 = vsel %vm2701_vm2, %v10233_v11, %v8477_v38  ;;  %v8080_v11 = vpop.f32.mrf.mxu0 }
 0x34f   :  { %v8480_v59 = vpop.permute.xlu0 %8479 }
 0x350   :  { %2993 = vmatmul.mubr.f32.gmra.mxu1 %v2709_v60  ;;  %v8481_v26 = vunpack.i.l.bf16 %v8480_v59  ;;  %v8482_v28 = vunpack.i.h.bf16 %v8480_v59 }
 0x351   :  { %2997 = vmatprep.mubr.f32.mxu1 %v2726_v61 }
 0x352   :  { %v2729_v21 = vsel %vm2701_vm2, %v10385_v23, %v8481_v26  ;;  %v2713_v29 = vsel %vm2701_vm2, %v10231_v9, %v8482_v28  ;;  %v2376_v9 = vpop.f32.mrf.mxu0 }
 0x353   :  { %v8495_v58 = vpop.permute.xlu0 %8494 }
 0x354   :  { %2998 = vmatmul.mubr.f32.gmra.mxu1 %v2710_v44  ;;  %v8496_v16 = vunpack.i.l.bf16 %v8495_v58  ;;  %v8497_v7 = vunpack.i.h.bf16 %v8495_v58  ;;  %v8083_v60 = vpop.f32.mrf.mxu0 }
 0x355   :  { %3002 = vmatprep.mubr.f32.mxu1 %v2727_v12 }
 0x356   :  { %v2730_v41 = vsel %vm2701_vm2, %v10409_v52, %v8496_v16  ;;  %v2714_v32 = vsel %vm2701_vm2, %v10243_v36, %v8497_v7  ;;  %v2386_v61 = vpop.f32.mrf.mxu0 }
 0x357   :  { %v8500_v25 = vpop.permute.xlu0 %8499 }
 0x358   :  { %3003 = vmatmul.mubr.f32.gmra.mxu1 %v2711_v48  ;;  %v8501_v30 = vunpack.i.l.bf16 %v8500_v25  ;;  %v8502_v6 = vunpack.i.h.bf16 %v8500_v25  ;;  %v8086_v31 = vpop.f32.mrf.mxu0 }
 0x359   :  { %3007 = vmatprep.mubr.f32.mxu1 %v2728_v37  ;;  %v12074_v37 = vld [vmem:[#allocation3_spill] sm:$0xff] }
 0x35a   :  { %v2731_v51 = vsel %vm2701_vm2, %v10398_v56, %v8501_v30  ;;  %v2715_v24 = vsel %vm2701_vm2, %v10235_v18, %v8502_v6  ;;  %v2396_v12 = vpop.f32.mrf.mxu0 }
 0x35b   :  { %v8515_v5 = vpop.permute.xlu0 %8514 }
 0x35c   :  { %3008 = vmatmul.mubr.f32.gmra.mxu1 %v2712_v0  ;;  %v8516_v23 = vunpack.i.l.bf16 %v8515_v5  ;;  %v8517_v39 = vunpack.i.h.bf16 %v8515_v5 }
 0x35d   :  { %3012 = vmatprep.mubr.f32.mxu1 %v2729_v21  ;;  %v12075_v21 = vld [vmem:[#allocation5_spill] sm:$0xff] }
 0x35e   :  { %v2732_v59 = vsel %vm2701_vm2, %v10413_v20, %v8516_v23  ;;  %v2716_v42 = vsel %vm2701_vm2, %v10247_v40, %v8517_v39 }
 0x35f   :  { %v8520_v49 = vpop.permute.xlu0 %8519 }
 0x360   :  { %3013 = vmatmul.mubr.f32.gmra.mxu1 %v2713_v29  ;;  %v8521_v52 = vunpack.i.l.bf16 %v8520_v49  ;;  %v8522_v36 = vunpack.i.h.bf16 %v8520_v49  ;;  %v12077_v49 = vld [vmem:[#allocation7_spill] sm:$0xff] }
 0x361   :  { %3017 = vmatprep.mubr.f32.mxu1 %v2730_v41  ;;  %v12076_v41 = vld [vmem:[#allocation4_spill] sm:$0xff] }
 0x362   :  { %v2733_v56 = vsel %vm2701_vm2, %v10411_v17, %v8521_v52  ;;  %v2717_v18 = vsel %vm2701_vm2, %v10245_v1, %v8522_v36  ;;  %v8089_v1 = vpop.f32.mrf.mxu0 }
 0x364   :  { %3018 = vmatmul.mubr.f32.gmra.mxu1 %v2714_v32  ;;  %v2406_v0 = vpop.f32.mrf.mxu0 }
 0x365   :  { %3022 = vmatprep.mubr.f32.mxu1 %v2731_v51 }
 0x368   :  { %3023 = vmatmul.mubr.f32.gmra.mxu1 %v2715_v24 }
 0x369   :  { %3027 = vmatprep.mubr.f32.mxu1 %v2732_v59 }
 0x36c   :  { %3028 = vmatmul.mubr.f32.gmra.mxu1 %v2716_v42 }
 0x36d   :  { %3032 = vmatprep.mubr.f32.mxu1 %v2733_v56 }
 0x36f   :  { %v8445_v58 = vpop.permute.xlu1 %8444 }
 0x370   :  { %v8447_v44 = vunpack.i.h.bf16 %v8445_v58  ;;  %v8446_v35 = vunpack.i.l.bf16 %v8445_v58  ;;  %3033 = vmatmul.mubr.f32.gmra.mxu1 %v2717_v18  ;;  %v12079_v58 = vld [vmem:[#allocation9_spill] sm:$0xff] }
 0x371   :  { %8115 = vmatprep.mubr.msk.f32.mxu1 %vm2701_vm2, %v2366_v46 }
 0x372   :  { %v2734_v20 = vsel %vm2701_vm2, %v10493_v57, %v8447_v44  ;;  %v2750_v40 = vsel %vm2701_vm2, %v10634_v14, %v8446_v35 }
 0x373   :  { %v8450_v17 = vpop.permute.xlu1 %8449  ;;  %3102 = vmatprep.mubr.f32.mxu0 %v2750_v40 }
 0x374   :  { %v8452_v38 = vunpack.i.h.bf16 %v8450_v17  ;;  %v8451_v48 = vunpack.i.l.bf16 %v8450_v17  ;;  %3103 = vmatmul.mubr.f32.vlgmr.msra.gmra.mxu0 %v2734_v20  ;;  %8116 = vmatmul.mubr.msk.f32.vlgmr.msra.gmra.mxu1 %vm2701_vm2, %v8077_v63 }
 0x375   :  { %8118 = vmatprep.mubr.msk.f32.mxu1 %vm2701_vm2, %v2376_v9 }
 0x376   :  { %v2751_v26 = vsel %vm2701_vm2, %v10630_v45, %v8451_v48  ;;  %v2735_v57 = vsel %vm2701_vm2, %v12074_v37, %v8452_v38  ;;  %v8092_v45 = vpop.f32.mrf.mxu0  ;;  %v12081_v37 = vld [vmem:[#allocation11_spill] sm:$0xff] }
 0x377   :  { %3107 = vmatprep.mubr.f32.mxu0 %v2751_v26  ;;  %v8465_v25 = vpop.permute.xlu1 %8464 }
 0x378   :  { %v8467_v14 = vunpack.i.h.bf16 %v8465_v25  ;;  %v8466_v28 = vunpack.i.l.bf16 %v8465_v25  ;;  %3108 = vmatmul.mubr.f32.gmra.mxu0 %v2735_v57  ;;  %8119 = vmatmul.mubr.msk.f32.gmra.mxu1 %vm2701_vm2, %v8080_v11 }
 0x379   :  { %8121 = vmatprep.mubr.msk.f32.mxu1 %vm2701_vm2, %v2386_v61 }
 0x37a   :  { %v2752_v16 = vsel %vm2701_vm2, %v10642_v53, %v8466_v28  ;;  %v2736_v63 = vsel %vm2701_vm2, %v12075_v21, %v8467_v14  ;;  %v2416_v53 = vpop.f32.mrf.mxu0 }
 0x37b   :  { %v8470_v7 = vpop.permute.xlu1 %8469  ;;  %3112 = vmatprep.mubr.f32.mxu0 %v2752_v16  ;;  %v12082_v16 = vld [vmem:[#allocation10_spill] sm:$0xff] }
 0x37c   :  { %v8472_v5 = vunpack.i.h.bf16 %v8470_v7  ;;  %v8471_v29 = vunpack.i.l.bf16 %v8470_v7  ;;  %3113 = vmatmul.mubr.f32.gmra.mxu0 %v2736_v63  ;;  %8122 = vmatmul.mubr.msk.f32.gmra.mxu1 %vm2701_vm2, %v8083_v60  ;;  %v8095_v23 = vpop.f32.mrf.mxu0  ;;  %v12078_v60 = vld [vmem:[#allocation6_spill] sm:$0xff] }
 0x37d   :  { %8124 = vmatprep.mubr.msk.f32.mxu1 %vm2701_vm2, %v2396_v12  ;;  %v12080_v12 = vld [vmem:[#allocation8_spill] sm:$0xff] }
 0x37e   :  { %v2753_v30 = vsel %vm2701_vm2, %v10638_v15, %v8471_v29  ;;  %v2737_v46 = vsel %vm2701_vm2, %v12076_v41, %v8472_v5  ;;  %v2426_v52 = vpop.f32.mrf.mxu0 }
 0x37f   :  { %3117 = vmatprep.mubr.f32.mxu0 %v2753_v30  ;;  %v8485_v11 = vpop.permute.xlu1 %8484 }
 0x380   :  { %v8487_v6 = vunpack.i.h.bf16 %v8485_v11  ;;  %v8486_v32 = vunpack.i.l.bf16 %v8485_v11  ;;  %3118 = vmatmul.mubr.f32.gmra.mxu0 %v2737_v46  ;;  %8125 = vmatmul.mubr.msk.f32.gmra.mxu1 %vm2701_vm2, %v8086_v31  ;;  %v12083_v11 = vld [vmem:[#allocation12_spill] sm:$0xff] }
 0x381   :  { %8127 = vmatprep.mubr.msk.f32.mxu1 %vm2701_vm2, %v2406_v0 }
 0x382   :  { %v2754_v51 = vsel %vm2701_vm2, %v10649_v47, %v8486_v32  ;;  %v2738_v15 = vsel %vm2701_vm2, %v12077_v49, %v8487_v6  ;;  %v8098_v47 = vpop.f32.mrf.mxu0 }
 0x383   :  { %v8490_v9 = vpop.permute.xlu1 %8489  ;;  %3122 = vmatprep.mubr.f32.mxu0 %v2754_v51 }
 0x384   :  { %v8492_v39 = vunpack.i.h.bf16 %v8490_v9  ;;  %v8491_v24 = vunpack.i.l.bf16 %v8490_v9  ;;  %3123 = vmatmul.mubr.f32.gmra.mxu0 %v2738_v15  ;;  %8128 = vmatmul.mubr.msk.f32.gmra.mxu1 %vm2701_vm2, %v8089_v1  ;;  %v8535_v1 = vpop.permute.xlu0 %8534 }
 0x385   :  { %8130 = vmatprep.mubr.msk.f32.mxu1 %vm2701_vm2, %v2416_v53  ;;  %v8537_v63 = vunpack.i.h.bf16 %v8535_v1 }
 0x386   :  { %v2755_v59 = vsel %vm2701_vm2, %v10646_v22, %v8491_v24  ;;  %v2739_v36 = vsel %vm2701_vm2, %v12078_v60, %v8492_v39  ;;  %v2436_v22 = vpop.f32.mrf.mxu0 }
 0x387   :  { %3127 = vmatprep.mubr.f32.mxu0 %v2755_v59  ;;  %v8505_v42 = vpop.permute.xlu1 %8504  ;;  %v2744_v30 = vsel %vm2701_vm2, %v10607_v33, %v8537_v63 }
 0x388   :  { %v8507_v56 = vunpack.i.h.bf16 %v8505_v42  ;;  %v8506_v61 = vunpack.i.l.bf16 %v8505_v42  ;;  %3128 = vmatmul.mubr.f32.gmra.mxu0 %v2739_v36  ;;  %8131 = vmatmul.mubr.msk.f32.gmra.mxu1 %vm2701_vm2, %v8092_v45  ;;  %v8545_v5 = vpop.permute.xlu0 %8544 }
 0x389   :  { %8133 = vmatprep.mubr.msk.f32.mxu1 %vm2701_vm2, %v2426_v52  ;;  %v8546_v41 = vunpack.i.l.bf16 %v8545_v5  ;;  %v8547_v53 = vunpack.i.h.bf16 %v8545_v5  ;;  %v10884_v5 = vld [vmem:[%s12085_s4] ss:$0 sm:$0xff] }
 0x38a   :  { %v2756_v31 = vsel %vm2701_vm2, %v10673_v3, %v8506_v61  ;;  %v2740_v18 = vsel %vm2701_vm2, %v12079_v58, %v8507_v56 }
 0x38b   :  { %v8510_v44 = vpop.permute.xlu1 %8509  ;;  %3132 = vmatprep.mubr.f32.mxu0 %v2756_v31  ;;  %v2746_v33 = vsel %vm2701_vm2, %v10615_v19, %v8547_v53 }
 0x38c   :  { %v8512_v35 = vunpack.i.h.bf16 %v8510_v44  ;;  %v8511_v20 = vunpack.i.l.bf16 %v8510_v44  ;;  %3133 = vmatmul.mubr.f32.gmra.mxu0 %v2740_v18  ;;  %8134 = vmatmul.mubr.msk.f32.gmra.mxu1 %vm2701_vm2, %v8095_v23  ;;  %v8555_v23 = vpop.permute.xlu0 %8554 }
 0x38d   :  { %8136 = vmatprep.mubr.msk.f32.mxu1 %vm2701_vm2, %v2436_v22  ;;  %v8556_v49 = vunpack.i.l.bf16 %v8555_v23  ;;  %v8557_v9 = vunpack.i.h.bf16 %v8555_v23 }
 0x38e   :  { %v2757_v40 = vsel %vm2701_vm2, %v10658_v27, %v8511_v20  ;;  %v2741_v17 = vsel %vm2701_vm2, %v12080_v12, %v8512_v35  ;;  %v8536_v27 = vunpack.i.l.bf16 %v8535_v1 }
 0x38f   :  { %3137 = vmatprep.mubr.f32.mxu0 %v2757_v40  ;;  %v8525_v3 = vpop.permute.xlu1 %8524  ;;  %v2748_v19 = vsel %vm2701_vm2, %v10625_v8, %v8557_v9  ;;  %v6505_v40 = vld [vmem:[%s12084_s10 + $0x80] sm:$0xff] }
 0x390   :  { %v8527_v38 = vunpack.i.h.bf16 %v8525_v3  ;;  %v8526_v48 = vunpack.i.l.bf16 %v8525_v3  ;;  %3138 = vmatmul.mubr.f32.gmra.mxu0 %v2741_v17  ;;  %8137 = vmatmul.mubr.msk.f32.gmra.mxu1 %vm2701_vm2, %v8098_v47 }
 0x391   :  { %8203 = vmatprep.mubr.msk.f32.mxu1 %vm3406_vm3, %v6505_v40 }
 0x392   :  { %v2758_v26 = vsel %vm2701_vm2, %v10697_v13, %v8526_v48  ;;  %v2742_v57 = vsel %vm2701_vm2, %v12081_v37, %v8527_v38  ;;  %v2760_v13 = vsel %vm2701_vm2, %v10709_v54, %v8536_v27  ;;  %v2762_v54 = vsel %vm2701_vm2, %v10721_v43, %v8546_v41 }
 0x393   :  { %v8530_v25 = vpop.permute.xlu1 %8529  ;;  %3142 = vmatprep.mubr.f32.mxu0 %v2758_v26  ;;  %v2764_v43 = vsel %vm2701_vm2, %v10733_v34, %v8556_v49 }
 0x394   :  { %v8532_v14 = vunpack.i.h.bf16 %v8530_v25  ;;  %v8531_v28 = vunpack.i.l.bf16 %v8530_v25  ;;  %3143 = vmatmul.mubr.f32.gmra.mxu0 %v2742_v57 }
 0x396   :  { %v2759_v0 = vsel %vm2701_vm2, %v10685_v50, %v8531_v28  ;;  %v2743_v21 = vsel %vm2701_vm2, %v12082_v16, %v8532_v14 }
 0x397   :  { %3147 = vmatprep.mubr.f32.mxu0 %v2759_v0  ;;  %v8540_v45 = vpop.permute.xlu1 %8539 }
 0x398   :  { %v8541_v7 = vunpack.i.l.bf16 %v8540_v45  ;;  %3148 = vmatmul.mubr.f32.gmra.mxu0 %v2743_v21  ;;  %v8542_v29 = vunpack.i.h.bf16 %v8540_v45 }
 0x399   :  { %3152 = vmatprep.mubr.f32.mxu0 %v2760_v13 }
 0x39a   :  { %v2761_v50 = vsel %vm2701_vm2, %v10703_v2, %v8541_v7  ;;  %v2745_v6 = vsel %vm2701_vm2, %v12083_v11, %v8542_v29 }
 0x39b   :  { %v8550_v46 = vpop.permute.xlu1 %8549 }
 0x39c   :  { %3153 = vmatmul.mubr.f32.gmra.mxu0 %v2744_v30  ;;  %v8551_v32 = vunpack.i.l.bf16 %v8550_v46  ;;  %v8552_v51 = vunpack.i.h.bf16 %v8550_v46 }
 0x39d   :  { %3157 = vmatprep.mubr.f32.mxu0 %v2761_v50 }
 0x39e   :  { %v2763_v2 = vsel %vm2701_vm2, %v10715_v55, %v8551_v32  ;;  %v2747_v39 = vsel %vm2701_vm2, %v10611_v4, %v8552_v51 }
 0x39f   :  { %v8560_v15 = vpop.permute.xlu1 %8559 }
 0x3a0   :  { %3158 = vmatmul.mubr.f32.gmra.mxu0 %v2745_v6  ;;  %v8561_v24 = vunpack.i.l.bf16 %v8560_v15  ;;  %v8562_v52 = vunpack.i.h.bf16 %v8560_v15 }
 0x3a1   :  { %3162 = vmatprep.mubr.f32.mxu0 %v2762_v54 }
 0x3a2   :  { %v2765_v55 = vsel %vm2701_vm2, %v10727_v62, %v8561_v24  ;;  %v2749_v59 = vsel %vm2701_vm2, %v10620_v10, %v8562_v52  ;;  %v3402_v10 = vld [vmem:[%s12084_s10] sm:$0xff] }
 0x3a4   :  { %3163 = vmatmul.mubr.f32.gmra.mxu0 %v2746_v33 }
 0x3a5   :  { %3167 = vmatprep.mubr.f32.mxu0 %v2763_v2 }
 0x3a8   :  { %3168 = vmatmul.mubr.f32.gmra.mxu0 %v2747_v39 }
 0x3a9   :  { %3172 = vmatprep.mubr.f32.mxu0 %v2764_v43 }
 0x3ac   :  { %3173 = vmatmul.mubr.f32.gmra.mxu0 %v2748_v19 }
 0x3ad   :  { %3177 = vmatprep.mubr.f32.mxu0 %v2765_v55 }
 0x3b0   :  { %3178 = vmatmul.mubr.f32.gmra.mxu0 %v2749_v59 }
 0x3b1   :  { %8147 = vmatprep.mubr.msk.f32.mxu0 %vm3406_vm3, %v3402_v10 }
 0x3f4   :  { %v7017_v4 = vpop.f32.mrf.mxu1 }
 0x3f6   :  { %v7018_v60 = vpop.f32.mrf.mxu1 }
 0x3f7   :  { %v7019_v36 = vadd.f32 %v7018_v60, %v7017_v4 }
 0x3f8   :  { %v7020_v47 = vpop.f32.mrf.mxu1 }
 0x3f9   :  { %v2960_v50 = vadd.f32 %v7019_v36, %v10884_v5 }
 0x3fa   :  { %v7021_v42 = vpop.f32.mrf.mxu1 }
 0x3fb   :  { %v7022_v34 = vadd.f32 %v7021_v42, %v7020_v47 }
 0x3fc   :  { %v7023_v56 = vpop.f32.mrf.mxu1 }
 0x3fd   :  { %v2965_v15 = vadd.f32 %v7022_v34, %v10884_v5  ;;  %v10901_v34 = vld [vmem:[%s12009_s8] ss:$0 sm:$0xff] }
 0x3fe   :  { %v7024_v61 = vpop.f32.mrf.mxu1 }
 0x3ff   :  { %v7025_v31 = vadd.f32 %v7024_v61, %v7023_v56 }
 0x400   :  { %v7026_v58 = vpop.f32.mrf.mxu1 }
 0x401   :  { %v2970_v4 = vadd.f32 %v7025_v31, %v10884_v5 }
 0x402   :  { %v7027_v8 = vpop.f32.mrf.mxu1 }
 0x403   :  { %v10837_v18 = vadd.f32 %v7027_v8, %v7026_v58 }
 0x404   :  { %v7029_v22 = vpop.f32.mrf.mxu1 }
 0x406   :  { %v7030_v62 = vpop.f32.mrf.mxu1 }
 0x407   :  { %v7031_v44 = vadd.f32 %v7030_v62, %v7029_v22 }
 0x408   :  { %v7032_v35 = vpop.f32.mrf.mxu1 }
 0x409   :  { %v2980_v60 = vadd.f32 %v7031_v44, %v10884_v5 }
 0x40a   :  { %v7033_v20 = vpop.f32.mrf.mxu1 }
 0x40b   :  { %v7034_v12 = vadd.f32 %v7033_v20, %v7032_v35 }
 0x40c   :  { %v7035_v17 = vpop.f32.mrf.mxu1 }
 0x40d   :  { %v2985_v62 = vadd.f32 %v7034_v12, %v10884_v5 }
 0x40e   :  { %v7036_v3 = vpop.f32.mrf.mxu1 }
 0x40f   :  { %v7037_v35 = vadd.f32 %v7036_v3, %v7035_v17 }
 0x410   :  { %v10847_v38 = vpop.f32.mrf.mxu1 }
 0x411   :  { %v2990_v12 = vadd.f32 %v7037_v35, %v10884_v5 }
 0x412   :  { %v10849_v48 = vpop.f32.mrf.mxu1 }
 0x414   :  { %v10851_v1 = vpop.f32.mrf.mxu1 }
 0x416   :  { %v10853_v26 = vpop.f32.mrf.mxu1 }
 0x418   :  { %v10855_v37 = vpop.f32.mrf.mxu1 }
 0x41a   :  { %v10857_v57 = vpop.f32.mrf.mxu1 }
 0x41c   :  { %v10859_v25 = vpop.f32.mrf.mxu1 }
 0x41e   :  { %v10861_v27 = vpop.f32.mrf.mxu1 }
 0x420   :  { %v10863_v14 = vpop.f32.mrf.mxu1 }
 0x422   :  { %v10865_v28 = vpop.f32.mrf.mxu1 }
 0x424   :  { %v10867_v0 = vpop.f32.mrf.mxu1 }
 0x426   :  { %v10869_v16 = vpop.f32.mrf.mxu1 }
 0x428   :  { %v10871_v21 = vpop.f32.mrf.mxu1 }
 0x42a   :  { %v10873_v63 = vpop.f32.mrf.mxu1 }
 0x42c   :  { %v10875_v45 = vpop.f32.mrf.mxu1 }
 0x42e   :  { %v10877_v7 = vpop.f32.mrf.mxu1 }
 0x430   :  { %v10879_v13 = vpop.f32.mrf.mxu1 }
 0x432   :  { %v10886_v30 = vpop.f32.mrf.mxu1 }
 0x434   :  { %v7097_v29 = vpop.f32.mrf.mxu0  ;;  %v8117_v11 = vpop.f32.mrf.mxu1 }
 0x436   :  { %v7098_v41 = vpop.f32.mrf.mxu0  ;;  %v3249_v54 = vpop.f32.mrf.mxu1 }
 0x437   :  { %v7099_v46 = vadd.f32 %v7098_v41, %v7097_v29  ;;  %v10910_v41 = vld [vmem:[%s12010_s9] ss:$0 sm:$0xff] }
 0x438   :  { %v7100_v53 = vpop.f32.mrf.mxu0  ;;  %v10889_v33 = vpop.f32.mrf.mxu1 }
 0x439   :  { %v3105_v6 = vadd.f32 %v7099_v46, %v2960_v50 }
 0x43a   :  { %v7101_v32 = vpop.f32.mrf.mxu0  ;;  %v3259_v39 = vpop.f32.mrf.mxu1 }
 0x43b   :  { %v7102_v49 = vadd.f32 %v7101_v32, %v7100_v53  ;;  %v3250_v43 = vadd.f32 %v3249_v54, %v3105_v6 }
 0x43c   :  { %v7103_v23 = vpop.f32.mrf.mxu0  ;;  %v8123_v19 = vpop.f32.mrf.mxu1 }
 0x43d   :  { %v3110_v24 = vadd.f32 %v7102_v49, %v2965_v15  ;;  %v3328_v42 = vmax.f32 %v3250_v43, 0.0 }
 0x43e   :  { %v7104_v51 = vpop.f32.mrf.mxu0  ;;  %v3269_v61 = vpop.f32.mrf.mxu1 }
 0x43f   :  { %v7105_v55 = vadd.f32 %v7104_v51, %v7103_v23  ;;  %v3255_v47 = vadd.f32 %v8117_v11, %v3110_v24  ;;  %v3351_v44 = vmul.f32 %v10901_v34, %v3328_v42 }
 0x440   :  { %v10891_v2 = vpop.f32.mrf.mxu0  ;;  %v10905_v29 = vpop.f32.mrf.mxu1 }
 0x441   :  { %v3115_v58 = vadd.f32 %v7105_v55, %v2970_v4  ;;  %v3329_v20 = vmax.f32 %v3255_v47, 0.0  ;;  %v10916_v54 = vadd.f32 %v10910_v41, %v3351_v44 }
 0x442   :  { %v10894_v9 = vpop.f32.mrf.mxu0  ;;  %v3279_v51 = vpop.f32.mrf.mxu1 }
 0x443   :  { %v3260_v50 = vadd.f32 %v3259_v39, %v3115_v58  ;;  %v3352_v32 = vmul.f32 %v10901_v34, %v3329_v20 }
 0x444   :  { %v7109_v52 = vpop.f32.mrf.mxu0 }
 0x445   :  { %v3330_v49 = vmax.f32 %v3260_v50, 0.0  ;;  %v10925_v4 = vadd.f32 %v10910_v41, %v3352_v32 }
 0x446   :  { %v7110_v59 = vpop.f32.mrf.mxu0 }
 0x447   :  { %v7111_v36 = vadd.f32 %v7110_v59, %v7109_v52 }
 0x448   :  { %v7112_v56 = vpop.f32.mrf.mxu0 }
 0x449   :  { %v3125_v8 = vadd.f32 %v7111_v36, %v2980_v60  ;;  %v3353_v60 = vmul.f32 %v10901_v34, %v3330_v49 }
 0x44a   :  { %v7113_v22 = vpop.f32.mrf.mxu0 }
 0x44b   :  { %v7114_v10 = vadd.f32 %v7113_v22, %v7112_v56  ;;  %v3270_v31 = vadd.f32 %v3269_v61, %v3125_v8  ;;  %v10935_v8 = vadd.f32 %v10910_v41, %v3353_v60 }
 0x44c   :  { %v7115_v40 = vpop.f32.mrf.mxu0 }
 0x44d   :  { %v3130_v46 = vadd.f32 %v7114_v10, %v2985_v62  ;;  %v3332_v53 = vmax.f32 %v3270_v31, 0.0  ;;  %v10940_v62 = vpop.f32.mrf.mxu1 }
 0x44e   :  { %v7116_v11 = vpop.f32.mrf.mxu0 }
 0x44f   :  { %v3275_v17 = vadd.f32 %v8123_v19, %v3130_v46  ;;  %v3355_v3 = vmul.f32 %v10901_v34, %v3332_v53  ;;  %v7117_v6 = vadd.f32 %v7116_v11, %v7115_v40  ;;  %v10944_v20 = vpop.f32.mrf.mxu1  ;;  %v7040_v53 = vadd.f32 %v10849_v48, %v10847_v38 }
 0x450   :  { %v7118_v23 = vpop.f32.mrf.mxu0  ;;  %v7108_v38 = vadd.f32 %v10894_v9, %v10891_v2 }
 0x451   :  { %v3333_v15 = vmax.f32 %v3275_v17, 0.0  ;;  %v10919_v39 = vadd.f32 %v10910_v41, %v3355_v3  ;;  %v3135_v24 = vadd.f32 %v7117_v6, %v2990_v12  ;;  %v8132_v50 = vpop.f32.mrf.mxu1  ;;  %v7049_v17 = vadd.f32 %v10861_v27, %v10859_v25 }
 0x452   :  { %v7119_v43 = vpop.f32.mrf.mxu0  ;;  %v7052_v3 = vadd.f32 %v10865_v28, %v10863_v14  ;;  %v7058_v6 = vadd.f32 %v10873_v63, %v10871_v21  ;;  %v7043_v25 = vadd.f32 %v10853_v26, %v10851_v1  ;;  %v7046_v27 = vadd.f32 %v10857_v57, %v10855_v37 }
 0x453   :  { %v3356_v52 = vmul.f32 %v10901_v34, %v3333_v15  ;;  %v3390_v19 = vmax.f32 %v10916_v54, %v10919_v39  ;;  %v3280_v55 = vadd.f32 %v3279_v51, %v3135_v24  ;;  %v3299_v11 = vpop.f32.mrf.mxu1  ;;  %v7120_v32 = vadd.f32 %v7119_v43, %v7118_v23  ;;  %v6506_v54 = vld [vmem:[%s12084_s10 + $0x88] sm:$0xff]  ;;  %v3404_v39 = vld [vmem:[%s12084_s10 + $0x10] sm:$0xff] }
 0x454   :  { %v7121_v59 = vpop.f32.mrf.mxu0  ;;  %v2975_v15 = vadd.f32 %v10837_v18, %v10884_v5  ;;  %v2995_v24 = vadd.f32 %v7040_v53, %v10884_v5  ;;  %v7055_v14 = vadd.f32 %v10869_v16, %v10867_v0  ;;  %v3010_v21 = vadd.f32 %v7049_v17, %v10884_v5 }
 0x455   :  { %v10929_v36 = vadd.f32 %v10910_v41, %v3356_v52  ;;  %v3334_v47 = vmax.f32 %v3280_v55, 0.0  ;;  %v8135_v49 = vpop.f32.mrf.mxu1  ;;  %v3015_v18 = vadd.f32 %v7052_v3, %v10884_v5  ;;  %v3025_v63 = vadd.f32 %v7058_v6, %v10884_v5 }
 0x456   :  { %v7122_v42 = vpop.f32.mrf.mxu0  ;;  %v3140_v23 = vadd.f32 %v7120_v32, %v2995_v24  ;;  %v7061_v43 = vadd.f32 %v10877_v7, %v10875_v45  ;;  %v3120_v37 = vadd.f32 %v7108_v38, %v2975_v15 }
 0x457   :  { %v3391_v56 = vmax.f32 %v10925_v4, %v10929_v36  ;;  %v3357_v61 = vmul.f32 %v10901_v34, %v3334_v47  ;;  %v3309_v9 = vpop.f32.mrf.mxu1  ;;  %v7123_v57 = vadd.f32 %v7122_v42, %v7121_v59  ;;  %v3005_v47 = vadd.f32 %v7046_v27, %v10884_v5  ;;  %v3403_v4 = vld [vmem:[%s12084_s10 + $0x8] sm:$0xff]  ;;  %v6507_v36 = vld [vmem:[%s12084_s10 + $0x90] sm:$0xff] }
 0x458   :  { %v7124_v58 = vpop.f32.mrf.mxu0  ;;  %v3285_v45 = vadd.f32 %v10905_v29, %v3140_v23  ;;  %v3265_v53 = vadd.f32 %v10889_v33, %v3120_v37 }
 0x459   :  { %v10938_v22 = vadd.f32 %v10910_v41, %v3357_v61  ;;  %v8138_v16 = vpop.f32.mrf.mxu1  ;;  %v3020_v61 = vadd.f32 %v7055_v14, %v10884_v5 }
 0x45a   :  { %v7125_v35 = vpop.f32.mrf.mxu0 }
 0x45b   :  { %v3392_v10 = vmax.f32 %v10935_v8, %v10938_v22  ;;  %v7126_v1 = vadd.f32 %v7125_v35, %v7124_v58  ;;  %v3030_v58 = vadd.f32 %v7061_v43, %v10884_v5  ;;  %v3319_v6 = vpop.f32.mrf.mxu1  ;;  %v6481_v22 = vld [vmem:[%s12084_s10 + $0x20] sm:$0xff] }
 0x45c   :  { %v7127_v31 = vpop.f32.mrf.mxu0 }
 0x45d   :  { %v3150_v59 = vadd.f32 %v7126_v1, %v3005_v47 }
 0x45e   :  { %v7128_v44 = vpop.f32.mrf.mxu0 }
 0x45f   :  { %v7129_v48 = vadd.f32 %v7128_v44, %v7127_v31  ;;  %v3295_v29 = vadd.f32 %v10940_v62, %v3150_v59 }
 0x460   :  { %v7130_v40 = vpop.f32.mrf.mxu0 }
 0x461   :  { %v3155_v60 = vadd.f32 %v7129_v48, %v3010_v21 }
 0x462   :  { %v7131_v46 = vpop.f32.mrf.mxu0 }
 0x463   :  { %v7132_v28 = vadd.f32 %v7131_v46, %v7130_v40  ;;  %v3000_v40 = vadd.f32 %v7043_v25, %v10884_v5  ;;  %v7064_v46 = vadd.f32 %v10886_v30, %v10879_v13  ;;  %v3300_v17 = vadd.f32 %v3299_v11, %v3155_v60 }
 0x464   :  { %v7133_v12 = vpop.f32.mrf.mxu0  ;;  %v3335_v13 = vmax.f32 %v3285_v45, 0.0  ;;  %v3331_v25 = vmax.f32 %v3265_v53, 0.0  ;;  %v6521_v53 = vld [vmem:[%s12084_s10 + $0xc0] sm:$0xff] }
 0x465   :  { %v3160_v31 = vadd.f32 %v7132_v28, %v3015_v18  ;;  %v3035_v24 = vadd.f32 %v7064_v46, %v10884_v5  ;;  %v3338_v33 = vmax.f32 %v3300_v17, 0.0  ;;  %v6483_v17 = vld [vmem:[%s12084_s10 + $0x30] sm:$0xff] }
 0x466   :  { %v7134_v51 = vpop.f32.mrf.mxu0  ;;  %v3354_v62 = vmul.f32 %v10901_v34, %v3331_v25  ;;  %v6499_v25 = vld [vmem:[%s12084_s10 + $0x70] sm:$0xff] }
 0x467   :  { %v7135_v26 = vadd.f32 %v7134_v51, %v7133_v12  ;;  %v3145_v12 = vadd.f32 %v7123_v57, %v3000_v40  ;;  %v3305_v32 = vadd.f32 %v8132_v50, %v3160_v31  ;;  %v3358_v50 = vmul.f32 %v10901_v34, %v3335_v13  ;;  %v6537_v13 = vld [vmem:[%s12084_s10 + $0x100] sm:$0xff] }
 0x468   :  { %v7136_v52 = vpop.f32.mrf.mxu0  ;;  %v3377_v60 = vadd.f32 %v10910_v41, %v3354_v62  ;;  %v4415_v62 = vld [vmem:[%s12011_s11 + $0x78] sm:$0xff] }
 0x469   :  { %v3165_v42 = vadd.f32 %v7135_v26, %v3020_v61  ;;  %v3290_v27 = vadd.f32 %v10944_v20, %v3145_v12  ;;  %v3339_v14 = vmax.f32 %v3305_v32, 0.0  ;;  %v3381_v1 = vadd.f32 %v10910_v41, %v3358_v50  ;;  %v6522_v12 = vld [vmem:[%s12084_s10 + $0xc8] sm:$0xff]  ;;  %v6529_v50 = vld [vmem:[%s12084_s10 + $0xe0] sm:$0xff] }
 0x46a   :  { %v7137_v2 = vpop.f32.mrf.mxu0  ;;  %v6490_v32 = vld [vmem:[%s12084_s10 + $0x48] sm:$0xff] }
 0x46b   :  { %v7138_v55 = vadd.f32 %v7137_v2, %v7136_v52  ;;  %v3310_v38 = vadd.f32 %v3309_v9, %v3165_v42  ;;  %v3336_v23 = vmax.f32 %v3290_v27, 0.0  ;;  %v3362_v2 = vmul.f32 %v10901_v34, %v3339_v14  ;;  %v6540_v27 = vld [vmem:[%s12084_s10 + $0x118] sm:$0xff]  ;;  %v6513_v14 = vld [vmem:[%s12084_s10 + $0xa0] sm:$0xff] }
 0x46c   :  { %v7139_v0 = vpop.f32.mrf.mxu0  ;;  %v3361_v9 = vmul.f32 %v10901_v34, %v3338_v33  ;;  %v6500_v33 = vld [vmem:[%s12084_s10 + $0x78] sm:$0xff] }
 0x46d   :  { %v3170_v44 = vadd.f32 %v7138_v55, %v3025_v63  ;;  %v3340_v18 = vmax.f32 %v3310_v38, 0.0  ;;  %v6538_v38 = vld [vmem:[%s12084_s10 + $0x108] sm:$0xff] }
 0x46e   :  { %v7140_v7 = vpop.f32.mrf.mxu0  ;;  %v3384_v47 = vadd.f32 %v10910_v41, %v3361_v9  ;;  %v4429_v9 = vld [vmem:[%s12011_s11 + $0xe8] sm:$0xff] }
 0x46f   :  { %v7141_v35 = vadd.f32 %v7140_v7, %v7139_v0  ;;  %v3315_v51 = vadd.f32 %v8135_v49, %v3170_v44  ;;  %v3337_v49 = vmax.f32 %v3295_v29, 0.0  ;;  %v3363_v55 = vmul.f32 %v10901_v34, %v3340_v18  ;;  %v6497_v29 = vld [vmem:[%s12084_s10 + $0x60] sm:$0xff]  ;;  %v6531_v18 = vld [vmem:[%s12084_s10 + $0xf0] sm:$0xff] }
 0x470   :  { %v7142_v3 = vpop.f32.mrf.mxu0  ;;  %v3359_v0 = vmul.f32 %v10901_v34, %v3336_v23  ;;  %v3393_v44 = vmax.f32 %v3377_v60, %v3381_v1  ;;  %v4430_v23 = vld [vmem:[%s12011_s11 + $0xf0] sm:$0xff]  ;;  %v4412_v1 = vld [vmem:[%s12011_s11 + $0x60] sm:$0xff] }
 0x471   :  { %v3175_v15 = vadd.f32 %v7141_v35, %v3030_v58  ;;  %v3341_v11 = vmax.f32 %v3315_v51, 0.0  ;;  %v3360_v26 = vmul.f32 %v10901_v34, %v3337_v49  ;;  %v3386_v46 = vadd.f32 %v10910_v41, %v3363_v55  ;;  %v6491_v51 = vld [vmem:[%s12084_s10 + $0x50] sm:$0xff]  ;;  %v6530_v49 = vld [vmem:[%s12084_s10 + $0xe8] sm:$0xff]  ;;  %v4427_v55 = vld [vmem:[%s12011_s11 + $0xd8] sm:$0xff] }
 0x472   :  { %v7143_v30 = vpop.f32.mrf.mxu0  ;;  %v3382_v58 = vadd.f32 %v10910_v41, %v3359_v0  ;;  %v4462_v60 = vld [vmem:[%s12011_s11 + $0x1f0] sm:$0xff] }
 0x473   :  { %v7144_v48 = vadd.f32 %v7143_v30, %v7142_v3  ;;  %v3320_v52 = vadd.f32 %v3319_v6, %v3175_v15  ;;  %v3364_v20 = vmul.f32 %v10901_v34, %v3341_v11  ;;  %v3383_v40 = vadd.f32 %v10910_v41, %v3360_v26  ;;  %v6484_v3 = vld [vmem:[%s12084_s10 + $0x38] sm:$0xff]  ;;  %v6489_v6 = vld [vmem:[%s12084_s10 + $0x40] sm:$0xff]  ;;  %v6523_v15 = vld [vmem:[%s12084_s10 + $0xd0] sm:$0xff] }
 0x474   :  { %v6492_v30 = vld [vmem:[%s12084_s10 + $0x58] sm:$0xff]  ;;  %v6514_v11 = vld [vmem:[%s12084_s10 + $0xa8] sm:$0xff]  ;;  %v4446_v0 = vld [vmem:[%s12011_s11 + $0x170] sm:$0xff] }
 0x475   :  { %v3180_v28 = vadd.f32 %v7144_v48, %v3035_v24  ;;  %v3342_v21 = vmax.f32 %v3320_v52, 0.0  ;;  %v3387_v61 = vadd.f32 %v10910_v41, %v3364_v20  ;;  %v6524_v24 = vld [vmem:[%s12084_s10 + $0xd8] sm:$0xff]  ;;  %v6539_v48 = vld [vmem:[%s12084_s10 + $0x110] sm:$0xff]  ;;  %v6498_v52 = vld [vmem:[%s12084_s10 + $0x68] sm:$0xff] }
 0x476   :  { %v4413_v20 = vld [vmem:[%s12011_s11 + $0x68] sm:$0xff]  ;;  %v4463_v26 = vld [vmem:[%s12011_s11 + $0x1f8] sm:$0xff] }
 0x477   :  { %v3325_v5 = vadd.f32 %v8138_v16, %v3180_v28  ;;  %v3365_v63 = vmul.f32 %v10901_v34, %v3342_v21  ;;  %v3385_v16 = vadd.f32 %v10910_v41, %v3362_v2  ;;  %v3395_v59 = vmax.f32 %v3383_v40, %v3387_v61  ;;  %v6515_v28 = vld [vmem:[%s12084_s10 + $0xb0] sm:$0xff]  ;;  %v6516_v21 = vld [vmem:[%s12084_s10 + $0xb8] sm:$0xff]  ;;  %v4425_v40 = vld [vmem:[%s12011_s11 + $0xc8] sm:$0xff] }
 0x478   :  { %v4414_v2 = vld [vmem:[%s12011_s11 + $0x70] sm:$0xff] }
 0x479   :  { %v3343_v43 = vmax.f32 %v3325_v5, 0.0  ;;  %v3388_v57 = vadd.f32 %v10910_v41, %v3365_v63  ;;  %v6532_v5 = vld [vmem:[%s12084_s10 + $0xf8] sm:$0xff]  ;;  %v4410_v61 = vld [vmem:[%s12011_s11 + $0x50] sm:$0xff] }
 0x47a   :  { %v4431_v63 = vld [vmem:[%s12011_s11 + $0xf8] sm:$0xff] }
 0x47b   :  { %v3366_v37 = vmul.f32 %v10901_v34, %v3343_v43  ;;  %v3396_v7 = vmax.f32 %v3384_v47, %v3388_v57  ;;  %v3394_v34 = vmax.f32 %v3382_v58, %v3386_v46  ;;  %v4428_v43 = vld [vmem:[%s12011_s11 + $0xe0] sm:$0xff]  ;;  %v4411_v57 = vld [vmem:[%s12011_s11 + $0x58] sm:$0xff]  ;;  %v4461_v47 = vld [vmem:[%s12011_s11 + $0x1e8] sm:$0xff] }
 0x47c   :  { %v4444_v46 = vld [vmem:[%s12011_s11 + $0x160] sm:$0xff] }
 0x47d   :  { %v3389_v31 = vadd.f32 %v10910_v41, %v3366_v37  ;;  %v11006_v35 = vmax.f32 %v3392_v10, %v3396_v7  ;;  %v11015_v41 = vmax.f32 %v3391_v56, %v3395_v59  ;;  %v11024_v8 = vmax.f32 %v3390_v19, %v3394_v34  ;;  %v3405_v19 = vld [vmem:[%s12084_s10 + $0x18] sm:$0xff]  ;;  %v6482_v10 = vld [vmem:[%s12084_s10 + $0x28] sm:$0xff]  ;;  %v4424_v58 = vld [vmem:[%s12011_s11 + $0xc0] sm:$0xff] }
 0x47e   :  { %v6508_v56 = vld [vmem:[%s12084_s10 + $0x98] sm:$0xff]  ;;  %v4458_v34 = vld [vmem:[%s12011_s11 + $0x1d0] sm:$0xff] }
 0x47f   :  { %v3397_v45 = vmax.f32 %v3385_v16, %v3389_v31  ;;  %v4447_v37 = vld [vmem:[%s12011_s11 + $0x178] sm:$0xff]  ;;  %v4426_v16 = vld [vmem:[%s12011_s11 + $0xd0] sm:$0xff]  ;;  %v4445_v31 = vld [vmem:[%s12011_s11 + $0x168] sm:$0xff] }
 0x480   :  { %v4459_v7 = vld [vmem:[%s12011_s11 + $0x1d8] sm:$0xff] }
 0x481   :  { %v11001_v42 = vmax.f32 %v3393_v44, %v3397_v45  ;;  %v4460_v44 = vld [vmem:[%s12011_s11 + $0x1e0] sm:$0xff]  ;;  %v4409_v45 = vld [vmem:[%s12011_s11 + $0x48] sm:$0xff]  ;;  %v4443_v59 = vld [vmem:[%s12011_s11 + $0x158] sm:$0xff] }
 0x483   :  { %8139 = vmatprep.subr.mxu0 %v11001_v42  ;;  %8195 = vmatprep.subr.mxu1 %v11001_v42 }
 0x484   :  { %8140 = vmatpush3.msra.mxu0 %v11001_v42  ;;  %8196 = vmatpush3.msra.mxu1 %v11001_v42 }
 0x485   :  { %8141 = vmatprep.subr.mxu0 %v11006_v35  ;;  %8197 = vmatprep.subr.mxu1 %v11006_v35 }
 0x486   :  { %8142 = vmatpush3.msra.mxu0 %v11006_v35  ;;  %8198 = vmatpush3.msra.mxu1 %v11006_v35 }
 0x487   :  { %8143 = vmatprep.subr.mxu0 %v11015_v41  ;;  %8199 = vmatprep.subr.mxu1 %v11015_v41 }
 0x488   :  { %8144 = vmatpush3.msra.mxu0 %v11015_v41  ;;  %8200 = vmatpush3.msra.mxu1 %v11015_v41 }
 0x489   :  { %8145 = vmatprep.subr.mxu0 %v11024_v8  ;;  %8201 = vmatprep.subr.mxu1 %v11024_v8 }
 0x48a   :  { %8146 = vmatpush3.msra.mxu0 %v11024_v8  ;;  %8202 = vmatpush3.msra.mxu1 %v11024_v8 }
 0x48b   :  { %8148 = vmatmul.mubr.msk.f32.vlgmr.msra.gmra.mxu0 %vm3406_vm3, %v3403_v4  ;;  %8153 = vmatprep.subr.mxu0 %v11001_v42  ;;  %v4422_v4 = vld [vmem:[%s12011_s11 + $0xb0] sm:$0xff] }
 0x48c   :  { %8223 = vmatprep.subr.mxu1 %v11001_v42  ;;  %8154 = vmatpush3.msra.mxu0 %v11001_v42 }
 0x48d   :  { %8204 = vmatmul.mubr.msk.f32.vlgmr.msra.gmra.mxu1 %vm3406_vm3, %v6506_v54  ;;  %8155 = vmatprep.subr.mxu0 %v11006_v35  ;;  %v4406_v54 = vld [vmem:[%s12011_s11 + $0x30] sm:$0xff] }
 0x48e   :  { %8224 = vmatpush3.msra.mxu1 %v11001_v42  ;;  %8150 = vmatprep.mubr.msk.f32.mxu0 %vm3406_vm3, %v3404_v39  ;;  %v4421_v39 = vld [vmem:[%s12011_s11 + $0xa8] sm:$0xff] }
 0x48f   :  { %8225 = vmatprep.subr.mxu1 %v11006_v35  ;;  %8156 = vmatpush3.msra.mxu0 %v11006_v35 }
 0x490   :  { %8226 = vmatpush3.msra.mxu1 %v11006_v35  ;;  %8151 = vmatmul.mubr.msk.f32.gmra.mxu0 %vm3406_vm3, %v3405_v19  ;;  %v4405_v19 = vld [vmem:[%s12011_s11 + $0x28] sm:$0xff] }
 0x491   :  { %8157 = vmatprep.subr.mxu0 %v11015_v41  ;;  %8206 = vmatprep.mubr.msk.f32.mxu1 %vm3406_vm3, %v6507_v36  ;;  %v4420_v36 = vld [vmem:[%s12011_s11 + $0xa0] sm:$0xff] }
 0x492   :  { %8227 = vmatprep.subr.mxu1 %v11015_v41  ;;  %8158 = vmatpush3.msra.mxu0 %v11015_v41 }
 0x493   :  { %8207 = vmatmul.mubr.msk.f32.gmra.mxu1 %vm3406_vm3, %v6508_v56  ;;  %8159 = vmatprep.subr.mxu0 %v11024_v8  ;;  %v4404_v56 = vld [vmem:[%s12011_s11 + $0x20] sm:$0xff] }
 0x494   :  { %8228 = vmatpush3.msra.mxu1 %v11015_v41  ;;  %8160 = vmatpush3.msra.mxu0 %v11024_v8 }
 0x495   :  { %8229 = vmatprep.subr.mxu1 %v11024_v8  ;;  %8161 = vmatprep.mubr.msk.f32.mxu0 %vm3406_vm3, %v6481_v22  ;;  %v4419_v22 = vld [vmem:[%s12011_s11 + $0x98] sm:$0xff] }
 0x496   :  { %8230 = vmatpush3.msra.mxu1 %v11024_v8  ;;  %8162 = vmatmul.mubr.msk.f32.vlgmr.msra.gmra.mxu0 %vm3406_vm3, %v6482_v10  ;;  %v4403_v10 = vld [vmem:[%s12011_s11 + $0x18] sm:$0xff] }
 0x497   :  { %8167 = vmatprep.subr.mxu0 %v11001_v42  ;;  %8231 = vmatprep.mubr.msk.f32.mxu1 %vm3406_vm3, %v6521_v53  ;;  %v4418_v53 = vld [vmem:[%s12011_s11 + $0x90] sm:$0xff] }
 0x498   :  { %8251 = vmatprep.subr.mxu1 %v11001_v42  ;;  %8168 = vmatpush3.msra.mxu0 %v11001_v42 }
 0x499   :  { %8232 = vmatmul.mubr.msk.f32.vlgmr.msra.gmra.mxu1 %vm3406_vm3, %v6522_v12  ;;  %8169 = vmatprep.subr.mxu0 %v11006_v35  ;;  %v4402_v12 = vld [vmem:[%s12011_s11 + $0x10] sm:$0xff] }
 0x49a   :  { %8252 = vmatpush3.msra.mxu1 %v11001_v42  ;;  %8164 = vmatprep.mubr.msk.f32.mxu0 %vm3406_vm3, %v6483_v17 }
 0x49b   :  { %8253 = vmatprep.subr.mxu1 %v11006_v35  ;;  %8170 = vmatpush3.msra.mxu0 %v11006_v35 }
 0x49c   :  { %8254 = vmatpush3.msra.mxu1 %v11006_v35  ;;  %8165 = vmatmul.mubr.msk.f32.gmra.mxu0 %vm3406_vm3, %v6484_v3 }
 0x49d   :  { %8171 = vmatprep.subr.mxu0 %v11015_v41  ;;  %8255 = vmatprep.subr.mxu1 %v11015_v41 }
 0x49e   :  { %8172 = vmatpush3.msra.mxu0 %v11015_v41  ;;  %8256 = vmatpush3.msra.mxu1 %v11015_v41 }
 0x49f   :  { %8173 = vmatprep.subr.mxu0 %v11024_v8  ;;  %8257 = vmatprep.subr.mxu1 %v11024_v8 }
 0x4a0   :  { %8174 = vmatpush3.msra.mxu0 %v11024_v8  ;;  %8175 = vmatprep.mubr.msk.f32.mxu0 %vm3406_vm3, %v6489_v6 }
 0x4a1   :  { %8258 = vmatpush3.msra.mxu1 %v11024_v8  ;;  %8176 = vmatmul.mubr.msk.f32.vlgmr.msra.gmra.mxu0 %vm3406_vm3, %v6490_v32 }
 0x4a2   :  { %8181 = vmatprep.subr.mxu0 %v11001_v42  ;;  %8178 = vmatprep.mubr.msk.f32.mxu0 %vm3406_vm3, %v6491_v51 }
 0x4a3   :  { %8182 = vmatpush3.msra.mxu0 %v11001_v42  ;;  %8234 = vmatprep.mubr.msk.f32.mxu1 %vm3406_vm3, %v6523_v15 }
 0x4a4   :  { %8183 = vmatprep.subr.mxu0 %v11006_v35  ;;  %8235 = vmatmul.mubr.msk.f32.gmra.mxu1 %vm3406_vm3, %v6524_v24 }
 0x4a5   :  { %8184 = vmatpush3.msra.mxu0 %v11006_v35  ;;  %8259 = vmatprep.mubr.msk.f32.mxu1 %vm3406_vm3, %v6537_v13 }
 0x4a6   :  { %8179 = vmatmul.mubr.msk.f32.gmra.mxu0 %vm3406_vm3, %v6492_v30  ;;  %8185 = vmatprep.subr.mxu0 %v11015_v41 }
 0x4a7   :  { %8186 = vmatpush3.msra.mxu0 %v11015_v41  ;;  %8189 = vmatprep.mubr.msk.f32.mxu0 %vm3406_vm3, %v6497_v29  ;;  %v4417_v29 = vld [vmem:[%s12011_s11 + $0x88] sm:$0xff] }
 0x4a8   :  { %8187 = vmatprep.subr.mxu0 %v11024_v8  ;;  %8260 = vmatmul.mubr.msk.f32.vlgmr.msra.gmra.mxu1 %vm3406_vm3, %v6538_v38  ;;  %v4457_v38 = vld [vmem:[%s12011_s11 + $0x1c8] sm:$0xff] }
 0x4a9   :  { %8188 = vmatpush3.msra.mxu0 %v11024_v8  ;;  %8262 = vmatprep.mubr.msk.f32.mxu1 %vm3406_vm3, %v6539_v48  ;;  %v4401_v48 = vld [vmem:[%s12011_s11 + $0x8] sm:$0xff] }
 0x4aa   :  { %8190 = vmatmul.mubr.msk.f32.vlgmr.msra.gmra.mxu0 %vm3406_vm3, %v6498_v52  ;;  %8209 = vmatprep.subr.mxu0 %v11001_v42  ;;  %v4441_v52 = vld [vmem:[%s12011_s11 + $0x148] sm:$0xff] }
 0x4ab   :  { %8210 = vmatpush3.msra.mxu0 %v11001_v42  ;;  %8192 = vmatprep.mubr.msk.f32.mxu0 %vm3406_vm3, %v6499_v25 }
 0x4ac   :  { %8211 = vmatprep.subr.mxu0 %v11006_v35  ;;  %8263 = vmatmul.mubr.msk.f32.gmra.mxu1 %vm3406_vm3, %v6540_v27  ;;  %v4416_v27 = vld [vmem:[%s12011_s11 + $0x80] sm:$0xff] }
 0x4ad   :  { %8212 = vmatpush3.msra.mxu0 %v11006_v35  ;;  %7285 = vmatprep.subr.mxu1 %v4463_v26 }
 0x4ae   :  { %8193 = vmatmul.mubr.msk.f32.gmra.mxu0 %vm3406_vm3, %v6500_v33  ;;  %8213 = vmatprep.subr.mxu0 %v11015_v41  ;;  %v4456_v33 = vld [vmem:[%s12011_s11 + $0x1c0] sm:$0xff] }
 0x4af   :  { %8214 = vmatpush3.msra.mxu0 %v11015_v41  ;;  %8217 = vmatprep.mubr.msk.f32.mxu0 %vm3406_vm3, %v6513_v14  ;;  %v4400_v14 = vld [vmem:[%s12011_s11] sm:$0xff] }
 0x4b0   :  { %8215 = vmatprep.subr.mxu0 %v11024_v8  ;;  %7286 = vmatpush3.msra.mxu1 %v4447_v37  ;;  %v4450_v37 = vld [vmem:[%s12011_s11 + $0x190] sm:$0xff] }
 0x4b1   :  { %8216 = vmatpush3.msra.mxu0 %v11024_v8  ;;  %7287 = vmatprep.subr.mxu1 %v4462_v60 }
 0x4b2   :  { %8218 = vmatmul.mubr.msk.f32.vlgmr.msra.gmra.mxu0 %vm3406_vm3, %v6514_v11  ;;  %8237 = vmatprep.subr.mxu0 %v11001_v42  ;;  %v4440_v11 = vld [vmem:[%s12011_s11 + $0x140] sm:$0xff] }
 0x4b3   :  { %8238 = vmatpush3.msra.mxu0 %v11001_v42  ;;  %8220 = vmatprep.mubr.msk.f32.mxu0 %vm3406_vm3, %v6515_v28  ;;  %v4408_v42 = vld [vmem:[%s12011_s11 + $0x40] sm:$0xff]  ;;  %v4455_v28 = vld [vmem:[%s12011_s11 + $0x1b8] sm:$0xff] }
 0x4b4   :  { %8239 = vmatprep.subr.mxu0 %v11006_v35  ;;  %7288 = vmatpush3.msra.mxu1 %v4446_v0  ;;  %v4449_v0 = vld [vmem:[%s12011_s11 + $0x188] sm:$0xff] }
 0x4b5   :  { %8240 = vmatpush3.msra.mxu0 %v11006_v35  ;;  %7289 = vmatprep.subr.mxu1 %v4461_v47  ;;  %v4423_v35 = vld [vmem:[%s12011_s11 + $0xb8] sm:$0xff] }
 0x4b6   :  { %8221 = vmatmul.mubr.msk.f32.gmra.mxu0 %vm3406_vm3, %v6516_v21  ;;  %8241 = vmatprep.subr.mxu0 %v11015_v41 }
 0x4b7   :  { %8242 = vmatpush3.msra.mxu0 %v11015_v41  ;;  %8245 = vmatprep.mubr.msk.f32.mxu0 %vm3406_vm3, %v6529_v50  ;;  %v4442_v41 = vld [vmem:[%s12011_s11 + $0x150] sm:$0xff]  ;;  %v4439_v50 = vld [vmem:[%s12011_s11 + $0x138] sm:$0xff] }
 0x4b8   :  { %8243 = vmatprep.subr.mxu0 %v11024_v8  ;;  %7290 = vmatpush3.msra.mxu1 %v4445_v31  ;;  %v4448_v31 = vld [vmem:[%s12011_s11 + $0x180] sm:$0xff] }
 0x4b9   :  { %8244 = vmatpush3.msra.mxu0 %v11024_v8  ;;  %7291 = vmatprep.subr.mxu1 %v4460_v44  ;;  %v4407_v8 = vld [vmem:[%s12011_s11 + $0x38] sm:$0xff]  ;;  %v4432_v44 = vld [vmem:[%s12011_s11 + $0x100] sm:$0xff] }
 0x4ba   :  { %8246 = vmatmul.mubr.msk.f32.vlgmr.msra.gmra.mxu0 %vm3406_vm3, %v6530_v49  ;;  %7241 = vmatprep.subr.mxu0 %v4431_v63  ;;  %v4454_v49 = vld [vmem:[%s12011_s11 + $0x1b0] sm:$0xff]  ;;  %v4453_v63 = vld [vmem:[%s12011_s11 + $0x1a8] sm:$0xff] }
 0x4bb   :  { %8248 = vmatprep.mubr.msk.f32.mxu0 %vm3406_vm3, %v6531_v18  ;;  %7242 = vmatpush3.msra.mxu0 %v4415_v62  ;;  %v4438_v18 = vld [vmem:[%s12011_s11 + $0x130] sm:$0xff] }
 0x4bc   :  { %7243 = vmatprep.subr.mxu0 %v4430_v23  ;;  %7292 = vmatpush3.msra.mxu1 %v4444_v46  ;;  %v4437_v23 = vld [vmem:[%s12011_s11 + $0x128] sm:$0xff] }
 0x4bd   :  { %7244 = vmatpush3.msra.mxu0 %v4414_v2  ;;  %7293 = vmatprep.subr.mxu1 %v4459_v7  ;;  %v4452_v2 = vld [vmem:[%s12011_s11 + $0x1a0] sm:$0xff] }
 0x4be   :  { %8249 = vmatmul.mubr.msk.f32.gmra.mxu0 %vm3406_vm3, %v6532_v5  ;;  %7245 = vmatprep.subr.mxu0 %v4429_v9 }
 0x4bf   :  { %7246 = vmatpush3.msra.mxu0 %v4413_v20  ;;  %7294 = vmatpush3.msra.mxu1 %v4443_v59  ;;  %v4436_v20 = vld [vmem:[%s12011_s11 + $0x120] sm:$0xff] }
 0x4c0   :  { %7247 = vmatprep.subr.mxu0 %v4428_v43  ;;  %7295 = vmatprep.subr.mxu1 %v4458_v34 }
 0x4c1   :  { %7248 = vmatpush3.msra.mxu0 %v4412_v1  ;;  %7296 = vmatpush3.msra.mxu1 %v4442_v41  ;;  %v4451_v1 = vld [vmem:[%s12011_s11 + $0x198] sm:$0xff] }
 0x4c2   :  { %7249 = vmatprep.subr.mxu0 %v4427_v55  ;;  %7297 = vmatprep.subr.mxu1 %v4457_v38  ;;  %v4435_v55 = vld [vmem:[%s12011_s11 + $0x118] sm:$0xff] }
 0x4c3   :  { %7250 = vmatpush3.msra.mxu0 %v4411_v57  ;;  %7298 = vmatpush3.msra.mxu1 %v4441_v52  ;;  %v4434_v57 = vld [vmem:[%s12011_s11 + $0x110] sm:$0xff]  ;;  %v4467_v52 = vld [vmem:[%s12011_s11 + $0x218] sm:$0xff] }
 0x4c4   :  { %7251 = vmatprep.subr.mxu0 %v4426_v16  ;;  %7299 = vmatprep.subr.mxu1 %v4456_v33  ;;  %v4471_v16 = vld [vmem:[%s12011_s11 + $0x238] sm:$0xff]  ;;  %v4465_v33 = vld [vmem:[%s12011_s11 + $0x208] sm:$0xff] }
 0x4c5   :  { %7252 = vmatpush3.msra.mxu0 %v4410_v61  ;;  %7300 = vmatpush3.msra.mxu1 %v4440_v11  ;;  %v4433_v61 = vld [vmem:[%s12011_s11 + $0x108] sm:$0xff] }
 0x4c6   :  { %7253 = vmatprep.subr.mxu0 %v4425_v40  ;;  %7301 = vmatprep.subr.mxu1 %v4455_v28 }
 0x4c7   :  { %7254 = vmatpush3.msra.mxu0 %v4409_v45  ;;  %7302 = vmatpush3.msra.mxu1 %v4439_v50 }
 0x4c8   :  { %7255 = vmatprep.subr.mxu0 %v4424_v58  ;;  %7303 = vmatprep.subr.mxu1 %v4454_v49 }
 0x4c9   :  { %7256 = vmatpush3.msra.mxu0 %v4408_v42  ;;  %7304 = vmatpush3.msra.mxu1 %v4438_v18  ;;  %v4464_v18 = vld [vmem:[%s12011_s11 + $0x200] sm:$0xff] }
 0x4ca   :  { %7257 = vmatprep.subr.mxu0 %v4423_v35  ;;  %7305 = vmatprep.subr.mxu1 %v4453_v63 }
 0x4cb   :  { %7258 = vmatpush3.msra.mxu0 %v4407_v8  ;;  %7306 = vmatpush3.msra.mxu1 %v4437_v23 }
 0x4cc   :  { %7259 = vmatprep.subr.mxu0 %v4422_v4  ;;  %7307 = vmatprep.subr.mxu1 %v4452_v2 }
 0x4cd   :  { %7260 = vmatpush3.msra.mxu0 %v4406_v54  ;;  %7308 = vmatpush3.msra.mxu1 %v4436_v20 }
 0x4ce   :  { %7261 = vmatprep.subr.mxu0 %v4421_v39  ;;  %7309 = vmatprep.subr.mxu1 %v4451_v1 }
 0x4cf   :  { %7262 = vmatpush3.msra.mxu0 %v4405_v19  ;;  %7310 = vmatpush3.msra.mxu1 %v4435_v55 }
 0x4d0   :  { %7263 = vmatprep.subr.mxu0 %v4420_v36  ;;  %7311 = vmatprep.subr.mxu1 %v4450_v37 }
 0x4d1   :  { %7264 = vmatpush3.msra.mxu0 %v4404_v56  ;;  %7312 = vmatpush3.msra.mxu1 %v4434_v57 }
 0x4d2   :  { %7265 = vmatprep.subr.mxu0 %v4419_v22  ;;  %7313 = vmatprep.subr.mxu1 %v4449_v0 }
 0x4d3   :  { %7266 = vmatpush3.msra.mxu0 %v4403_v10  ;;  %7314 = vmatpush3.msra.mxu1 %v4433_v61 }
 0x4d4   :  { %7267 = vmatprep.subr.mxu0 %v4418_v53  ;;  %7315 = vmatprep.subr.mxu1 %v4448_v31 }
 0x4d5   :  { %7268 = vmatpush3.msra.mxu0 %v4402_v12  ;;  %7316 = vmatpush3.msra.mxu1 %v4432_v44 }
 0x4d6   :  { %7269 = vmatprep.subr.mxu0 %v4417_v29  ;;  %v4469_v29 = vld [vmem:[%s12011_s11 + $0x228] sm:$0xff] }
 0x4d7   :  { %7270 = vmatpush3.msra.mxu0 %v4401_v48 }
 0x4d8   :  { %7271 = vmatprep.subr.mxu0 %v4416_v27  ;;  %v4466_v27 = vld [vmem:[%s12011_s11 + $0x210] sm:$0xff] }
 0x4d9   :  { %7272 = vmatpush3.msra.mxu0 %v4400_v14 }
 0x4da   :  { %8265 = vmatprep.subr.mxu0 %v4471_v16 }
 0x54b   :  { %v11346_v17 = vpop.f32.mrf.mxu0 }
 0x54d   :  { %v11348_v3 = vpop.f32.mrf.mxu0  ;;  %v11454_v19 = vpop.f32.mrf.mxu1 }
 0x54f   :  { %v3893_v36 = vpop.f32.mrf.mxu1 }
 0x550   :  { %v11350_v6 = vpop.f32.mrf.mxu0 }
 0x552   :  { %v11352_v32 = vpop.f32.mrf.mxu0 }
 0x553   :  { %v11456_v56 = vpop.f32.mrf.mxu1 }
 0x555   :  { %v11458_v12 = vpop.f32.mrf.mxu1 }
 0x556   :  { %v11354_v51 = vpop.f32.mrf.mxu0 }
 0x558   :  { %v3587_v15 = vpop.f32.mrf.mxu0 }
 0x55c   :  { %v11356_v24 = vpop.f32.mrf.mxu0 }
 0x55e   :  { %v11358_v13 = vpop.f32.mrf.mxu0 }
 0x561   :  { %v11360_v30 = vpop.f32.mrf.mxu0 }
 0x563   :  { %v11374_v25 = vpop.f32.mrf.mxu0 }
 0x566   :  { %v11391_v21 = vpop.f32.mrf.mxu0 }
 0x568   :  { %v11402_v5 = vpop.f32.mrf.mxu0 }
 0x56a   :  { %v8191_v62 = vpop.f32.mrf.mxu0 }
 0x56c   :  { %v3791_v9 = vpop.f32.mrf.mxu0 }
 0x56d   :  { %v8563_v43 = vpack.i.bf16 %v3587_v15, %v3791_v9 }
 0x56e   :  { %v8194_v26 = vpop.f32.mrf.mxu0 }
 0x56f   :  { %8564 = vrot.lane.b32.xlu0 %v8563_v43, %s8643_s6 }
 0x570   :  { %v3801_v60 = vpop.f32.mrf.mxu0 }
 0x572   :  { %v8219_v47 = vpop.f32.mrf.mxu0 }
 0x573   :  { %v8583_v58 = vpack.i.bf16 %v8219_v47, %v11358_v13  ;;  %v8233_v13 = vpop.f32.mrf.mxu1 }
 0x574   :  { %v3995_v40 = vpop.f32.mrf.mxu0 }
 0x575   :  { %v8568_v46 = vpack.i.bf16 %v3995_v40, %v11354_v51  ;;  %v4097_v48 = vpop.f32.mrf.mxu1 }
 0x576   :  { %v8222_v45 = vpop.f32.mrf.mxu0 }
 0x577   :  { %8569 = vrot.lane.b32.xlu0 %v8568_v46, %s8643_s6 }
 0x578   :  { %v4005_v7 = vpop.f32.mrf.mxu0 }
 0x579   :  { %v8588_v34 = vpack.i.bf16 %v4005_v7, %v11356_v24  ;;  %v4470_v24 = vld [vmem:[%s12011_s11 + $0x230] sm:$0xff] }
 0x57a   :  { %v8247_v59 = vpop.f32.mrf.mxu0 }
 0x57b   :  { %8584 = vrot.lane.b32.xlu0 %v8583_v58, %s8643_s6  ;;  %v8578_v8 = vpack.i.bf16 %v8247_v59, %v3801_v60 }
 0x57c   :  { %v4199_v42 = vpop.f32.mrf.mxu0 }
 0x57d   :  { %v8573_v35 = vpack.i.bf16 %v4199_v42, %v8191_v62 }
 0x57e   :  { %v8250_v41 = vpop.f32.mrf.mxu0 }
 0x57f   :  { %8589 = vrot.lane.b32.xlu0 %v8588_v34, %s8643_s6  ;;  %8574 = vrot.lane.b32.xlu1 %v8573_v35, %s8643_s6  ;;  %v8598_v39 = vpack.i.bf16 %v8222_v45, %v8250_v41 }
 0x580   :  { %v4209_v4 = vpop.f32.mrf.mxu0 }
 0x581   :  { %v8593_v54 = vpack.i.bf16 %v4209_v4, %v8194_v26 }
 0x583   :  { %8579 = vrot.lane.b32.xlu1 %v8578_v8, %s8643_s6  ;;  %v6556_v8 = vld [vmem:[%s12012_s15 + $0x20] sm:$0xff] }
 0x587   :  { %8594 = vrot.lane.b32.xlu1 %v8593_v54, %s8643_s6 }
 0x58b   :  { %8599 = vrot.lane.b32.xlu1 %v8598_v39, %s8643_s6 }
 0x5e1   :  { %v8565_v22 = vpop.permute.xlu0 %8564 }
 0x5e2   :  { %v8567_v10 = vunpack.i.h.bf16 %v8565_v22  ;;  %v8566_v53 = vunpack.i.l.bf16 %v8565_v22 }
 0x5e4   :  { %v4384_v51 = vsel %vm2701_vm2, %v11348_v3, %v8567_v10  ;;  %v4388_v15 = vsel %vm2701_vm2, %v11374_v25, %v8566_v53  ;;  %v4468_v3 = vld [vmem:[%s12011_s11 + $0x220] sm:$0xff]  ;;  %v11476_v25 = vpop.f32.mrf.mxu1 }
 0x5e5   :  { %4555 = vmatprep.mubr.f32.mxu0 %v4388_v15 }
 0x5e6   :  { %4556 = vmatmul.mubr.f32.vlgmr.msra.gmra.mxu0 %v4384_v51  ;;  %v4107_v11 = vpop.f32.mrf.mxu1 }
 0x5e7   :  { %8266 = vmatpush3.msra.mxu0 %v4471_v16 }
 0x5e8   :  { %8267 = vmatprep.subr.mxu0 %v4470_v24  ;;  %v8261_v9 = vpop.f32.mrf.mxu1 }
 0x5e9   :  { %8268 = vmatpush3.msra.mxu0 %v4470_v24  ;;  %v8570_v38 = vpop.permute.xlu0 %8569 }
 0x5ea   :  { %8269 = vmatprep.subr.mxu0 %v4469_v29  ;;  %v8572_v28 = vunpack.i.h.bf16 %v8570_v38  ;;  %v8571_v50 = vunpack.i.l.bf16 %v8570_v38  ;;  %v4301_v16 = vpop.f32.mrf.mxu1 }
 0x5eb   :  { %8270 = vmatpush3.msra.mxu0 %v4469_v29 }
 0x5ec   :  { %8271 = vmatprep.subr.mxu0 %v4468_v3  ;;  %v4392_v20 = vsel %vm2701_vm2, %v3893_v36, %v8572_v28  ;;  %v4385_v55 = vsel %vm2701_vm2, %v11346_v17, %v8571_v50  ;;  %v8264_v7 = vpop.f32.mrf.mxu1 }
 0x5ed   :  { %8272 = vmatpush3.msra.mxu0 %v4468_v3  ;;  %v8585_v14 = vpop.permute.xlu0 %8584 }
 0x5ee   :  { %8273 = vmatprep.subr.mxu0 %v4467_v52  ;;  %v8587_v43 = vunpack.i.h.bf16 %v8585_v14  ;;  %v8586_v1 = vunpack.i.l.bf16 %v8585_v14  ;;  %v4311_v41 = vpop.f32.mrf.mxu1 }
 0x5ef   :  { %8274 = vmatpush3.msra.mxu0 %v4467_v52 }
 0x5f0   :  { %8275 = vmatprep.subr.mxu0 %v4466_v27  ;;  %v4386_v17 = vsel %vm2701_vm2, %v11352_v32, %v8586_v1  ;;  %v4393_v44 = vsel %vm2701_vm2, %v11454_v19, %v8587_v43 }
 0x5f1   :  { %v8575_v49 = vpop.permute.xlu1 %8574  ;;  %8276 = vmatpush3.msra.mxu0 %v4466_v27  ;;  %v8590_v37 = vpop.permute.xlu0 %8589 }
 0x5f2   :  { %v8577_v63 = vunpack.i.h.bf16 %v8575_v49  ;;  %v8576_v62 = vunpack.i.l.bf16 %v8575_v49  ;;  %8277 = vmatprep.subr.mxu0 %v4465_v33  ;;  %v8592_v47 = vunpack.i.h.bf16 %v8590_v37  ;;  %v8591_v61 = vunpack.i.l.bf16 %v8590_v37 }
 0x5f3   :  { %8278 = vmatpush3.msra.mxu0 %v4465_v33 }
 0x5f4   :  { %v4389_v23 = vsel %vm2701_vm2, %v11360_v30, %v8576_v62  ;;  %v4396_v2 = vsel %vm2701_vm2, %v4097_v48, %v8577_v63  ;;  %8279 = vmatprep.subr.mxu0 %v4464_v18  ;;  %v4387_v59 = vsel %vm2701_vm2, %v11350_v6, %v8591_v61  ;;  %v4394_v32 = vsel %vm2701_vm2, %v11458_v12, %v8592_v47  ;;  %v4775_v6 = vld [vmem:[%s12012_s15] sm:$0xff] }
 0x5f5   :  { %v8580_v26 = vpop.permute.xlu1 %8579  ;;  %4560 = vmatprep.mubr.f32.mxu0 %v4389_v23  ;;  %4640 = vmatprep.mubr.f32.mxu1 %v4396_v2 }
 0x5f6   :  { %v8582_v57 = vunpack.i.h.bf16 %v8580_v26  ;;  %v8581_v60 = vunpack.i.l.bf16 %v8580_v26  ;;  %4561 = vmatmul.mubr.f32.gmra.mxu0 %v4385_v55  ;;  %4641 = vmatmul.mubr.f32.vlgmr.msra.gmra.mxu1 %v4392_v20 }
 0x5f7   :  { %8280 = vmatpush3.msra.mxu0 %v4464_v18 }
 0x5f8   :  { %v4390_v30 = vsel %vm2701_vm2, %v11402_v5, %v8581_v60  ;;  %v4397_v0 = vsel %vm2701_vm2, %v8233_v13, %v8582_v57  ;;  %v6545_v13 = vld [vmem:[%s12013_s12] ss:$0 sm:$0xff] }
 0x5f9   :  { %4565 = vmatprep.mubr.f32.mxu0 %v4390_v30  ;;  %4645 = vmatprep.mubr.f32.mxu1 %v4397_v0  ;;  %v8595_v31 = vpop.permute.xlu1 %8594  ;;  %v6550_v60 = vld [vmem:[%s12014_s13] ss:$0 sm:$0xff] }
 0x5fa   :  { %v8597_v40 = vunpack.i.h.bf16 %v8595_v31  ;;  %v8596_v46 = vunpack.i.l.bf16 %v8595_v31  ;;  %4566 = vmatmul.mubr.f32.gmra.mxu0 %v4386_v17  ;;  %4646 = vmatmul.mubr.f32.gmra.mxu1 %v4393_v44  ;;  %v6551_v44 = vld [vmem:[%s12015_s14] ss:$0 sm:$0xff] }
 0x5fc   :  { %v4391_v5 = vsel %vm2701_vm2, %v11391_v21, %v8596_v46  ;;  %v4398_v45 = vsel %vm2701_vm2, %v4107_v11, %v8597_v40 }
 0x5fd   :  { %v8600_v58 = vpop.permute.xlu1 %8599  ;;  %4570 = vmatprep.mubr.f32.mxu0 %v4391_v5  ;;  %4650 = vmatprep.mubr.f32.mxu1 %v4398_v45 }
 0x5fe   :  { %v8602_v42 = vunpack.i.h.bf16 %v8600_v58  ;;  %v8601_v34 = vunpack.i.l.bf16 %v8600_v58  ;;  %4571 = vmatmul.mubr.f32.gmra.mxu0 %v4387_v59  ;;  %4651 = vmatmul.mubr.f32.gmra.mxu1 %v4394_v32 }
 0x5ff   :  { %8281 = vmatprep.mubr.msk.f32.mxu0 %vm2701_vm2, %v4301_v16 }
 0x600   :  { %v4399_v21 = vsel %vm2701_vm2, %v11476_v25, %v8601_v34  ;;  %v4395_v35 = vsel %vm2701_vm2, %v11456_v56, %v8602_v42  ;;  %v4776_v34 = vld [vmem:[%s12012_s15 + $0x8] sm:$0xff] }
 0x601   :  { %4655 = vmatprep.mubr.f32.mxu1 %v4399_v21  ;;  %v6557_v21 = vld [vmem:[%s12012_s15 + $0x28] sm:$0xff] }
 0x602   :  { %4656 = vmatmul.mubr.f32.gmra.mxu1 %v4395_v35  ;;  %8282 = vmatmul.mubr.msk.f32.vlgmr.msra.gmra.mxu0 %vm2701_vm2, %v8261_v9  ;;  %v4777_v35 = vld [vmem:[%s12012_s15 + $0x10] sm:$0xff] }
 0x603   :  { %8284 = vmatprep.mubr.msk.f32.mxu0 %vm2701_vm2, %v4311_v41  ;;  %8289 = vmatprep.mubr.msk.f32.mxu1 %vm4779_vm4, %v4775_v6  ;;  %v6558_v41 = vld [vmem:[%s12012_s15 + $0x30] sm:$0xff]  ;;  %v4778_v6 = vld [vmem:[%s12012_s15 + $0x18] sm:$0xff] }
 0x606   :  { %8285 = vmatmul.mubr.msk.f32.gmra.mxu0 %vm2701_vm2, %v8264_v7 }
 0x607   :  { %8297 = vmatprep.mubr.msk.f32.mxu0 %vm4779_vm4, %v6556_v8  ;;  %v6559_v8 = vld [vmem:[%s12012_s15 + $0x38] sm:$0xff] }
 0x6a6   :  { %v7273_v4 = vpop.f32.mrf.mxu0 }
 0x6a8   :  { %v7274_v54 = vpop.f32.mrf.mxu0 }
 0x6a9   :  { %v7275_v15 = vadd.f32 %v7274_v54, %v7273_v4  ;;  %v6564_v4 = vld [vmem:[%s12012_s15 + $0x40] sm:$0xff] }
 0x6aa   :  { %v6572_v54 = vld [vmem:[%s12012_s15 + $0x60] sm:$0xff] }
 0x6ab   :  { %v4558_v27 = vadd.f32 %v7275_v15, %v6545_v13  ;;  %v6589_v15 = vld [vmem:[%s12012_s15 + $0xa8] sm:$0xff] }
 0x6b6   :  { %v7276_v39 = vpop.f32.mrf.mxu0  ;;  %v7317_v19 = vpop.f32.mrf.mxu1 }
 0x6b8   :  { %v7277_v36 = vpop.f32.mrf.mxu0  ;;  %v7318_v56 = vpop.f32.mrf.mxu1 }
 0x6b9   :  { %v7278_v53 = vadd.f32 %v7277_v36, %v7276_v39  ;;  %v7319_v48 = vadd.f32 %v7318_v56, %v7317_v19  ;;  %v6565_v39 = vld [vmem:[%s12012_s15 + $0x48] sm:$0xff]  ;;  %v6566_v36 = vld [vmem:[%s12012_s15 + $0x50] sm:$0xff] }
 0x6ba   :  { %v7279_v22 = vpop.f32.mrf.mxu0  ;;  %v7320_v10 = vpop.f32.mrf.mxu1  ;;  %v6573_v19 = vld [vmem:[%s12012_s15 + $0x68] sm:$0xff]  ;;  %v6574_v56 = vld [vmem:[%s12012_s15 + $0x70] sm:$0xff] }
 0x6bb   :  { %v4563_v38 = vadd.f32 %v7278_v53, %v6545_v13  ;;  %v4643_v63 = vadd.f32 %v7319_v48, %v4558_v27  ;;  %v6580_v53 = vld [vmem:[%s12012_s15 + $0x80] sm:$0xff]  ;;  %v6606_v27 = vld [vmem:[%s12012_s15 + $0xf0] sm:$0xff] }
 0x6bc   :  { %v7280_v12 = vpop.f32.mrf.mxu0  ;;  %v7321_v51 = vpop.f32.mrf.mxu1  ;;  %v6604_v48 = vld [vmem:[%s12012_s15 + $0xe0] sm:$0xff] }
 0x6bd   :  { %v7322_v24 = vadd.f32 %v7321_v51, %v7320_v10  ;;  %v7281_v33 = vadd.f32 %v7280_v12, %v7279_v22  ;;  %v6567_v22 = vld [vmem:[%s12012_s15 + $0x58] sm:$0xff]  ;;  %v6588_v12 = vld [vmem:[%s12012_s15 + $0xa0] sm:$0xff]  ;;  %v6581_v51 = vld [vmem:[%s12012_s15 + $0x88] sm:$0xff] }
 0x6be   :  { %v7282_v29 = vpop.f32.mrf.mxu0  ;;  %v7323_v3 = vpop.f32.mrf.mxu1  ;;  %v6575_v10 = vld [vmem:[%s12012_s15 + $0x78] sm:$0xff] }
 0x6bf   :  { %v4648_v11 = vadd.f32 %v7322_v24, %v4563_v38  ;;  %v4568_v2 = vadd.f32 %v7281_v33, %v6545_v13  ;;  %v6582_v24 = vld [vmem:[%s12012_s15 + $0x90] sm:$0xff]  ;;  %v6596_v38 = vld [vmem:[%s12012_s15 + $0xc0] sm:$0xff] }
 0x6c0   :  { %v7283_v52 = vpop.f32.mrf.mxu0  ;;  %v7324_v25 = vpop.f32.mrf.mxu1  ;;  %v6598_v33 = vld [vmem:[%s12012_s15 + $0xd0] sm:$0xff] }
 0x6c1   :  { %v7284_v14 = vadd.f32 %v7283_v52, %v7282_v29  ;;  %v7325_v49 = vadd.f32 %v7324_v25, %v7323_v3  ;;  %v6583_v29 = vld [vmem:[%s12012_s15 + $0x98] sm:$0xff]  ;;  %v6597_v52 = vld [vmem:[%s12012_s15 + $0xc8] sm:$0xff] }
 0x6c2   :  { %v7326_v28 = vpop.f32.mrf.mxu1  ;;  %v8283_v50 = vpop.f32.mrf.mxu0  ;;  %v6591_v3 = vld [vmem:[%s12012_s15 + $0xb8] sm:$0xff]  ;;  %v6605_v25 = vld [vmem:[%s12012_s15 + $0xe8] sm:$0xff] }
 0x6c3   :  { %v4733_v18 = vadd.f32 %v8283_v50, %v4648_v11  ;;  %v4573_v9 = vadd.f32 %v7284_v14, %v6545_v13  ;;  %v4653_v57 = vadd.f32 %v7325_v49, %v4568_v2  ;;  %v6590_v13 = vld [vmem:[%s12012_s15 + $0xb0] sm:$0xff]  ;;  %v6607_v14 = vld [vmem:[%s12012_s15 + $0xf8] sm:$0xff]  ;;  %v6613_v50 = vld [vmem:[%s12012_s15 + $0x108] sm:$0xff] }
 0x6c4   :  { %v7327_v62 = vpop.f32.mrf.mxu1  ;;  %v4727_v23 = vpop.f32.mrf.mxu0  ;;  %v6599_v11 = vld [vmem:[%s12012_s15 + $0xd8] sm:$0xff]  ;;  %v6614_v49 = vld [vmem:[%s12012_s15 + $0x110] sm:$0xff] }
 0x6c5   :  { %v7328_v20 = vadd.f32 %v7327_v62, %v7326_v28  ;;  %v4728_v43 = vadd.f32 %v4727_v23, %v4643_v63  ;;  %v4747_v26 = vmax.f32 %v4733_v18, 0.0  ;;  %v6612_v28 = vld [vmem:[%s12012_s15 + $0x100] sm:$0xff]  ;;  %v6615_v18 = vld [vmem:[%s12012_s15 + $0x118] sm:$0xff]  ;;  %v5803_v23 = vld [vmem:[%s12016_s16 + $0xf0] sm:$0xff] }
 0x6c6   :  { %v8286_v1 = vpop.f32.mrf.mxu0  ;;  %v5804_v63 = vld [vmem:[%s12016_s16 + $0xf8] sm:$0xff]  ;;  %v5787_v2 = vld [vmem:[%s12016_s16 + $0x70] sm:$0xff] }
 0x6c7   :  { %v4746_v55 = vmax.f32 %v4728_v43, 0.0  ;;  %v4658_v37 = vadd.f32 %v7328_v20, %v4573_v9  ;;  %v4758_v61 = vmul.f32 %v6550_v60, %v4747_v26  ;;  %v5788_v62 = vld [vmem:[%s12016_s16 + $0x78] sm:$0xff]  ;;  %v5802_v20 = vld [vmem:[%s12016_s16 + $0xe8] sm:$0xff]  ;;  %v5835_v26 = vld [vmem:[%s12016_s16 + $0x1f0] sm:$0xff] }
 0x6c8   :  { %v4737_v30 = vpop.f32.mrf.mxu0  ;;  %v5836_v9 = vld [vmem:[%s12016_s16 + $0x1f8] sm:$0xff] }
 0x6c9   :  { %v4757_v0 = vmul.f32 %v6550_v60, %v4746_v55  ;;  %v4743_v16 = vadd.f32 %v8286_v1, %v4658_v37  ;;  %v4738_v47 = vadd.f32 %v4737_v30, %v4653_v57  ;;  %v4769_v45 = vadd.f32 %v6551_v44, %v4758_v61  ;;  %v5820_v43 = vld [vmem:[%s12016_s16 + $0x178] sm:$0xff]  ;;  %v5786_v1 = vld [vmem:[%s12016_s16 + $0x68] sm:$0xff]  ;;  %v5819_v55 = vld [vmem:[%s12016_s16 + $0x170] sm:$0xff] }
 0x6ca   :  { %v5801_v37 = vld [vmem:[%s12016_s16 + $0xe0] sm:$0xff]  ;;  %v5834_v57 = vld [vmem:[%s12016_s16 + $0x1e8] sm:$0xff]  ;;  %v5784_v61 = vld [vmem:[%s12016_s16 + $0x58] sm:$0xff] }
 0x6cb   :  { %v4749_v31 = vmax.f32 %v4743_v16, 0.0  ;;  %v4748_v17 = vmax.f32 %v4738_v47, 0.0  ;;  %v4768_v40 = vadd.f32 %v6551_v44, %v4757_v0  ;;  %v5818_v30 = vld [vmem:[%s12016_s16 + $0x168] sm:$0xff]  ;;  %v5833_v0 = vld [vmem:[%s12016_s16 + $0x1e0] sm:$0xff]  ;;  %v5800_v16 = vld [vmem:[%s12016_s16 + $0xd8] sm:$0xff] }
 0x6cc   :  { %v5817_v47 = vld [vmem:[%s12016_s16 + $0x160] sm:$0xff] }
 0x6cd   :  { %v4760_v46 = vmul.f32 %v6550_v60, %v4749_v31  ;;  %v4759_v5 = vmul.f32 %v6550_v60, %v4748_v17  ;;  %v4772_v59 = vmax.f32 %v4768_v40, %v4769_v45  ;;  %v5785_v60 = vld [vmem:[%s12016_s16 + $0x60] sm:$0xff]  ;;  %v5832_v31 = vld [vmem:[%s12016_s16 + $0x1d8] sm:$0xff]  ;;  %v5799_v17 = vld [vmem:[%s12016_s16 + $0xd0] sm:$0xff] }
 0x6ce   :  { %v5783_v40 = vld [vmem:[%s12016_s16 + $0x50] sm:$0xff] }
 0x6cf   :  { %v4771_v7 = vadd.f32 %v6551_v44, %v4760_v46  ;;  %v4770_v58 = vadd.f32 %v6551_v44, %v4759_v5  ;;  %v5816_v44 = vld [vmem:[%s12016_s16 + $0x158] sm:$0xff]  ;;  %v5831_v46 = vld [vmem:[%s12016_s16 + $0x1d0] sm:$0xff]  ;;  %v5798_v5 = vld [vmem:[%s12016_s16 + $0xc8] sm:$0xff] }
 0x6d0   :  { %v5815_v45 = vld [vmem:[%s12016_s16 + $0x150] sm:$0xff] }
 0x6d1   :  { %v4773_v32 = vmax.f32 %v4770_v58, %v4771_v7  ;;  %v5782_v7 = vld [vmem:[%s12016_s16 + $0x48] sm:$0xff] }
 0x6d2   :  { %v5830_v58 = vld [vmem:[%s12016_s16 + $0x1c8] sm:$0xff] }
 0x6d3   :  { %v11532_v42 = vmax.f32 %v4772_v59, %v4773_v32  ;;  %v5797_v59 = vld [vmem:[%s12016_s16 + $0xc0] sm:$0xff]  ;;  %v5814_v32 = vld [vmem:[%s12016_s16 + $0x148] sm:$0xff] }
 0x6d5   :  { %8287 = vmatprep.subr.mxu1 %v11532_v42  ;;  %8295 = vmatprep.subr.mxu0 %v11532_v42 }
 0x6d6   :  { %8288 = vmatpush3.msra.mxu1 %v11532_v42  ;;  %8296 = vmatpush3.msra.mxu0 %v11532_v42 }
 0x6d7   :  { %8290 = vmatmul.mubr.msk.f32.vlgmr.msra.gmra.mxu1 %vm4779_vm4, %v4776_v34  ;;  %8298 = vmatmul.mubr.msk.f32.vlgmr.msra.gmra.mxu0 %vm4779_vm4, %v6557_v21  ;;  %v5829_v34 = vld [vmem:[%s12016_s16 + $0x1c0] sm:$0xff]  ;;  %v5796_v21 = vld [vmem:[%s12016_s16 + $0xb8] sm:$0xff] }
 0x6d8   :  { %8303 = vmatprep.subr.mxu1 %v11532_v42  ;;  %8311 = vmatprep.subr.mxu0 %v11532_v42 }
 0x6d9   :  { %8304 = vmatpush3.msra.mxu1 %v11532_v42  ;;  %8312 = vmatpush3.msra.mxu0 %v11532_v42 }
 0x6da   :  { %8319 = vmatprep.subr.mxu1 %v11532_v42  ;;  %8327 = vmatprep.subr.mxu0 %v11532_v42 }
 0x6db   :  { %8292 = vmatprep.mubr.msk.f32.mxu1 %vm4779_vm4, %v4777_v35  ;;  %8300 = vmatprep.mubr.msk.f32.mxu0 %vm4779_vm4, %v6558_v41  ;;  %v5813_v35 = vld [vmem:[%s12016_s16 + $0x140] sm:$0xff]  ;;  %v5780_v41 = vld [vmem:[%s12016_s16 + $0x38] sm:$0xff] }
 0x6dc   :  { %8293 = vmatmul.mubr.msk.f32.gmra.mxu1 %vm4779_vm4, %v4778_v6  ;;  %8301 = vmatmul.mubr.msk.f32.gmra.mxu0 %vm4779_vm4, %v6559_v8  ;;  %v5828_v6 = vld [vmem:[%s12016_s16 + $0x1b8] sm:$0xff]  ;;  %v5795_v8 = vld [vmem:[%s12016_s16 + $0xb0] sm:$0xff] }
 0x6dd   :  { %8305 = vmatprep.mubr.msk.f32.mxu1 %vm4779_vm4, %v6564_v4  ;;  %8313 = vmatprep.mubr.msk.f32.mxu0 %vm4779_vm4, %v6572_v54  ;;  %v5812_v4 = vld [vmem:[%s12016_s16 + $0x138] sm:$0xff]  ;;  %v5779_v54 = vld [vmem:[%s12016_s16 + $0x30] sm:$0xff] }
 0x6e0   :  { %8306 = vmatmul.mubr.msk.f32.vlgmr.msra.gmra.mxu1 %vm4779_vm4, %v6565_v39  ;;  %8314 = vmatmul.mubr.msk.f32.vlgmr.msra.gmra.mxu0 %vm4779_vm4, %v6573_v19  ;;  %v5827_v39 = vld [vmem:[%s12016_s16 + $0x1b0] sm:$0xff]  ;;  %v5794_v19 = vld [vmem:[%s12016_s16 + $0xa8] sm:$0xff] }
 0x6e1   :  { %8320 = vmatpush3.msra.mxu1 %v11532_v42  ;;  %8328 = vmatpush3.msra.mxu0 %v11532_v42 }
 0x6e2   :  { %8335 = vmatprep.subr.mxu1 %v11532_v42  ;;  %8343 = vmatprep.subr.mxu0 %v11532_v42 }
 0x6e3   :  { %8308 = vmatprep.mubr.msk.f32.mxu1 %vm4779_vm4, %v6566_v36  ;;  %8316 = vmatprep.mubr.msk.f32.mxu0 %vm4779_vm4, %v6574_v56  ;;  %v5811_v36 = vld [vmem:[%s12016_s16 + $0x130] sm:$0xff]  ;;  %v5778_v56 = vld [vmem:[%s12016_s16 + $0x28] sm:$0xff] }
 0x6e4   :  { %8309 = vmatmul.mubr.msk.f32.gmra.mxu1 %vm4779_vm4, %v6567_v22  ;;  %8317 = vmatmul.mubr.msk.f32.gmra.mxu0 %vm4779_vm4, %v6575_v10  ;;  %v5826_v22 = vld [vmem:[%s12016_s16 + $0x1a8] sm:$0xff]  ;;  %v5793_v10 = vld [vmem:[%s12016_s16 + $0xa0] sm:$0xff] }
 0x6e5   :  { %8321 = vmatprep.mubr.msk.f32.mxu1 %vm4779_vm4, %v6580_v53  ;;  %8329 = vmatprep.mubr.msk.f32.mxu0 %vm4779_vm4, %v6588_v12  ;;  %v5810_v53 = vld [vmem:[%s12016_s16 + $0x128] sm:$0xff]  ;;  %v5777_v12 = vld [vmem:[%s12016_s16 + $0x20] sm:$0xff] }
 0x6e8   :  { %8322 = vmatmul.mubr.msk.f32.vlgmr.msra.gmra.mxu1 %vm4779_vm4, %v6581_v51  ;;  %8330 = vmatmul.mubr.msk.f32.vlgmr.msra.gmra.mxu0 %vm4779_vm4, %v6589_v15  ;;  %v5825_v51 = vld [vmem:[%s12016_s16 + $0x1a0] sm:$0xff]  ;;  %v5792_v15 = vld [vmem:[%s12016_s16 + $0x98] sm:$0xff] }
 0x6e9   :  { %8336 = vmatpush3.msra.mxu1 %v11532_v42  ;;  %8344 = vmatpush3.msra.mxu0 %v11532_v42 }
 0x6ea   :  { %8351 = vmatprep.subr.mxu1 %v11532_v42  ;;  %8324 = vmatprep.mubr.msk.f32.mxu1 %vm4779_vm4, %v6582_v24  ;;  %v5776_v24 = vld [vmem:[%s12016_s16 + $0x18] sm:$0xff] }
 0x6eb   :  { %8332 = vmatprep.mubr.msk.f32.mxu0 %vm4779_vm4, %v6590_v13  ;;  %7386 = vmatprep.subr.mxu0 %v5804_v63  ;;  %v5791_v13 = vld [vmem:[%s12016_s16 + $0x90] sm:$0xff] }
 0x6ec   :  { %8325 = vmatmul.mubr.msk.f32.gmra.mxu1 %vm4779_vm4, %v6583_v29  ;;  %8333 = vmatmul.mubr.msk.f32.gmra.mxu0 %vm4779_vm4, %v6591_v3  ;;  %v5775_v29 = vld [vmem:[%s12016_s16 + $0x10] sm:$0xff] }
 0x6ed   :  { %8337 = vmatprep.mubr.msk.f32.mxu1 %vm4779_vm4, %v6596_v38  ;;  %8345 = vmatprep.mubr.msk.f32.mxu0 %vm4779_vm4, %v6604_v48  ;;  %v5790_v38 = vld [vmem:[%s12016_s16 + $0x88] sm:$0xff] }
 0x6f0   :  { %8338 = vmatmul.mubr.msk.f32.vlgmr.msra.gmra.mxu1 %vm4779_vm4, %v6597_v52  ;;  %8346 = vmatmul.mubr.msk.f32.vlgmr.msra.gmra.mxu0 %vm4779_vm4, %v6605_v25  ;;  %v5774_v52 = vld [vmem:[%s12016_s16 + $0x8] sm:$0xff]  ;;  %v5809_v25 = vld [vmem:[%s12016_s16 + $0x120] sm:$0xff] }
 0x6f1   :  { %8352 = vmatpush3.msra.mxu1 %v11532_v42  ;;  %8348 = vmatprep.mubr.msk.f32.mxu0 %vm4779_vm4, %v6606_v27  ;;  %v5781_v42 = vld [vmem:[%s12016_s16 + $0x40] sm:$0xff]  ;;  %v5824_v27 = vld [vmem:[%s12016_s16 + $0x198] sm:$0xff] }
 0x6f2   :  { %8340 = vmatprep.mubr.msk.f32.mxu1 %vm4779_vm4, %v6598_v33  ;;  %7387 = vmatpush3.msra.mxu0 %v5788_v62  ;;  %v5808_v33 = vld [vmem:[%s12016_s16 + $0x118] sm:$0xff] }
 0x6f3   :  { %7430 = vmatprep.subr.mxu1 %v5836_v9  ;;  %7388 = vmatprep.subr.mxu0 %v5803_v23  ;;  %v5807_v9 = vld [vmem:[%s12016_s16 + $0x110] sm:$0xff] }
 0x6f4   :  { %8349 = vmatmul.mubr.msk.f32.gmra.mxu0 %vm4779_vm4, %v6607_v14  ;;  %8341 = vmatmul.mubr.msk.f32.gmra.mxu1 %vm4779_vm4, %v6599_v11  ;;  %v5789_v14 = vld [vmem:[%s12016_s16 + $0x80] sm:$0xff]  ;;  %v5823_v11 = vld [vmem:[%s12016_s16 + $0x190] sm:$0xff] }
 0x6f5   :  { %8353 = vmatprep.mubr.msk.f32.mxu1 %vm4779_vm4, %v6612_v28  ;;  %7389 = vmatpush3.msra.mxu0 %v5787_v2  ;;  %v5773_v28 = vld [vmem:[%s12016_s16] sm:$0xff] }
 0x6f6   :  { %7390 = vmatprep.subr.mxu0 %v5802_v20 }
 0x6f7   :  { %7391 = vmatpush3.msra.mxu0 %v5786_v1  ;;  %v5822_v1 = vld [vmem:[%s12016_s16 + $0x188] sm:$0xff] }
 0x6f8   :  { %8354 = vmatmul.mubr.msk.f32.vlgmr.msra.gmra.mxu1 %vm4779_vm4, %v6613_v50  ;;  %7392 = vmatprep.subr.mxu0 %v5801_v37 }
 0x6f9   :  { %8356 = vmatprep.mubr.msk.f32.mxu1 %vm4779_vm4, %v6614_v49  ;;  %7431 = vmatpush3.msra.mxu1 %v5820_v43  ;;  %v5844_v43 = vld [vmem:[%s12016_s16 + $0x238] sm:$0xff] }
 0x6fa   :  { %7432 = vmatprep.subr.mxu1 %v5835_v26  ;;  %7393 = vmatpush3.msra.mxu0 %v5785_v60  ;;  %v5806_v26 = vld [vmem:[%s12016_s16 + $0x108] sm:$0xff]  ;;  %v5805_v60 = vld [vmem:[%s12016_s16 + $0x100] sm:$0xff] }
 0x6fb   :  { %7433 = vmatpush3.msra.mxu1 %v5819_v55  ;;  %7394 = vmatprep.subr.mxu0 %v5800_v16  ;;  %v5821_v55 = vld [vmem:[%s12016_s16 + $0x180] sm:$0xff] }
 0x6fc   :  { %8357 = vmatmul.mubr.msk.f32.gmra.mxu1 %vm4779_vm4, %v6615_v18  ;;  %7434 = vmatprep.subr.mxu1 %v5834_v57 }
 0x6fd   :  { %7435 = vmatpush3.msra.mxu1 %v5818_v30  ;;  %7395 = vmatpush3.msra.mxu0 %v5784_v61 }
 0x6fe   :  { %7436 = vmatprep.subr.mxu1 %v5833_v0  ;;  %7396 = vmatprep.subr.mxu0 %v5799_v17 }
 0x6ff   :  { %7437 = vmatpush3.msra.mxu1 %v5817_v47  ;;  %7397 = vmatpush3.msra.mxu0 %v5783_v40 }
 0x700   :  { %7438 = vmatprep.subr.mxu1 %v5832_v31  ;;  %7398 = vmatprep.subr.mxu0 %v5798_v5 }
 0x701   :  { %7439 = vmatpush3.msra.mxu1 %v5816_v44  ;;  %7399 = vmatpush3.msra.mxu0 %v5782_v7 }
 0x702   :  { %7440 = vmatprep.subr.mxu1 %v5831_v46  ;;  %7400 = vmatprep.subr.mxu0 %v5797_v59 }
 0x703   :  { %7441 = vmatpush3.msra.mxu1 %v5815_v45  ;;  %7401 = vmatpush3.msra.mxu0 %v5781_v42 }
 0x704   :  { %7442 = vmatprep.subr.mxu1 %v5830_v58  ;;  %7402 = vmatprep.subr.mxu0 %v5796_v21 }
 0x705   :  { %7443 = vmatpush3.msra.mxu1 %v5814_v32  ;;  %7403 = vmatpush3.msra.mxu0 %v5780_v41 }
 0x706   :  { %7444 = vmatprep.subr.mxu1 %v5829_v34  ;;  %7404 = vmatprep.subr.mxu0 %v5795_v8 }
 0x707   :  { %7445 = vmatpush3.msra.mxu1 %v5813_v35  ;;  %7405 = vmatpush3.msra.mxu0 %v5779_v54 }
 0x708   :  { %7446 = vmatprep.subr.mxu1 %v5828_v6  ;;  %7406 = vmatprep.subr.mxu0 %v5794_v19 }
 0x709   :  { %7447 = vmatpush3.msra.mxu1 %v5812_v4  ;;  %7407 = vmatpush3.msra.mxu0 %v5778_v56 }
 0x70a   :  { %7448 = vmatprep.subr.mxu1 %v5827_v39  ;;  %7408 = vmatprep.subr.mxu0 %v5793_v10 }
 0x70b   :  { %7449 = vmatpush3.msra.mxu1 %v5811_v36  ;;  %7409 = vmatpush3.msra.mxu0 %v5777_v12  ;;  %v5841_v12 = vld [vmem:[%s12016_s16 + $0x220] sm:$0xff] }
 0x70c   :  { %7450 = vmatprep.subr.mxu1 %v5826_v22  ;;  %7410 = vmatprep.subr.mxu0 %v5792_v15  ;;  %v5843_v22 = vld [vmem:[%s12016_s16 + $0x230] sm:$0xff] }
 0x70d   :  { %7451 = vmatpush3.msra.mxu1 %v5810_v53  ;;  %7411 = vmatpush3.msra.mxu0 %v5776_v24  ;;  %v5842_v53 = vld [vmem:[%s12016_s16 + $0x228] sm:$0xff]  ;;  %v5840_v24 = vld [vmem:[%s12016_s16 + $0x218] sm:$0xff] }
 0x70e   :  { %7452 = vmatprep.subr.mxu1 %v5825_v51  ;;  %7412 = vmatprep.subr.mxu0 %v5791_v13 }
 0x70f   :  { %7413 = vmatpush3.msra.mxu0 %v5775_v29  ;;  %7453 = vmatpush3.msra.mxu1 %v5809_v25  ;;  %v5839_v29 = vld [vmem:[%s12016_s16 + $0x210] sm:$0xff] }
 0x710   :  { %7414 = vmatprep.subr.mxu0 %v5790_v38  ;;  %7454 = vmatprep.subr.mxu1 %v5824_v27 }
 0x711   :  { %7415 = vmatpush3.msra.mxu0 %v5774_v52  ;;  %7455 = vmatpush3.msra.mxu1 %v5808_v33  ;;  %v5837_v33 = vld [vmem:[%s12016_s16 + $0x200] sm:$0xff] }
 0x712   :  { %7416 = vmatprep.subr.mxu0 %v5789_v14  ;;  %7456 = vmatprep.subr.mxu1 %v5823_v11 }
 0x713   :  { %7417 = vmatpush3.msra.mxu0 %v5773_v28  ;;  %7457 = vmatpush3.msra.mxu1 %v5807_v9 }
 0x714   :  { %8359 = vmatprep.subr.mxu0 %v5844_v43  ;;  %7458 = vmatprep.subr.mxu1 %v5822_v1 }
 0x715   :  { %7459 = vmatpush3.msra.mxu1 %v5806_v26 }
 0x716   :  { %7460 = vmatprep.subr.mxu1 %v5821_v55 }
 0x717   :  { %7461 = vmatpush3.msra.mxu1 %v5805_v60 }
 0x797   :  { %v8299_v3 = vpop.f32.mrf.mxu0  ;;  %v8291_v7 = vpop.f32.mrf.mxu1 }
 0x799   :  { %v4960_v48 = vpop.f32.mrf.mxu0  ;;  %v4858_v58 = vpop.f32.mrf.mxu1 }
 0x79c   :  { %v8302_v50 = vpop.f32.mrf.mxu0  ;;  %v11891_v59 = vpop.f32.mrf.mxu1 }
 0x79e   :  { %v4970_v49 = vpop.f32.mrf.mxu0  ;;  %v11893_v32 = vpop.f32.mrf.mxu1 }
 0x7a0   :  { %v8315_v18 = vpop.f32.mrf.mxu0  ;;  %v8307_v42 = vpop.f32.mrf.mxu1 }
 0x7a2   :  { %v5164_v63 = vpop.f32.mrf.mxu0  ;;  %v5062_v34 = vpop.f32.mrf.mxu1 }
 0x7a3   :  { %v8603_v62 = vpack.i.bf16 %v4960_v48, %v5164_v63 }
 0x7a4   :  { %v8318_v23 = vpop.f32.mrf.mxu0  ;;  %v11895_v21 = vpop.f32.mrf.mxu1 }
 0x7a5   :  { %8604 = vrot.lane.b32.xlu0 %v8603_v62, %s8643_s6 }
 0x7a6   :  { %v5174_v2 = vpop.f32.mrf.mxu0  ;;  %v5072_v35 = vpop.f32.mrf.mxu1 }
 0x7a8   :  { %v8331_v20 = vpop.f32.mrf.mxu0  ;;  %v11897_v41 = vpop.f32.mrf.mxu1 }
 0x7a9   :  { %v8623_v16 = vpack.i.bf16 %v8331_v20, %v4970_v49 }
 0x7aa   :  { %v5368_v37 = vpop.f32.mrf.mxu0  ;;  %v5266_v6 = vpop.f32.mrf.mxu1 }
 0x7ab   :  { %v8608_v57 = vpack.i.bf16 %v5368_v37, %v8299_v3  ;;  %v5838_v3 = vld [vmem:[%s12016_s16 + $0x208] sm:$0xff] }
 0x7ac   :  { %v8334_v30 = vpop.f32.mrf.mxu0  ;;  %v11899_v8 = vpop.f32.mrf.mxu1 }
 0x7ad   :  { %8609 = vrot.lane.b32.xlu0 %v8608_v57, %s8643_s6 }
 0x7ae   :  { %v5378_v0 = vpop.f32.mrf.mxu0  ;;  %v11901_v19 = vpop.f32.mrf.mxu1 }
 0x7af   :  { %v8628_v31 = vpack.i.bf16 %v5378_v0, %v8302_v50 }
 0x7b0   :  { %v8347_v47 = vpop.f32.mrf.mxu0  ;;  %v8339_v10 = vpop.f32.mrf.mxu1 }
 0x7b1   :  { %8624 = vrot.lane.b32.xlu0 %v8623_v16, %s8643_s6  ;;  %v8618_v40 = vpack.i.bf16 %v8347_v47, %v5174_v2 }
 0x7b2   :  { %v5572_v61 = vpop.f32.mrf.mxu0  ;;  %v5470_v15 = vpop.f32.mrf.mxu1 }
 0x7b3   :  { %v8613_v17 = vpack.i.bf16 %v5572_v61, %v8315_v18 }
 0x7b4   :  { %v8350_v44 = vpop.f32.mrf.mxu0  ;;  %v11917_v13 = vpop.f32.mrf.mxu1 }
 0x7b5   :  { %8614 = vrot.lane.b32.xlu1 %v8613_v17, %s8643_s6  ;;  %8629 = vrot.lane.b32.xlu0 %v8628_v31, %s8643_s6  ;;  %v8638_v45 = vpack.i.bf16 %v8334_v30, %v8350_v44 }
 0x7b6   :  { %v5582_v46 = vpop.f32.mrf.mxu0  ;;  %v5480_v48 = vpop.f32.mrf.mxu1 }
 0x7b7   :  { %v8633_v5 = vpack.i.bf16 %v5582_v46, %v8318_v23 }
 0x7b8   :  { %v8355_v49 = vpop.f32.mrf.mxu1 }
 0x7b9   :  { %8619 = vrot.lane.b32.xlu1 %v8618_v40, %s8643_s6 }
 0x7ba   :  { %v5674_v55 = vpop.f32.mrf.mxu1 }
 0x7bc   :  { %v8358_v17 = vpop.f32.mrf.mxu1 }
 0x7bd   :  { %8634 = vrot.lane.b32.xlu1 %v8633_v5, %s8643_s6 }
 0x7c1   :  { %8639 = vrot.lane.b32.xlu1 %v8638_v45, %s8643_s6 }
 0x817   :  { %v8605_v4 = vpop.permute.xlu0 %8604 }
 0x818   :  { %v8607_v54 = vunpack.i.h.bf16 %v8605_v4  ;;  %v8606_v39 = vunpack.i.l.bf16 %v8605_v4  ;;  %v6148_v4 = vld [vmem:[%s12017_s20] sm:$0xff] }
 0x81a   :  { %v5757_v36 = vsel %vm2701_vm2, %v4858_v58, %v8607_v54  ;;  %v5761_v56 = vsel %vm2701_vm2, %v5062_v34, %v8606_v39  ;;  %v6154_v34 = vld [vmem:[%s12017_s20 + $0x30] sm:$0xff] }
 0x81b   :  { %5928 = vmatprep.mubr.f32.mxu0 %v5761_v56 }
 0x81c   :  { %5929 = vmatmul.mubr.f32.vlgmr.msra.gmra.mxu0 %v5757_v36 }
 0x81d   :  { %8360 = vmatpush3.msra.mxu0 %v5844_v43 }
 0x81e   :  { %8361 = vmatprep.subr.mxu0 %v5843_v22 }
 0x81f   :  { %8362 = vmatpush3.msra.mxu0 %v5843_v22  ;;  %v8610_v51 = vpop.permute.xlu0 %8609 }
 0x820   :  { %8363 = vmatprep.subr.mxu0 %v5842_v53  ;;  %v8612_v25 = vunpack.i.h.bf16 %v8610_v51  ;;  %v8611_v27 = vunpack.i.l.bf16 %v8610_v51 }
 0x821   :  { %8364 = vmatpush3.msra.mxu0 %v5842_v53 }
 0x822   :  { %8365 = vmatprep.subr.mxu0 %v5841_v12  ;;  %v5765_v18 = vsel %vm2701_vm2, %v5266_v6, %v8612_v25  ;;  %v5758_v2 = vsel %vm2701_vm2, %v8291_v7, %v8611_v27  ;;  %v6150_v6 = vld [vmem:[%s12017_s20 + $0x10] sm:$0xff] }
 0x823   :  { %8366 = vmatpush3.msra.mxu0 %v5841_v12  ;;  %v8625_v38 = vpop.permute.xlu0 %8624 }
 0x824   :  { %8367 = vmatprep.subr.mxu0 %v5840_v24  ;;  %v8627_v62 = vunpack.i.h.bf16 %v8625_v38  ;;  %v8626_v23 = vunpack.i.l.bf16 %v8625_v38 }
 0x825   :  { %8368 = vmatpush3.msra.mxu0 %v5840_v24 }
 0x826   :  { %8369 = vmatprep.subr.mxu0 %v5839_v29  ;;  %v5759_v30 = vsel %vm2701_vm2, %v11893_v32, %v8626_v23  ;;  %v5766_v0 = vsel %vm2701_vm2, %v11897_v41, %v8627_v62  ;;  %v5684_v32 = vpop.f32.mrf.mxu1  ;;  %v6151_v41 = vld [vmem:[%s12017_s20 + $0x18] sm:$0xff] }
 0x827   :  { %v8615_v52 = vpop.permute.xlu1 %8614  ;;  %8370 = vmatpush3.msra.mxu0 %v5839_v29  ;;  %v8630_v43 = vpop.permute.xlu0 %8629  ;;  %v6620_v29 = vld [vmem:[%s12018_s17] ss:$0 sm:$0xff] }
 0x828   :  { %v8617_v14 = vunpack.i.h.bf16 %v8615_v52  ;;  %v8616_v11 = vunpack.i.l.bf16 %v8615_v52  ;;  %8371 = vmatprep.subr.mxu0 %v5838_v3  ;;  %v8632_v57 = vunpack.i.h.bf16 %v8630_v43  ;;  %v8631_v60 = vunpack.i.l.bf16 %v8630_v43 }
 0x829   :  { %8372 = vmatpush3.msra.mxu0 %v5838_v3 }
 0x82a   :  { %v5762_v28 = vsel %vm2701_vm2, %v8307_v42, %v8616_v11  ;;  %v5769_v50 = vsel %vm2701_vm2, %v5470_v15, %v8617_v14  ;;  %8373 = vmatprep.subr.mxu0 %v5837_v33  ;;  %v5760_v40 = vsel %vm2701_vm2, %v11891_v59, %v8631_v60  ;;  %v5767_v46 = vsel %vm2701_vm2, %v11901_v19, %v8632_v57  ;;  %v6155_v42 = vld [vmem:[%s12017_s20 + $0x38] sm:$0xff] }
 0x82b   :  { %v8620_v63 = vpop.permute.xlu1 %8619  ;;  %5933 = vmatprep.mubr.f32.mxu0 %v5762_v28  ;;  %6013 = vmatprep.mubr.f32.mxu1 %v5769_v50  ;;  %v8644_v59 = vmov 0.0  }
 0x82c   :  { %v8622_v9 = vunpack.i.h.bf16 %v8620_v63  ;;  %v8621_v20 = vunpack.i.l.bf16 %v8620_v63  ;;  %5934 = vmatmul.mubr.f32.gmra.mxu0 %v5758_v2  ;;  %6014 = vmatmul.mubr.f32.vlgmr.msra.gmra.mxu1 %v5765_v18 }
 0x82d   :  { %8374 = vmatpush3.msra.mxu0 %v5837_v33  ;;  %8381 = vmatprep.subr.mxu1 %v8644_v59 }
 0x82e   :  { %v5763_v1 = vsel %vm2701_vm2, %v5072_v35, %v8621_v20  ;;  %v5770_v26 = vsel %vm2701_vm2, %v8339_v10, %v8622_v9  ;;  %8382 = vmatpush3.msra.mxu1 %v6155_v42  ;;  %v6152_v35 = vld [vmem:[%s12017_s20 + $0x20] sm:$0xff] }
 0x82f   :  { %v8635_v37 = vpop.permute.xlu1 %8634  ;;  %5938 = vmatprep.mubr.f32.mxu0 %v5763_v1  ;;  %6018 = vmatprep.mubr.f32.mxu1 %v5770_v26 }
 0x830   :  { %v8637_v16 = vunpack.i.h.bf16 %v8635_v37  ;;  %v8636_v47 = vunpack.i.l.bf16 %v8635_v37  ;;  %5939 = vmatmul.mubr.f32.gmra.mxu0 %v5759_v30  ;;  %6019 = vmatmul.mubr.f32.gmra.mxu1 %v5766_v0  ;;  %v6625_v30 = vld [vmem:[%s12019_s18] ss:$0 sm:$0xff] }
 0x831   :  { %8383 = vmatprep.subr.mxu1 %v8644_v59 }
 0x832   :  { %v5764_v61 = vsel %vm2701_vm2, %v11895_v21, %v8636_v47  ;;  %v5771_v31 = vsel %vm2701_vm2, %v5480_v48, %v8637_v16  ;;  %8384 = vmatpush3.msra.mxu1 %v6154_v34  ;;  %v6153_v21 = vld [vmem:[%s12017_s20 + $0x28] sm:$0xff] }
 0x833   :  { %v8640_v44 = vpop.permute.xlu1 %8639  ;;  %5943 = vmatprep.mubr.f32.mxu0 %v5764_v61  ;;  %6023 = vmatprep.mubr.f32.mxu1 %v5771_v31 }
 0x834   :  { %v8642_v5 = vunpack.i.h.bf16 %v8640_v44  ;;  %v8641_v45 = vunpack.i.l.bf16 %v8640_v44  ;;  %5944 = vmatmul.mubr.f32.gmra.mxu0 %v5760_v40  ;;  %6024 = vmatmul.mubr.f32.gmra.mxu1 %v5767_v46  ;;  %v6626_v40 = vld [vmem:[%s12020_s19] ss:$0 sm:$0xff] }
 0x835   :  { %8375 = vmatprep.mubr.msk.f32.mxu0 %vm2701_vm2, %v5674_v55  ;;  %8385 = vmatprep.subr.mxu1 %v8644_v59 }
 0x836   :  { %v5772_v7 = vsel %vm2701_vm2, %v11917_v13, %v8641_v45  ;;  %v5768_v58 = vsel %vm2701_vm2, %v11899_v8, %v8642_v5  ;;  %8386 = vmatpush3.msra.mxu1 %v6153_v21  ;;  %v6149_v8 = vld [vmem:[%s12017_s20 + $0x8] sm:$0xff]  ;;  %v29_v21 = vstv %s12021_s23 }
 0x837   :  { %6028 = vmatprep.mubr.f32.mxu1 %v5772_v7  ;;  %8387 = vmatprep.subr.mxu1 %v8644_v59  ;;  %30 = vst [vmem:[#allocation2] sm:$0x1] %v29_v21 }
 0x838   :  { %6029 = vmatmul.mubr.f32.gmra.mxu1 %v5768_v58  ;;  %8376 = vmatmul.mubr.msk.f32.vlgmr.msra.gmra.mxu0 %vm2701_vm2, %v8355_v49 }
 0x839   :  { %8378 = vmatprep.mubr.msk.f32.mxu0 %vm2701_vm2, %v5684_v32  ;;  %8388 = vmatpush3.msra.mxu1 %v6152_v35  ;;  %v6627_v35 = vld [vmem:[%s12022_s21] ss:$0 sm:$0xff] }
 0x83a   :  { %8389 = vmatprep.subr.mxu1 %v8644_v59  ;;  %8397 = vmatprep.mubr.msk.f32.mxu1 %vm8645_vm5, %v8644_v59 }
 0x83b   :  { %8390 = vmatpush3.msra.mxu1 %v6151_v41 }
 0x83c   :  { %8379 = vmatmul.mubr.msk.f32.gmra.mxu0 %vm2701_vm2, %v8358_v17  ;;  %8391 = vmatprep.subr.mxu1 %v8644_v59 }
 0x83d   :  { %8392 = vmatpush3.msra.mxu1 %v6150_v6 }
 0x83e   :  { %8393 = vmatprep.subr.mxu1 %v8644_v59 }
 0x83f   :  { %8394 = vmatpush3.msra.mxu1 %v6149_v8 }
 0x840   :  { %8395 = vmatprep.subr.mxu1 %v8644_v59 }
 0x841   :  { %8396 = vmatpush3.msra.mxu1 %v6148_v4  ;;  %v6629_v4 = vld [vmem:[%s12023_s22] ss:$0 sm:$0xff] }
 0x8dc   :  { %v7418_v54 = vpop.f32.mrf.mxu0 }
 0x8de   :  { %v7419_v39 = vpop.f32.mrf.mxu0 }
 0x8df   :  { %v7420_v24 = vadd.f32 %v7419_v39, %v7418_v54 }
 0x8e1   :  { %v5931_v33 = vadd.f32 %v7420_v24, %v6620_v29 }
 0x8ec   :  { %v7421_v19 = vpop.f32.mrf.mxu0  ;;  %v7462_v36 = vpop.f32.mrf.mxu1 }
 0x8ee   :  { %v7422_v56 = vpop.f32.mrf.mxu0  ;;  %v7463_v22 = vpop.f32.mrf.mxu1 }
 0x8ef   :  { %v7423_v12 = vadd.f32 %v7422_v56, %v7421_v19  ;;  %v7464_v52 = vadd.f32 %v7463_v22, %v7462_v36  ;;  %v6630_v36 = vld [vmem:[#allocation2] ss:$0 sm:$0xff] }
 0x8f0   :  { %v7424_v10 = vpop.f32.mrf.mxu0  ;;  %v7465_v53 = vpop.f32.mrf.mxu1 }
 0x8f1   :  { %v5936_v48 = vadd.f32 %v7423_v12, %v6620_v29  ;;  %v6016_v62 = vadd.f32 %v7464_v52, %v5931_v33 }
 0x8f2   :  { %v7425_v51 = vpop.f32.mrf.mxu0  ;;  %v7466_v15 = vpop.f32.mrf.mxu1 }
 0x8f3   :  { %v7467_v13 = vadd.f32 %v7466_v15, %v7465_v53  ;;  %v7426_v14 = vadd.f32 %v7425_v51, %v7424_v10 }
 0x8f4   :  { %v7427_v3 = vpop.f32.mrf.mxu0  ;;  %v7468_v38 = vpop.f32.mrf.mxu1 }
 0x8f5   :  { %v6021_v28 = vadd.f32 %v7467_v13, %v5936_v48  ;;  %v5941_v9 = vadd.f32 %v7426_v14, %v6620_v29 }
 0x8f6   :  { %v7428_v25 = vpop.f32.mrf.mxu0  ;;  %v7469_v27 = vpop.f32.mrf.mxu1 }
 0x8f7   :  { %v7429_v11 = vadd.f32 %v7428_v25, %v7427_v3  ;;  %v7470_v18 = vadd.f32 %v7469_v27, %v7468_v38 }
 0x8f8   :  { %v7471_v50 = vpop.f32.mrf.mxu1  ;;  %v8377_v49 = vpop.f32.mrf.mxu0 }
 0x8f9   :  { %v6106_v63 = vadd.f32 %v8377_v49, %v6021_v28  ;;  %v5946_v20 = vadd.f32 %v7429_v11, %v6620_v29  ;;  %v6026_v60 = vadd.f32 %v7470_v18, %v5941_v9 }
 0x8fa   :  { %v7472_v23 = vpop.f32.mrf.mxu1  ;;  %v6100_v2 = vpop.f32.mrf.mxu0 }
 0x8fb   :  { %v7473_v43 = vadd.f32 %v7472_v23, %v7471_v50  ;;  %v6101_v1 = vadd.f32 %v6100_v2, %v6016_v62  ;;  %v6120_v55 = vmax.f32 %v6106_v63, 0.0 }
 0x8fc   :  { %v8380_v26 = vpop.f32.mrf.mxu0 }
 0x8fd   :  { %v6119_v37 = vmax.f32 %v6101_v1, 0.0  ;;  %v6031_v57 = vadd.f32 %v7473_v43, %v5946_v20  ;;  %v6131_v31 = vmul.f32 %v6625_v30, %v6120_v55 }
 0x8fe   :  { %v6110_v0 = vpop.f32.mrf.mxu0 }
 0x8ff   :  { %v6130_v16 = vmul.f32 %v6625_v30, %v6119_v37  ;;  %v6116_v47 = vadd.f32 %v8380_v26, %v6031_v57  ;;  %v6111_v61 = vadd.f32 %v6110_v0, %v6026_v60  ;;  %v6142_v7 = vadd.f32 %v6626_v40, %v6131_v31 }
 0x901   :  { %v6122_v17 = vmax.f32 %v6116_v47, 0.0  ;;  %v6121_v44 = vmax.f32 %v6111_v61, 0.0  ;;  %v6141_v46 = vadd.f32 %v6626_v40, %v6130_v16 }
 0x903   :  { %v6133_v5 = vmul.f32 %v6625_v30, %v6122_v17  ;;  %v6132_v45 = vmul.f32 %v6625_v30, %v6121_v44  ;;  %v6145_v59 = vmax.f32 %v6141_v46, %v6142_v7 }
 0x905   :  { %v6144_v58 = vadd.f32 %v6626_v40, %v6133_v5  ;;  %v6143_v32 = vadd.f32 %v6626_v40, %v6132_v45 }
 0x907   :  { %v6146_v42 = vmax.f32 %v6143_v32, %v6144_v58 }
 0x909   :  { %v6147_v34 = vmax.f32 %v6145_v59, %v6146_v42 }
 0x90b   :  { %8398 = vmatmul.mubr.msk.f32.vlgmr.msra.gmra.mxu1 %vm2701_vm2, %v6147_v34 }
 0x9cb   :  { %v6232_v41 = vpop.f32.mrf.mxu1 }
 0x9cc   :  { %v6233_v6 = vadd.f32 %v6627_v35, %v6232_v41 }
 0x9cd   :  { %v8399_v8 = vpop.f32.mrf.mxu1 }
 0x9ce   :  { %v6236_v54 = vmax.f32 %v6233_v6, 0.0 }
 0x9d0   :  { %v6244_v39 = vmul.f32 %v6629_v4, %v6236_v54 }
 0x9d2   :  { %v6245_v19 = vsel %vm2701_vm2, %v6244_v39, 0.0 }
 0x9d3   :  { %6246 = vadd.xlane.f32.xlu0 %v6245_v19 }
 0xa5c   :  { %v6247_v56 = vpop.xlane.xlu0 %6246 }
 0xa5d   :  { %v6255_v22 = vadd.f32 %v6630_v36, %v6247_v56 }
 0xa5f   :  { %6257 = vst.msk [vmem:[%s12024_s24] sm:$0xff] %vm6256_vm6, %v6255_v22 }

</bundles_post_ra>
